<compile_context>
chip_gen: v6e
topology: v6e:2x2x1
jax: 0.10.0
libtpu: 0.0.40
codegen_flags: <defaults>
</compile_context>

<pallas_src>
import math
from functools import partial

import numpy as np
import jax
import jax.numpy as jnp
from jax import lax
from jax.experimental import pallas as pl
from jax.experimental.pallas import tpu as pltpu


# ----------------------------- in-kernel helpers -----------------------------

def _gelu(x):
    # TODO(synk): PyTorch nn.GELU defaults to the exact erf form; tanh approximation
    # used for Mosaic-safe lowering (max abs diff ~1e-3).
    c = math.sqrt(2.0 / math.pi)
    return 0.5 * x * (1.0 + jnp.tanh(c * (x + 0.044715 * x * x * x)))


def _layernorm(x, gamma, beta, eps=1e-5):
    mean = jnp.mean(x, axis=-1, keepdims=True)
    var = jnp.mean((x - mean) ** 2, axis=-1, keepdims=True)
    return (x - mean) * lax.rsqrt(var + eps) * gamma + beta


def _encoder_block(x, get, bp, num_heads, batch, seq_len):
    """TransformerEncoderBlock on a (B*T, D) slab (batch folded along sublanes)."""
    BT, D = x.shape
    H = num_heads
    hd = D // H

    cos = get(bp["cos"])          # (B*T, D) per-head tiled cos table
    sin = get(bp["sin"])          # (B*T, D) per-head tiled sin table

    # One full-width fused matmul producing [q/sqrt(hd) | k | v | q/sqrt(hd)@R | k@R].
    qkv = jnp.dot(x, get(bp["wqkv"]), preferred_element_type=jnp.float32) + get(bp["bqkv"])
    q = qkv[:, 0:D] * cos + qkv[:, 3 * D:4 * D] * sin      # = RoPE(q) / sqrt(hd)
    k = qkv[:, D:2 * D] * cos + qkv[:, 4 * D:5 * D] * sin  # = RoPE(k)
    v = qkv[:, 2 * D:3 * D]

    def split_heads(z):   # (B*T, D) -> (B*H, T, hd); sequences/heads on leading batch axis
        return jnp.stack(
            [z[b * seq_len:(b + 1) * seq_len, h * hd:(h + 1) * hd]
             for b in range(batch) for h in range(H)], axis=0)

    qh, kh, vh = split_heads(q), split_heads(k), split_heads(v)

    s = lax.dot_general(qh, kh, (((2,), (2,)), ((0,), (0,))),
                        preferred_element_type=jnp.float32)        # (B*H, T, T)
    s = s - jnp.max(s, axis=-1, keepdims=True)
    p = jnp.exp(s)
    attn = p * pl.reciprocal(jnp.sum(p, axis=-1, keepdims=True), approx=True)
    ctx = lax.dot_general(attn, vh, (((2,), (1,)), ((0,), (0,))),
                          preferred_element_type=jnp.float32)      # (B*H, T, hd)

    # Re-assemble lane-dense (B*T, D): heads along lanes, sequences along sublanes.
    ctx_flat = jnp.concatenate(
        [jnp.concatenate([ctx[b * H + h] for h in range(H)], axis=-1)
         for b in range(batch)], axis=0)

    attn_out = jnp.dot(ctx_flat, get(bp["wo"]),
                       preferred_element_type=jnp.float32) + get(bp["bo"])

    x = _layernorm(x + attn_out, get(bp["g1"]), get(bp["b1"]))
    h1 = _gelu(jnp.dot(x, get(bp["w1"]), preferred_element_type=jnp.float32)
               + get(bp["bf1"]))
    ffn = jnp.dot(h1, get(bp["w2"]), preferred_element_type=jnp.float32) + get(bp["bf2"])
    return _layernorm(x + ffn, get(bp["g2"]), get(bp["b2"]))


def _projection(x, get, pp):
    """Linear -> LayerNorm -> GELU."""
    y = jnp.dot(x, get(pp["w"]), preferred_element_type=jnp.float32) + get(pp["b"])
    return _gelu(_layernorm(y, get(pp["g"]), get(pp["beta"])))


# --------------------------- single fused forward kernel ---------------------------

def _rctnet_kernel(*refs, plan, num_heads, m_iterations, batch, seq_len):
    x_ref = refs[0]
    o_ref = refs[-1]
    w = refs[1:-1]

    def get(i):
        return w[i][...]

    x = x_ref[...]                                   # (B*T, D_initial)
    for bp in plan["initial"]:
        x = _encoder_block(x, get, bp, num_heads, batch, seq_len)
    x = _projection(x, get, plan["proj1"])
    # TODO(synk): for large m_iterations switch to lax.fori_loop with x as carry.
    for _ in range(m_iterations):
        for bp in plan["recurrent"]:
            x = _encoder_block(x, get, bp, num_heads, batch, seq_len)
    x = _projection(x, get, plan["proj2"])
    for bp in plan["final"]:
        x = _encoder_block(x, get, bp, num_heads, batch, seq_len)

    # Last token of each sequence -> (B, D_final); 128-lane-padded head matmul.
    last = jnp.concatenate(
        [x[(b + 1) * seq_len - 1:(b + 1) * seq_len, :] for b in range(batch)], axis=0)
    o_ref[...] = (jnp.dot(last, get(plan["head_w"]),
                          preferred_element_type=jnp.float32) + get(plan["head_b"]))


# ------------------------------ host-side packing ------------------------------

def _rope_tables(batch, seq_len, head_dim, num_heads):
    """(B*T, D) cos/sin tables tiled over heads and batch (compile-time constants)."""
    half = head_dim // 2
    pos = np.arange(seq_len, dtype=np.float32)[:, None]
    inv_freq = 1.0 / (10000.0 ** (np.arange(half, dtype=np.float32) / half))
    ang = pos * inv_freq[None, :]                                  # (T, half)
    cos_h = np.concatenate([np.cos(ang), np.cos(ang)], axis=-1)    # (T, hd)
    sin_h = np.concatenate([np.sin(ang), np.sin(ang)], axis=-1)
    cos = np.tile(cos_h, (batch, num_heads)).astype(np.float32)    # (B*T, D)
    sin = np.tile(sin_h, (batch, num_heads)).astype(np.float32)
    return cos, sin


def _rotate_half_matrix(d_model, head_dim):
    """Block-diagonal R with (x @ R) == per-head rotate_half(x) = [-x2, x1]."""
    half = head_dim // 2
    blk = np.zeros((head_dim, head_dim), np.float32)
    idx = np.arange(half)
    blk[idx + half, idx] = -1.0
    blk[idx, idx + half] = 1.0
    R = np.zeros((d_model, d_model), np.float32)
    for h0 in range(0, d_model, head_dim):
        R[h0:h0 + head_dim, h0:h0 + head_dim] = blk
    return jnp.asarray(R)


def _pack_args(params, config, batch, seq_len, out_pad):
    """Flatten all weights (lane-dense layouts) into one arg list + index 'plan'."""
    flat = []

    def add(a):
        # TODO(synk): cast to bf16 on v6e/v7x (keep f32 matmul accumulation).
        flat.append(jnp.asarray(a, jnp.float32))
        return len(flat) - 1

    H = config["num_heads"]
    rope_cache = {}

    def rope_ids(hd):
        if hd not in rope_cache:
            cos, sin = _rope_tables(batch, seq_len, hd, H)
            rope_cache[hd] = {"cos": add(cos), "sin": add(sin)}
        return rope_cache[hd]

    def block_ids(blk):
        D = blk["qw"].shape[0]
        hd = D // H
        assert D % H == 0 and hd % 2 == 0, "invalid head dimension for RoPE"
        scale = 1.0 / math.sqrt(hd)
        R = _rotate_half_matrix(D, hd)
        wq = blk["qw"] * scale                 # fold 1/sqrt(hd) into q (RoPE is linear)
        bq = blk["qb"] * scale
        wqkv = jnp.concatenate([wq, blk["kw"], blk["vw"], wq @ R, blk["kw"] @ R], axis=1)
        bqkv = jnp.concatenate([bq, blk["kb"], blk["vb"], bq @ R, blk["kb"] @ R], axis=1)
        ids = {
            "wqkv": add(wqkv), "bqkv": add(bqkv),            # (D, 5D), (1, 5D)
            "wo": add(blk["ow"]), "bo": add(blk["ob"]),       # (D, D), (1, D)
            "g1": add(blk["ln1g"]), "b1": add(blk["ln1b"]),
            "w1": add(blk["w1"]), "bf1": add(blk["b1"]),
            "w2": add(blk["w2"]), "bf2": add(blk["b2"]),
            "g2": add(blk["ln2g"]), "b2": add(blk["ln2b"]),
        }
        ids.update(rope_ids(hd))
        return ids

    def proj_ids(p):
        return {k: add(p[k]) for k in ("w", "b", "g", "beta")}

    out_dim = config["output_dim"]
    hw = params["output_head"]["w"]
    hb = params["output_head"]["b"]
    hw_p = jnp.zeros((hw.shape[0], out_pad), jnp.float32).at[:, :out_dim].set(hw)
    hb_p = jnp.zeros((1, out_pad), jnp.float32).at[:, :out_dim].set(hb)

    plan = {
        "initial": [block_ids(b) for b in params["initial_blocks"]],
        "proj1": proj_ids(params["proj_init_to_rec"]),
        "recurrent": [block_ids(b) for b in params["recurrent_blocks"]],
        "proj2": proj_ids(params["proj_rec_to_final"]),
        "final": [block_ids(b) for b in params["final_blocks"]],
        "head_w": add(hw_p),
        "head_b": add(hb_p),
    }
    return flat, plan


def _const_spec(a):
    # Full-array block with constant index map: DMA'd once for the single grid step.
    return pl.BlockSpec(a.shape, lambda i, z=(0,) * a.ndim: z)


# ------------------------------ full model forward ------------------------------

def rctnet_forward(params, input_tokens, m_iterations, config):
    B, T = input_tokens.shape
    D_in = config["D_initial"]
    out_dim = config["output_dim"]
    out_pad = max(128, ((out_dim + 127) // 128) * 128)

    # Embedding lookup + (B,T,D)->(B*T,D) flatten are plain-JAX glue in the same
    # jitted program; embed/block dropouts are identity at inference.
    x = jnp.take(params["embedding"], input_tokens, axis=0).reshape(B * T, D_in)

    flat, plan = _pack_args(params, config, B, T, out_pad)
    kernel = partial(_rctnet_kernel, plan=plan, num_heads=config["num_heads"],
                     m_iterations=m_iterations, batch=B, seq_len=T)

    out = pl.pallas_call(
        kernel,
        out_shape=jax.ShapeDtypeStruct((B, out_pad), jnp.float32),
        grid=(1,),                                   # batch folded into one step
        in_specs=[_const_spec(x)] + [_const_spec(a) for a in flat],
        out_specs=pl.BlockSpec((B, out_pad), lambda i: (0, 0)),
        compiler_params=pltpu.CompilerParams(
            dimension_semantics=("arbitrary",),
            vmem_limit_bytes=32 * 1024 * 1024),
    )(x, *flat)
    return out[:, :out_dim]


# ------------------------------ deterministic init ------------------------------

def _init_block(key, d_model, d_ff):
    ks = jax.random.split(key, 6)
    z = lambda n: jnp.zeros((1, n), jnp.float32)
    one = lambda n: jnp.ones((1, n), jnp.float32)
    nrm = lambda k, s: jax.random.normal(k, s, jnp.float32) * 0.02
    return {
        "qw": nrm(ks[0], (d_model, d_model)), "qb": z(d_model),
        "kw": nrm(ks[1], (d_model, d_model)), "kb": z(d_model),
        "vw": nrm(ks[2], (d_model, d_model)), "vb": z(d_model),
        "ow": nrm(ks[3], (d_model, d_model)), "ob": z(d_model),
        "ln1g": one(d_model), "ln1b": z(d_model),
        "w1": nrm(ks[4], (d_model, d_ff)), "b1": z(d_ff),
        "w2": nrm(ks[5], (d_ff, d_model)), "b2": z(d_model),
        "ln2g": one(d_model), "ln2b": z(d_model),
    }


def _init_proj(key, d_in, d_out):
    return {"w": jax.random.normal(key, (d_in, d_out), jnp.float32) * 0.02,
            "b": jnp.zeros((1, d_out), jnp.float32),
            "g": jnp.ones((1, d_out), jnp.float32),
            "beta": jnp.zeros((1, d_out), jnp.float32)}


def init_params(key, cfg):
    ks = jax.random.split(key, 8)
    params = {
        "embedding": jax.random.normal(
            ks[0], (cfg["vocab_size"], cfg["D_initial"]), jnp.float32) * 0.02,
        "initial_blocks": [
            _init_block(jax.random.fold_in(ks[1], i), cfg["D_initial"], cfg["d_ff"])
            for i in range(cfg["N_initial"])],
        "proj_init_to_rec": _init_proj(ks[2], cfg["D_initial"], cfg["D_recurrent"]),
        "recurrent_blocks": [
            _init_block(jax.random.fold_in(ks[3], i), cfg["D_recurrent"], cfg["d_ff"])
            for i in range(cfg["L_recurrent"])],
        "proj_rec_to_final": _init_proj(ks[4], cfg["D_recurrent"], cfg["D_final"]),
        "final_blocks": [
            _init_block(jax.random.fold_in(ks[5], i), cfg["D_final"], cfg["d_ff"])
            for i in range(cfg["N_final"])],
        "output_head": {
            "w": jax.random.normal(ks[6], (cfg["D_final"], cfg["output_dim"]),
                                   jnp.float32) * 0.02,
            "b": jnp.zeros((1, cfg["output_dim"]), jnp.float32)},
    }
    # Note: halting_unit params exist in the PyTorch __init__ but are never used in
    # forward(), so they are intentionally omitted here.
    return params


# ------------------------------------ main ---------------------------------------

if __name__ == "__main__":
    config = dict(vocab_size=50, D_initial=32, D_recurrent=64, D_final=32,
                  D_halt=16, num_heads=4, d_ff=64,
                  N_initial=1, L_recurrent=1, N_final=1,
                  dropout=0.1, output_dim=8)

    key = jax.random.PRNGKey(0)
    params = init_params(key, config)

    B, T = 2, 8
    tok_key = jax.random.fold_in(key, 123)
    input_tokens = jax.random.randint(tok_key, (B, T), 0, config["vocab_size"],
                                      dtype=jnp.int32)

    fwd = jax.jit(lambda p, toks: rctnet_forward(p, toks, m_iterations=2,
                                                 config=config))
    out = jax.block_until_ready(fwd(params, input_tokens))
    assert out.shape == (B, config["output_dim"])
    assert bool(jnp.all(jnp.isfinite(out)))
    print("KERNEL_OK")
</pallas_src>

<mosaic_0001>
module attributes {stable_mosaic.version = 11 : i64} {
  func.func @_rctnet_kernel(%arg0: i32, %arg1: memref<16x32xf32, #tpu.memory_space<vmem>>, %arg2: memref<32x160xf32, #tpu.memory_space<vmem>>, %arg3: memref<1x160xf32, #tpu.memory_space<vmem>>, %arg4: memref<32x32xf32, #tpu.memory_space<vmem>>, %arg5: memref<1x32xf32, #tpu.memory_space<vmem>>, %arg6: memref<1x32xf32, #tpu.memory_space<vmem>>, %arg7: memref<1x32xf32, #tpu.memory_space<vmem>>, %arg8: memref<32x64xf32, #tpu.memory_space<vmem>>, %arg9: memref<1x64xf32, #tpu.memory_space<vmem>>, %arg10: memref<64x32xf32, #tpu.memory_space<vmem>>, %arg11: memref<1x32xf32, #tpu.memory_space<vmem>>, %arg12: memref<1x32xf32, #tpu.memory_space<vmem>>, %arg13: memref<1x32xf32, #tpu.memory_space<vmem>>, %arg14: memref<16x32xf32, #tpu.memory_space<vmem>>, %arg15: memref<16x32xf32, #tpu.memory_space<vmem>>, %arg16: memref<32x64xf32, #tpu.memory_space<vmem>>, %arg17: memref<1x64xf32, #tpu.memory_space<vmem>>, %arg18: memref<1x64xf32, #tpu.memory_space<vmem>>, %arg19: memref<1x64xf32, #tpu.memory_space<vmem>>, %arg20: memref<64x320xf32, #tpu.memory_space<vmem>>, %arg21: memref<1x320xf32, #tpu.memory_space<vmem>>, %arg22: memref<64x64xf32, #tpu.memory_space<vmem>>, %arg23: memref<1x64xf32, #tpu.memory_space<vmem>>, %arg24: memref<1x64xf32, #tpu.memory_space<vmem>>, %arg25: memref<1x64xf32, #tpu.memory_space<vmem>>, %arg26: memref<64x64xf32, #tpu.memory_space<vmem>>, %arg27: memref<1x64xf32, #tpu.memory_space<vmem>>, %arg28: memref<64x64xf32, #tpu.memory_space<vmem>>, %arg29: memref<1x64xf32, #tpu.memory_space<vmem>>, %arg30: memref<1x64xf32, #tpu.memory_space<vmem>>, %arg31: memref<1x64xf32, #tpu.memory_space<vmem>>, %arg32: memref<16x64xf32, #tpu.memory_space<vmem>>, %arg33: memref<16x64xf32, #tpu.memory_space<vmem>>, %arg34: memref<64x32xf32, #tpu.memory_space<vmem>>, %arg35: memref<1x32xf32, #tpu.memory_space<vmem>>, %arg36: memref<1x32xf32, #tpu.memory_space<vmem>>, %arg37: memref<1x32xf32, #tpu.memory_space<vmem>>, %arg38: memref<32x160xf32, #tpu.memory_space<vmem>>, %arg39: memref<1x160xf32, #tpu.memory_space<vmem>>, %arg40: memref<32x32xf32, #tpu.memory_space<vmem>>, %arg41: memref<1x32xf32, #tpu.memory_space<vmem>>, %arg42: memref<1x32xf32, #tpu.memory_space<vmem>>, %arg43: memref<1x32xf32, #tpu.memory_space<vmem>>, %arg44: memref<32x64xf32, #tpu.memory_space<vmem>>, %arg45: memref<1x64xf32, #tpu.memory_space<vmem>>, %arg46: memref<64x32xf32, #tpu.memory_space<vmem>>, %arg47: memref<1x32xf32, #tpu.memory_space<vmem>>, %arg48: memref<1x32xf32, #tpu.memory_space<vmem>>, %arg49: memref<1x32xf32, #tpu.memory_space<vmem>>, %arg50: memref<32x128xf32, #tpu.memory_space<vmem>>, %arg51: memref<1x128xf32, #tpu.memory_space<vmem>>, %arg52: memref<2x128xf32, #tpu.memory_space<vmem>>) attributes {dimension_semantics = [#tpu.dimension_semantics<arbitrary>], iteration_bounds = array<i64: 1>, scalar_prefetch = 0 : i64, scratch_operands = 0 : i64, tpu.core_type = #tpu.core_type<tc>, window_params = [{pipeline_mode = #tpu.pipeline_mode<synchronous>, transform_indices = @transform_0, window_bounds = array<i64: 16, 32>}, {pipeline_mode = #tpu.pipeline_mode<synchronous>, transform_indices = @transform_1, window_bounds = array<i64: 32, 160>}, {pipeline_mode = #tpu.pipeline_mode<synchronous>, transform_indices = @transform_2, window_bounds = array<i64: 1, 160>}, {pipeline_mode = #tpu.pipeline_mode<synchronous>, transform_indices = @transform_3, window_bounds = array<i64: 32, 32>}, {pipeline_mode = #tpu.pipeline_mode<synchronous>, transform_indices = @transform_4, window_bounds = array<i64: 1, 32>}, {pipeline_mode = #tpu.pipeline_mode<synchronous>, transform_indices = @transform_5, window_bounds = array<i64: 1, 32>}, {pipeline_mode = #tpu.pipeline_mode<synchronous>, transform_indices = @transform_6, window_bounds = array<i64: 1, 32>}, {pipeline_mode = #tpu.pipeline_mode<synchronous>, transform_indices = @transform_7, window_bounds = array<i64: 32, 64>}, {pipeline_mode = #tpu.pipeline_mode<synchronous>, transform_indices = @transform_8, window_bounds = array<i64: 1, 64>}, {pipeline_mode = #tpu.pipeline_mode<synchronous>, transform_indices = @transform_9, window_bounds = array<i64: 64, 32>}, {pipeline_mode = #tpu.pipeline_mode<synchronous>, transform_indices = @transform_10, window_bounds = array<i64: 1, 32>}, {pipeline_mode = #tpu.pipeline_mode<synchronous>, transform_indices = @transform_11, window_bounds = array<i64: 1, 32>}, {pipeline_mode = #tpu.pipeline_mode<synchronous>, transform_indices = @transform_12, window_bounds = array<i64: 1, 32>}, {pipeline_mode = #tpu.pipeline_mode<synchronous>, transform_indices = @transform_13, window_bounds = array<i64: 16, 32>}, {pipeline_mode = #tpu.pipeline_mode<synchronous>, transform_indices = @transform_14, window_bounds = array<i64: 16, 32>}, {pipeline_mode = #tpu.pipeline_mode<synchronous>, transform_indices = @transform_15, window_bounds = array<i64: 32, 64>}, {pipeline_mode = #tpu.pipeline_mode<synchronous>, transform_indices = @transform_16, window_bounds = array<i64: 1, 64>}, {pipeline_mode = #tpu.pipeline_mode<synchronous>, transform_indices = @transform_17, window_bounds = array<i64: 1, 64>}, {pipeline_mode = #tpu.pipeline_mode<synchronous>, transform_indices = @transform_18, window_bounds = array<i64: 1, 64>}, {pipeline_mode = #tpu.pipeline_mode<synchronous>, transform_indices = @transform_19, window_bounds = array<i64: 64, 320>}, {pipeline_mode = #tpu.pipeline_mode<synchronous>, transform_indices = @transform_20, window_bounds = array<i64: 1, 320>}, {pipeline_mode = #tpu.pipeline_mode<synchronous>, transform_indices = @transform_21, window_bounds = array<i64: 64, 64>}, {pipeline_mode = #tpu.pipeline_mode<synchronous>, transform_indices = @transform_22, window_bounds = array<i64: 1, 64>}, {pipeline_mode = #tpu.pipeline_mode<synchronous>, transform_indices = @transform_23, window_bounds = array<i64: 1, 64>}, {pipeline_mode = #tpu.pipeline_mode<synchronous>, transform_indices = @transform_24, window_bounds = array<i64: 1, 64>}, {pipeline_mode = #tpu.pipeline_mode<synchronous>, transform_indices = @transform_25, window_bounds = array<i64: 64, 64>}, {pipeline_mode = #tpu.pipeline_mode<synchronous>, transform_indices = @transform_26, window_bounds = array<i64: 1, 64>}, {pipeline_mode = #tpu.pipeline_mode<synchronous>, transform_indices = @transform_27, window_bounds = array<i64: 64, 64>}, {pipeline_mode = #tpu.pipeline_mode<synchronous>, transform_indices = @transform_28, window_bounds = array<i64: 1, 64>}, {pipeline_mode = #tpu.pipeline_mode<synchronous>, transform_indices = @transform_29, window_bounds = array<i64: 1, 64>}, {pipeline_mode = #tpu.pipeline_mode<synchronous>, transform_indices = @transform_30, window_bounds = array<i64: 1, 64>}, {pipeline_mode = #tpu.pipeline_mode<synchronous>, transform_indices = @transform_31, window_bounds = array<i64: 16, 64>}, {pipeline_mode = #tpu.pipeline_mode<synchronous>, transform_indices = @transform_32, window_bounds = array<i64: 16, 64>}, {pipeline_mode = #tpu.pipeline_mode<synchronous>, transform_indices = @transform_33, window_bounds = array<i64: 64, 32>}, {pipeline_mode = #tpu.pipeline_mode<synchronous>, transform_indices = @transform_34, window_bounds = array<i64: 1, 32>}, {pipeline_mode = #tpu.pipeline_mode<synchronous>, transform_indices = @transform_35, window_bounds = array<i64: 1, 32>}, {pipeline_mode = #tpu.pipeline_mode<synchronous>, transform_indices = @transform_36, window_bounds = array<i64: 1, 32>}, {pipeline_mode = #tpu.pipeline_mode<synchronous>, transform_indices = @transform_37, window_bounds = array<i64: 32, 160>}, {pipeline_mode = #tpu.pipeline_mode<synchronous>, transform_indices = @transform_38, window_bounds = array<i64: 1, 160>}, {pipeline_mode = #tpu.pipeline_mode<synchronous>, transform_indices = @transform_39, window_bounds = array<i64: 32, 32>}, {pipeline_mode = #tpu.pipeline_mode<synchronous>, transform_indices = @transform_40, window_bounds = array<i64: 1, 32>}, {pipeline_mode = #tpu.pipeline_mode<synchronous>, transform_indices = @transform_41, window_bounds = array<i64: 1, 32>}, {pipeline_mode = #tpu.pipeline_mode<synchronous>, transform_indices = @transform_42, window_bounds = array<i64: 1, 32>}, {pipeline_mode = #tpu.pipeline_mode<synchronous>, transform_indices = @transform_43, window_bounds = array<i64: 32, 64>}, {pipeline_mode = #tpu.pipeline_mode<synchronous>, transform_indices = @transform_44, window_bounds = array<i64: 1, 64>}, {pipeline_mode = #tpu.pipeline_mode<synchronous>, transform_indices = @transform_45, window_bounds = array<i64: 64, 32>}, {pipeline_mode = #tpu.pipeline_mode<synchronous>, transform_indices = @transform_46, window_bounds = array<i64: 1, 32>}, {pipeline_mode = #tpu.pipeline_mode<synchronous>, transform_indices = @transform_47, window_bounds = array<i64: 1, 32>}, {pipeline_mode = #tpu.pipeline_mode<synchronous>, transform_indices = @transform_48, window_bounds = array<i64: 1, 32>}, {pipeline_mode = #tpu.pipeline_mode<synchronous>, transform_indices = @transform_49, window_bounds = array<i64: 32, 128>}, {pipeline_mode = #tpu.pipeline_mode<synchronous>, transform_indices = @transform_50, window_bounds = array<i64: 1, 128>}, {pipeline_mode = #tpu.pipeline_mode<synchronous>, transform_indices = @transform_51, window_bounds = array<i64: 2, 128>}]} {
    %c0 = arith.constant 0 : index
    %c0_0 = arith.constant 0 : index
    %0 = vector.load %arg1[%c0, %c0_0] : memref<16x32xf32, #tpu.memory_space<vmem>>, vector<16x32xf32>
    %c0_1 = arith.constant 0 : index
    %c0_2 = arith.constant 0 : index
    %1 = vector.load %arg14[%c0_1, %c0_2] : memref<16x32xf32, #tpu.memory_space<vmem>>, vector<16x32xf32>
    %c0_3 = arith.constant 0 : index
    %c0_4 = arith.constant 0 : index
    %2 = vector.load %arg15[%c0_3, %c0_4] : memref<16x32xf32, #tpu.memory_space<vmem>>, vector<16x32xf32>
    %c0_5 = arith.constant 0 : index
    %c0_6 = arith.constant 0 : index
    %3 = vector.load %arg2[%c0_5, %c0_6] : memref<32x160xf32, #tpu.memory_space<vmem>>, vector<32x160xf32>
    %cst = arith.constant dense<0.000000e+00> : vector<16x160xf32>
    %4 = tpu.matmul %0, %3, %cst {dimension_numbers = #tpu.dot_dimension_numbers<[1], [0], [0], [1], [0, 0, 1, 1], [], []>} : vector<16x32xf32>, vector<32x160xf32>, vector<16x160xf32> -> vector<16x160xf32>
    %c0_7 = arith.constant 0 : index
    %c0_8 = arith.constant 0 : index
    %5 = vector.load %arg3[%c0_7, %c0_8] : memref<1x160xf32, #tpu.memory_space<vmem>>, vector<1x160xf32>
    %6 = vector.broadcast %5 : vector<1x160xf32> to vector<16x160xf32>
    %7 = arith.addf %4, %6 : vector<16x160xf32>
    %8 = vector.extract_strided_slice %7 {offsets = [0, 0], sizes = [16, 32], strides = [1, 1]} : vector<16x160xf32> to vector<16x32xf32>
    %9 = arith.mulf %8, %1 : vector<16x32xf32>
    %10 = vector.extract_strided_slice %7 {offsets = [0, 96], sizes = [16, 32], strides = [1, 1]} : vector<16x160xf32> to vector<16x32xf32>
    %11 = arith.mulf %10, %2 : vector<16x32xf32>
    %12 = arith.addf %9, %11 : vector<16x32xf32>
    %13 = vector.extract_strided_slice %7 {offsets = [0, 32], sizes = [16, 32], strides = [1, 1]} : vector<16x160xf32> to vector<16x32xf32>
    %14 = arith.mulf %13, %1 : vector<16x32xf32>
    %15 = vector.extract_strided_slice %7 {offsets = [0, 128], sizes = [16, 32], strides = [1, 1]} : vector<16x160xf32> to vector<16x32xf32>
    %16 = arith.mulf %15, %2 : vector<16x32xf32>
    %17 = arith.addf %14, %16 : vector<16x32xf32>
    %18 = vector.extract_strided_slice %7 {offsets = [0, 64], sizes = [16, 32], strides = [1, 1]} : vector<16x160xf32> to vector<16x32xf32>
    %19 = vector.extract_strided_slice %12 {offsets = [0, 0], sizes = [8, 8], strides = [1, 1]} : vector<16x32xf32> to vector<8x8xf32>
    %20 = vector.extract_strided_slice %12 {offsets = [0, 8], sizes = [8, 8], strides = [1, 1]} : vector<16x32xf32> to vector<8x8xf32>
    %21 = vector.extract_strided_slice %12 {offsets = [0, 16], sizes = [8, 8], strides = [1, 1]} : vector<16x32xf32> to vector<8x8xf32>
    %22 = vector.extract_strided_slice %12 {offsets = [0, 24], sizes = [8, 8], strides = [1, 1]} : vector<16x32xf32> to vector<8x8xf32>
    %23 = vector.extract_strided_slice %12 {offsets = [8, 0], sizes = [8, 8], strides = [1, 1]} : vector<16x32xf32> to vector<8x8xf32>
    %24 = vector.extract_strided_slice %12 {offsets = [8, 8], sizes = [8, 8], strides = [1, 1]} : vector<16x32xf32> to vector<8x8xf32>
    %25 = vector.extract_strided_slice %12 {offsets = [8, 16], sizes = [8, 8], strides = [1, 1]} : vector<16x32xf32> to vector<8x8xf32>
    %26 = vector.extract_strided_slice %12 {offsets = [8, 24], sizes = [8, 8], strides = [1, 1]} : vector<16x32xf32> to vector<8x8xf32>
    %27 = vector.shape_cast %19 : vector<8x8xf32> to vector<1x8x8xf32>
    %28 = vector.shape_cast %20 : vector<8x8xf32> to vector<1x8x8xf32>
    %29 = vector.shape_cast %21 : vector<8x8xf32> to vector<1x8x8xf32>
    %30 = vector.shape_cast %22 : vector<8x8xf32> to vector<1x8x8xf32>
    %31 = vector.shape_cast %23 : vector<8x8xf32> to vector<1x8x8xf32>
    %32 = vector.shape_cast %24 : vector<8x8xf32> to vector<1x8x8xf32>
    %33 = vector.shape_cast %25 : vector<8x8xf32> to vector<1x8x8xf32>
    %34 = vector.shape_cast %26 : vector<8x8xf32> to vector<1x8x8xf32>
    %35 = tpu.concatenate %27, %28, %29, %30, %31, %32, %33, %34 in 0 : vector<1x8x8xf32>, vector<1x8x8xf32>, vector<1x8x8xf32>, vector<1x8x8xf32>, vector<1x8x8xf32>, vector<1x8x8xf32>, vector<1x8x8xf32>, vector<1x8x8xf32> -> vector<8x8x8xf32>
    %36 = vector.extract_strided_slice %17 {offsets = [0, 0], sizes = [8, 8], strides = [1, 1]} : vector<16x32xf32> to vector<8x8xf32>
    %37 = vector.extract_strided_slice %17 {offsets = [0, 8], sizes = [8, 8], strides = [1, 1]} : vector<16x32xf32> to vector<8x8xf32>
    %38 = vector.extract_strided_slice %17 {offsets = [0, 16], sizes = [8, 8], strides = [1, 1]} : vector<16x32xf32> to vector<8x8xf32>
    %39 = vector.extract_strided_slice %17 {offsets = [0, 24], sizes = [8, 8], strides = [1, 1]} : vector<16x32xf32> to vector<8x8xf32>
    %40 = vector.extract_strided_slice %17 {offsets = [8, 0], sizes = [8, 8], strides = [1, 1]} : vector<16x32xf32> to vector<8x8xf32>
    %41 = vector.extract_strided_slice %17 {offsets = [8, 8], sizes = [8, 8], strides = [1, 1]} : vector<16x32xf32> to vector<8x8xf32>
    %42 = vector.extract_strided_slice %17 {offsets = [8, 16], sizes = [8, 8], strides = [1, 1]} : vector<16x32xf32> to vector<8x8xf32>
    %43 = vector.extract_strided_slice %17 {offsets = [8, 24], sizes = [8, 8], strides = [1, 1]} : vector<16x32xf32> to vector<8x8xf32>
    %44 = vector.shape_cast %36 : vector<8x8xf32> to vector<1x8x8xf32>
    %45 = vector.shape_cast %37 : vector<8x8xf32> to vector<1x8x8xf32>
    %46 = vector.shape_cast %38 : vector<8x8xf32> to vector<1x8x8xf32>
    %47 = vector.shape_cast %39 : vector<8x8xf32> to vector<1x8x8xf32>
    %48 = vector.shape_cast %40 : vector<8x8xf32> to vector<1x8x8xf32>
    %49 = vector.shape_cast %41 : vector<8x8xf32> to vector<1x8x8xf32>
    %50 = vector.shape_cast %42 : vector<8x8xf32> to vector<1x8x8xf32>
    %51 = vector.shape_cast %43 : vector<8x8xf32> to vector<1x8x8xf32>
    %52 = tpu.concatenate %44, %45, %46, %47, %48, %49, %50, %51 in 0 : vector<1x8x8xf32>, vector<1x8x8xf32>, vector<1x8x8xf32>, vector<1x8x8xf32>, vector<1x8x8xf32>, vector<1x8x8xf32>, vector<1x8x8xf32>, vector<1x8x8xf32> -> vector<8x8x8xf32>
    %53 = vector.extract_strided_slice %18 {offsets = [0, 0], sizes = [8, 8], strides = [1, 1]} : vector<16x32xf32> to vector<8x8xf32>
    %54 = vector.extract_strided_slice %18 {offsets = [0, 8], sizes = [8, 8], strides = [1, 1]} : vector<16x32xf32> to vector<8x8xf32>
    %55 = vector.extract_strided_slice %18 {offsets = [0, 16], sizes = [8, 8], strides = [1, 1]} : vector<16x32xf32> to vector<8x8xf32>
    %56 = vector.extract_strided_slice %18 {offsets = [0, 24], sizes = [8, 8], strides = [1, 1]} : vector<16x32xf32> to vector<8x8xf32>
    %57 = vector.extract_strided_slice %18 {offsets = [8, 0], sizes = [8, 8], strides = [1, 1]} : vector<16x32xf32> to vector<8x8xf32>
    %58 = vector.extract_strided_slice %18 {offsets = [8, 8], sizes = [8, 8], strides = [1, 1]} : vector<16x32xf32> to vector<8x8xf32>
    %59 = vector.extract_strided_slice %18 {offsets = [8, 16], sizes = [8, 8], strides = [1, 1]} : vector<16x32xf32> to vector<8x8xf32>
    %60 = vector.extract_strided_slice %18 {offsets = [8, 24], sizes = [8, 8], strides = [1, 1]} : vector<16x32xf32> to vector<8x8xf32>
    %61 = vector.shape_cast %53 : vector<8x8xf32> to vector<1x8x8xf32>
    %62 = vector.shape_cast %54 : vector<8x8xf32> to vector<1x8x8xf32>
    %63 = vector.shape_cast %55 : vector<8x8xf32> to vector<1x8x8xf32>
    %64 = vector.shape_cast %56 : vector<8x8xf32> to vector<1x8x8xf32>
    %65 = vector.shape_cast %57 : vector<8x8xf32> to vector<1x8x8xf32>
    %66 = vector.shape_cast %58 : vector<8x8xf32> to vector<1x8x8xf32>
    %67 = vector.shape_cast %59 : vector<8x8xf32> to vector<1x8x8xf32>
    %68 = vector.shape_cast %60 : vector<8x8xf32> to vector<1x8x8xf32>
    %69 = tpu.concatenate %61, %62, %63, %64, %65, %66, %67, %68 in 0 : vector<1x8x8xf32>, vector<1x8x8xf32>, vector<1x8x8xf32>, vector<1x8x8xf32>, vector<1x8x8xf32>, vector<1x8x8xf32>, vector<1x8x8xf32>, vector<1x8x8xf32> -> vector<8x8x8xf32>
    %cst_9 = arith.constant dense<0.000000e+00> : vector<8x8x8xf32>
    %70 = tpu.matmul %35, %52, %cst_9 {dimension_numbers = #tpu.dot_dimension_numbers<[2], [2], [1], [1], [0, 0, 0, 1, 1, 1], [0], [0]>} : vector<8x8x8xf32>, vector<8x8x8xf32>, vector<8x8x8xf32> -> vector<8x8x8xf32>
    %cst_10 = arith.constant dense<0xFF800000> : vector<8x8xf32>
    %71 = vector.multi_reduction <maximumf>, %70, %cst_10 [2] : vector<8x8x8xf32> to vector<8x8xf32>
    %72 = vector.shape_cast %71 : vector<8x8xf32> to vector<8x8x1xf32>
    %73 = vector.broadcast %72 : vector<8x8x1xf32> to vector<8x8x8xf32>
    %74 = arith.subf %70, %73 : vector<8x8x8xf32>
    %75 = math.exp %74 : vector<8x8x8xf32>
    %cst_11 = arith.constant dense<0.000000e+00> : vector<8x8xf32>
    %76 = vector.multi_reduction <add>, %75, %cst_11 [2] : vector<8x8x8xf32> to vector<8x8xf32>
    %77 = vector.shape_cast %76 : vector<8x8xf32> to vector<8x8x1xf32>
    %78 = tpu.reciprocal %77 {approx = true} : vector<8x8x1xf32> -> vector<8x8x1xf32>
    %79 = vector.broadcast %78 : vector<8x8x1xf32> to vector<8x8x8xf32>
    %80 = arith.mulf %75, %79 : vector<8x8x8xf32>
    %cst_12 = arith.constant dense<0.000000e+00> : vector<8x8x8xf32>
    %81 = tpu.matmul %80, %69, %cst_12 {dimension_numbers = #tpu.dot_dimension_numbers<[2], [1], [1], [2], [0, 0, 0, 1, 1, 2], [0], [0]>} : vector<8x8x8xf32>, vector<8x8x8xf32>, vector<8x8x8xf32> -> vector<8x8x8xf32>
    %82 = vector.extract_strided_slice %81 {offsets = [0, 0, 0], sizes = [1, 8, 8], strides = [1, 1, 1]} : vector<8x8x8xf32> to vector<1x8x8xf32>
    %83 = vector.shape_cast %82 : vector<1x8x8xf32> to vector<8x8xf32>
    %84 = vector.extract_strided_slice %81 {offsets = [1, 0, 0], sizes = [1, 8, 8], strides = [1, 1, 1]} : vector<8x8x8xf32> to vector<1x8x8xf32>
    %85 = vector.shape_cast %84 : vector<1x8x8xf32> to vector<8x8xf32>
    %86 = vector.extract_strided_slice %81 {offsets = [2, 0, 0], sizes = [1, 8, 8], strides = [1, 1, 1]} : vector<8x8x8xf32> to vector<1x8x8xf32>
    %87 = vector.shape_cast %86 : vector<1x8x8xf32> to vector<8x8xf32>
    %88 = vector.extract_strided_slice %81 {offsets = [3, 0, 0], sizes = [1, 8, 8], strides = [1, 1, 1]} : vector<8x8x8xf32> to vector<1x8x8xf32>
    %89 = vector.shape_cast %88 : vector<1x8x8xf32> to vector<8x8xf32>
    %90 = tpu.concatenate %83, %85, %87, %89 in 1 : vector<8x8xf32>, vector<8x8xf32>, vector<8x8xf32>, vector<8x8xf32> -> vector<8x32xf32>
    %91 = vector.extract_strided_slice %81 {offsets = [4, 0, 0], sizes = [1, 8, 8], strides = [1, 1, 1]} : vector<8x8x8xf32> to vector<1x8x8xf32>
    %92 = vector.shape_cast %91 : vector<1x8x8xf32> to vector<8x8xf32>
    %93 = vector.extract_strided_slice %81 {offsets = [5, 0, 0], sizes = [1, 8, 8], strides = [1, 1, 1]} : vector<8x8x8xf32> to vector<1x8x8xf32>
    %94 = vector.shape_cast %93 : vector<1x8x8xf32> to vector<8x8xf32>
    %95 = vector.extract_strided_slice %81 {offsets = [6, 0, 0], sizes = [1, 8, 8], strides = [1, 1, 1]} : vector<8x8x8xf32> to vector<1x8x8xf32>
    %96 = vector.shape_cast %95 : vector<1x8x8xf32> to vector<8x8xf32>
    %97 = vector.extract_strided_slice %81 {offsets = [7, 0, 0], sizes = [1, 8, 8], strides = [1, 1, 1]} : vector<8x8x8xf32> to vector<1x8x8xf32>
    %98 = vector.shape_cast %97 : vector<1x8x8xf32> to vector<8x8xf32>
    %99 = tpu.concatenate %92, %94, %96, %98 in 1 : vector<8x8xf32>, vector<8x8xf32>, vector<8x8xf32>, vector<8x8xf32> -> vector<8x32xf32>
    %100 = tpu.concatenate %90, %99 in 0 : vector<8x32xf32>, vector<8x32xf32> -> vector<16x32xf32>
    %c0_13 = arith.constant 0 : index
    %c0_14 = arith.constant 0 : index
    %101 = vector.load %arg4[%c0_13, %c0_14] : memref<32x32xf32, #tpu.memory_space<vmem>>, vector<32x32xf32>
    %cst_15 = arith.constant dense<0.000000e+00> : vector<16x32xf32>
    %102 = tpu.matmul %100, %101, %cst_15 {dimension_numbers = #tpu.dot_dimension_numbers<[1], [0], [0], [1], [0, 0, 1, 1], [], []>} : vector<16x32xf32>, vector<32x32xf32>, vector<16x32xf32> -> vector<16x32xf32>
    %c0_16 = arith.constant 0 : index
    %c0_17 = arith.constant 0 : index
    %103 = vector.load %arg5[%c0_16, %c0_17] : memref<1x32xf32, #tpu.memory_space<vmem>>, vector<1x32xf32>
    %104 = vector.broadcast %103 : vector<1x32xf32> to vector<16x32xf32>
    %105 = arith.addf %102, %104 : vector<16x32xf32>
    %106 = arith.addf %0, %105 : vector<16x32xf32>
    %c0_18 = arith.constant 0 : index
    %c0_19 = arith.constant 0 : index
    %107 = vector.load %arg6[%c0_18, %c0_19] : memref<1x32xf32, #tpu.memory_space<vmem>>, vector<1x32xf32>
    %c0_20 = arith.constant 0 : index
    %c0_21 = arith.constant 0 : index
    %108 = vector.load %arg7[%c0_20, %c0_21] : memref<1x32xf32, #tpu.memory_space<vmem>>, vector<1x32xf32>
    %cst_22 = arith.constant dense<0.000000e+00> : vector<16xf32>
    %109 = vector.multi_reduction <add>, %106, %cst_22 [1] : vector<16x32xf32> to vector<16xf32>
    %110 = vector.shape_cast %109 : vector<16xf32> to vector<16x1xf32>
    %cst_23 = arith.constant 3.200000e+01 : f32
    %111 = vector.broadcast %cst_23 : f32 to vector<16x1xf32>
    %112 = arith.divf %110, %111 : vector<16x1xf32>
    %113 = vector.broadcast %112 : vector<16x1xf32> to vector<16x32xf32>
    %114 = arith.subf %106, %113 : vector<16x32xf32>
    %115 = arith.mulf %114, %114 : vector<16x32xf32>
    %cst_24 = arith.constant dense<0.000000e+00> : vector<16xf32>
    %116 = vector.multi_reduction <add>, %115, %cst_24 [1] : vector<16x32xf32> to vector<16xf32>
    %117 = vector.shape_cast %116 : vector<16xf32> to vector<16x1xf32>
    %cst_25 = arith.constant 3.200000e+01 : f32
    %118 = vector.broadcast %cst_25 : f32 to vector<16x1xf32>
    %119 = arith.divf %117, %118 : vector<16x1xf32>
    %120 = vector.broadcast %112 : vector<16x1xf32> to vector<16x32xf32>
    %121 = arith.subf %106, %120 : vector<16x32xf32>
    %cst_26 = arith.constant 9.99999974E-6 : f32
    %122 = vector.broadcast %cst_26 : f32 to vector<16x1xf32>
    %123 = arith.addf %119, %122 : vector<16x1xf32>
    %124 = math.rsqrt %123 : vector<16x1xf32>
    %125 = vector.broadcast %124 : vector<16x1xf32> to vector<16x32xf32>
    %126 = arith.mulf %121, %125 : vector<16x32xf32>
    %127 = vector.broadcast %107 : vector<1x32xf32> to vector<16x32xf32>
    %128 = arith.mulf %126, %127 : vector<16x32xf32>
    %129 = vector.broadcast %108 : vector<1x32xf32> to vector<16x32xf32>
    %130 = arith.addf %128, %129 : vector<16x32xf32>
    %c0_27 = arith.constant 0 : index
    %c0_28 = arith.constant 0 : index
    %131 = vector.load %arg8[%c0_27, %c0_28] : memref<32x64xf32, #tpu.memory_space<vmem>>, vector<32x64xf32>
    %cst_29 = arith.constant dense<0.000000e+00> : vector<16x64xf32>
    %132 = tpu.matmul %130, %131, %cst_29 {dimension_numbers = #tpu.dot_dimension_numbers<[1], [0], [0], [1], [0, 0, 1, 1], [], []>} : vector<16x32xf32>, vector<32x64xf32>, vector<16x64xf32> -> vector<16x64xf32>
    %c0_30 = arith.constant 0 : index
    %c0_31 = arith.constant 0 : index
    %133 = vector.load %arg9[%c0_30, %c0_31] : memref<1x64xf32, #tpu.memory_space<vmem>>, vector<1x64xf32>
    %134 = vector.broadcast %133 : vector<1x64xf32> to vector<16x64xf32>
    %135 = arith.addf %132, %134 : vector<16x64xf32>
    %cst_32 = arith.constant 5.000000e-01 : f32
    %136 = vector.broadcast %cst_32 : f32 to vector<16x64xf32>
    %137 = arith.mulf %136, %135 : vector<16x64xf32>
    %cst_33 = arith.constant 4.471500e-02 : f32
    %138 = vector.broadcast %cst_33 : f32 to vector<16x64xf32>
    %139 = arith.mulf %138, %135 : vector<16x64xf32>
    %140 = arith.mulf %139, %135 : vector<16x64xf32>
    %141 = arith.mulf %140, %135 : vector<16x64xf32>
    %142 = arith.addf %135, %141 : vector<16x64xf32>
    %cst_34 = arith.constant 0.797884583 : f32
    %143 = vector.broadcast %cst_34 : f32 to vector<16x64xf32>
    %144 = arith.mulf %143, %142 : vector<16x64xf32>
    %145 = math.tanh %144 : vector<16x64xf32>
    %cst_35 = arith.constant 1.000000e+00 : f32
    %146 = vector.broadcast %cst_35 : f32 to vector<16x64xf32>
    %147 = arith.addf %146, %145 : vector<16x64xf32>
    %148 = arith.mulf %137, %147 : vector<16x64xf32>
    %c0_36 = arith.constant 0 : index
    %c0_37 = arith.constant 0 : index
    %149 = vector.load %arg10[%c0_36, %c0_37] : memref<64x32xf32, #tpu.memory_space<vmem>>, vector<64x32xf32>
    %cst_38 = arith.constant dense<0.000000e+00> : vector<16x32xf32>
    %150 = tpu.matmul %148, %149, %cst_38 {dimension_numbers = #tpu.dot_dimension_numbers<[1], [0], [0], [1], [0, 0, 1, 1], [], []>} : vector<16x64xf32>, vector<64x32xf32>, vector<16x32xf32> -> vector<16x32xf32>
    %c0_39 = arith.constant 0 : index
    %c0_40 = arith.constant 0 : index
    %151 = vector.load %arg11[%c0_39, %c0_40] : memref<1x32xf32, #tpu.memory_space<vmem>>, vector<1x32xf32>
    %152 = vector.broadcast %151 : vector<1x32xf32> to vector<16x32xf32>
    %153 = arith.addf %150, %152 : vector<16x32xf32>
    %154 = arith.addf %130, %153 : vector<16x32xf32>
    %c0_41 = arith.constant 0 : index
    %c0_42 = arith.constant 0 : index
    %155 = vector.load %arg12[%c0_41, %c0_42] : memref<1x32xf32, #tpu.memory_space<vmem>>, vector<1x32xf32>
    %c0_43 = arith.constant 0 : index
    %c0_44 = arith.constant 0 : index
    %156 = vector.load %arg13[%c0_43, %c0_44] : memref<1x32xf32, #tpu.memory_space<vmem>>, vector<1x32xf32>
    %cst_45 = arith.constant dense<0.000000e+00> : vector<16xf32>
    %157 = vector.multi_reduction <add>, %154, %cst_45 [1] : vector<16x32xf32> to vector<16xf32>
    %158 = vector.shape_cast %157 : vector<16xf32> to vector<16x1xf32>
    %cst_46 = arith.constant 3.200000e+01 : f32
    %159 = vector.broadcast %cst_46 : f32 to vector<16x1xf32>
    %160 = arith.divf %158, %159 : vector<16x1xf32>
    %161 = vector.broadcast %160 : vector<16x1xf32> to vector<16x32xf32>
    %162 = arith.subf %154, %161 : vector<16x32xf32>
    %163 = arith.mulf %162, %162 : vector<16x32xf32>
    %cst_47 = arith.constant dense<0.000000e+00> : vector<16xf32>
    %164 = vector.multi_reduction <add>, %163, %cst_47 [1] : vector<16x32xf32> to vector<16xf32>
    %165 = vector.shape_cast %164 : vector<16xf32> to vector<16x1xf32>
    %cst_48 = arith.constant 3.200000e+01 : f32
    %166 = vector.broadcast %cst_48 : f32 to vector<16x1xf32>
    %167 = arith.divf %165, %166 : vector<16x1xf32>
    %168 = vector.broadcast %160 : vector<16x1xf32> to vector<16x32xf32>
    %169 = arith.subf %154, %168 : vector<16x32xf32>
    %cst_49 = arith.constant 9.99999974E-6 : f32
    %170 = vector.broadcast %cst_49 : f32 to vector<16x1xf32>
    %171 = arith.addf %167, %170 : vector<16x1xf32>
    %172 = math.rsqrt %171 : vector<16x1xf32>
    %173 = vector.broadcast %172 : vector<16x1xf32> to vector<16x32xf32>
    %174 = arith.mulf %169, %173 : vector<16x32xf32>
    %175 = vector.broadcast %155 : vector<1x32xf32> to vector<16x32xf32>
    %176 = arith.mulf %174, %175 : vector<16x32xf32>
    %177 = vector.broadcast %156 : vector<1x32xf32> to vector<16x32xf32>
    %178 = arith.addf %176, %177 : vector<16x32xf32>
    %c0_50 = arith.constant 0 : index
    %c0_51 = arith.constant 0 : index
    %179 = vector.load %arg16[%c0_50, %c0_51] : memref<32x64xf32, #tpu.memory_space<vmem>>, vector<32x64xf32>
    %cst_52 = arith.constant dense<0.000000e+00> : vector<16x64xf32>
    %180 = tpu.matmul %178, %179, %cst_52 {dimension_numbers = #tpu.dot_dimension_numbers<[1], [0], [0], [1], [0, 0, 1, 1], [], []>} : vector<16x32xf32>, vector<32x64xf32>, vector<16x64xf32> -> vector<16x64xf32>
    %c0_53 = arith.constant 0 : index
    %c0_54 = arith.constant 0 : index
    %181 = vector.load %arg17[%c0_53, %c0_54] : memref<1x64xf32, #tpu.memory_space<vmem>>, vector<1x64xf32>
    %182 = vector.broadcast %181 : vector<1x64xf32> to vector<16x64xf32>
    %183 = arith.addf %180, %182 : vector<16x64xf32>
    %c0_55 = arith.constant 0 : index
    %c0_56 = arith.constant 0 : index
    %184 = vector.load %arg18[%c0_55, %c0_56] : memref<1x64xf32, #tpu.memory_space<vmem>>, vector<1x64xf32>
    %c0_57 = arith.constant 0 : index
    %c0_58 = arith.constant 0 : index
    %185 = vector.load %arg19[%c0_57, %c0_58] : memref<1x64xf32, #tpu.memory_space<vmem>>, vector<1x64xf32>
    %cst_59 = arith.constant dense<0.000000e+00> : vector<16xf32>
    %186 = vector.multi_reduction <add>, %183, %cst_59 [1] : vector<16x64xf32> to vector<16xf32>
    %187 = vector.shape_cast %186 : vector<16xf32> to vector<16x1xf32>
    %cst_60 = arith.constant 6.400000e+01 : f32
    %188 = vector.broadcast %cst_60 : f32 to vector<16x1xf32>
    %189 = arith.divf %187, %188 : vector<16x1xf32>
    %190 = vector.broadcast %189 : vector<16x1xf32> to vector<16x64xf32>
    %191 = arith.subf %183, %190 : vector<16x64xf32>
    %192 = arith.mulf %191, %191 : vector<16x64xf32>
    %cst_61 = arith.constant dense<0.000000e+00> : vector<16xf32>
    %193 = vector.multi_reduction <add>, %192, %cst_61 [1] : vector<16x64xf32> to vector<16xf32>
    %194 = vector.shape_cast %193 : vector<16xf32> to vector<16x1xf32>
    %cst_62 = arith.constant 6.400000e+01 : f32
    %195 = vector.broadcast %cst_62 : f32 to vector<16x1xf32>
    %196 = arith.divf %194, %195 : vector<16x1xf32>
    %197 = vector.broadcast %189 : vector<16x1xf32> to vector<16x64xf32>
    %198 = arith.subf %183, %197 : vector<16x64xf32>
    %cst_63 = arith.constant 9.99999974E-6 : f32
    %199 = vector.broadcast %cst_63 : f32 to vector<16x1xf32>
    %200 = arith.addf %196, %199 : vector<16x1xf32>
    %201 = math.rsqrt %200 : vector<16x1xf32>
    %202 = vector.broadcast %201 : vector<16x1xf32> to vector<16x64xf32>
    %203 = arith.mulf %198, %202 : vector<16x64xf32>
    %204 = vector.broadcast %184 : vector<1x64xf32> to vector<16x64xf32>
    %205 = arith.mulf %203, %204 : vector<16x64xf32>
    %206 = vector.broadcast %185 : vector<1x64xf32> to vector<16x64xf32>
    %207 = arith.addf %205, %206 : vector<16x64xf32>
    %cst_64 = arith.constant 5.000000e-01 : f32
    %208 = vector.broadcast %cst_64 : f32 to vector<16x64xf32>
    %209 = arith.mulf %208, %207 : vector<16x64xf32>
    %cst_65 = arith.constant 4.471500e-02 : f32
    %210 = vector.broadcast %cst_65 : f32 to vector<16x64xf32>
    %211 = arith.mulf %210, %207 : vector<16x64xf32>
    %212 = arith.mulf %211, %207 : vector<16x64xf32>
    %213 = arith.mulf %212, %207 : vector<16x64xf32>
    %214 = arith.addf %207, %213 : vector<16x64xf32>
    %cst_66 = arith.constant 0.797884583 : f32
    %215 = vector.broadcast %cst_66 : f32 to vector<16x64xf32>
    %216 = arith.mulf %215, %214 : vector<16x64xf32>
    %217 = math.tanh %216 : vector<16x64xf32>
    %cst_67 = arith.constant 1.000000e+00 : f32
    %218 = vector.broadcast %cst_67 : f32 to vector<16x64xf32>
    %219 = arith.addf %218, %217 : vector<16x64xf32>
    %220 = arith.mulf %209, %219 : vector<16x64xf32>
    %c0_68 = arith.constant 0 : index
    %c0_69 = arith.constant 0 : index
    %221 = vector.load %arg32[%c0_68, %c0_69] : memref<16x64xf32, #tpu.memory_space<vmem>>, vector<16x64xf32>
    %c0_70 = arith.constant 0 : index
    %c0_71 = arith.constant 0 : index
    %222 = vector.load %arg33[%c0_70, %c0_71] : memref<16x64xf32, #tpu.memory_space<vmem>>, vector<16x64xf32>
    %c0_72 = arith.constant 0 : index
    %c0_73 = arith.constant 0 : index
    %223 = vector.load %arg20[%c0_72, %c0_73] : memref<64x320xf32, #tpu.memory_space<vmem>>, vector<64x320xf32>
    %cst_74 = arith.constant dense<0.000000e+00> : vector<16x320xf32>
    %224 = tpu.matmul %220, %223, %cst_74 {dimension_numbers = #tpu.dot_dimension_numbers<[1], [0], [0], [1], [0, 0, 1, 1], [], []>} : vector<16x64xf32>, vector<64x320xf32>, vector<16x320xf32> -> vector<16x320xf32>
    %c0_75 = arith.constant 0 : index
    %c0_76 = arith.constant 0 : index
    %225 = vector.load %arg21[%c0_75, %c0_76] : memref<1x320xf32, #tpu.memory_space<vmem>>, vector<1x320xf32>
    %226 = vector.broadcast %225 : vector<1x320xf32> to vector<16x320xf32>
    %227 = arith.addf %224, %226 : vector<16x320xf32>
    %228 = vector.extract_strided_slice %227 {offsets = [0, 0], sizes = [16, 64], strides = [1, 1]} : vector<16x320xf32> to vector<16x64xf32>
    %229 = arith.mulf %228, %221 : vector<16x64xf32>
    %230 = vector.extract_strided_slice %227 {offsets = [0, 192], sizes = [16, 64], strides = [1, 1]} : vector<16x320xf32> to vector<16x64xf32>
    %231 = arith.mulf %230, %222 : vector<16x64xf32>
    %232 = arith.addf %229, %231 : vector<16x64xf32>
    %233 = vector.extract_strided_slice %227 {offsets = [0, 64], sizes = [16, 64], strides = [1, 1]} : vector<16x320xf32> to vector<16x64xf32>
    %234 = arith.mulf %233, %221 : vector<16x64xf32>
    %235 = vector.extract_strided_slice %227 {offsets = [0, 256], sizes = [16, 64], strides = [1, 1]} : vector<16x320xf32> to vector<16x64xf32>
    %236 = arith.mulf %235, %222 : vector<16x64xf32>
    %237 = arith.addf %234, %236 : vector<16x64xf32>
    %238 = vector.extract_strided_slice %227 {offsets = [0, 128], sizes = [16, 64], strides = [1, 1]} : vector<16x320xf32> to vector<16x64xf32>
    %239 = vector.extract_strided_slice %232 {offsets = [0, 0], sizes = [8, 16], strides = [1, 1]} : vector<16x64xf32> to vector<8x16xf32>
    %240 = vector.extract_strided_slice %232 {offsets = [0, 16], sizes = [8, 16], strides = [1, 1]} : vector<16x64xf32> to vector<8x16xf32>
    %241 = vector.extract_strided_slice %232 {offsets = [0, 32], sizes = [8, 16], strides = [1, 1]} : vector<16x64xf32> to vector<8x16xf32>
    %242 = vector.extract_strided_slice %232 {offsets = [0, 48], sizes = [8, 16], strides = [1, 1]} : vector<16x64xf32> to vector<8x16xf32>
    %243 = vector.extract_strided_slice %232 {offsets = [8, 0], sizes = [8, 16], strides = [1, 1]} : vector<16x64xf32> to vector<8x16xf32>
    %244 = vector.extract_strided_slice %232 {offsets = [8, 16], sizes = [8, 16], strides = [1, 1]} : vector<16x64xf32> to vector<8x16xf32>
    %245 = vector.extract_strided_slice %232 {offsets = [8, 32], sizes = [8, 16], strides = [1, 1]} : vector<16x64xf32> to vector<8x16xf32>
    %246 = vector.extract_strided_slice %232 {offsets = [8, 48], sizes = [8, 16], strides = [1, 1]} : vector<16x64xf32> to vector<8x16xf32>
    %247 = vector.shape_cast %239 : vector<8x16xf32> to vector<1x8x16xf32>
    %248 = vector.shape_cast %240 : vector<8x16xf32> to vector<1x8x16xf32>
    %249 = vector.shape_cast %241 : vector<8x16xf32> to vector<1x8x16xf32>
    %250 = vector.shape_cast %242 : vector<8x16xf32> to vector<1x8x16xf32>
    %251 = vector.shape_cast %243 : vector<8x16xf32> to vector<1x8x16xf32>
    %252 = vector.shape_cast %244 : vector<8x16xf32> to vector<1x8x16xf32>
    %253 = vector.shape_cast %245 : vector<8x16xf32> to vector<1x8x16xf32>
    %254 = vector.shape_cast %246 : vector<8x16xf32> to vector<1x8x16xf32>
    %255 = tpu.concatenate %247, %248, %249, %250, %251, %252, %253, %254 in 0 : vector<1x8x16xf32>, vector<1x8x16xf32>, vector<1x8x16xf32>, vector<1x8x16xf32>, vector<1x8x16xf32>, vector<1x8x16xf32>, vector<1x8x16xf32>, vector<1x8x16xf32> -> vector<8x8x16xf32>
    %256 = vector.extract_strided_slice %237 {offsets = [0, 0], sizes = [8, 16], strides = [1, 1]} : vector<16x64xf32> to vector<8x16xf32>
    %257 = vector.extract_strided_slice %237 {offsets = [0, 16], sizes = [8, 16], strides = [1, 1]} : vector<16x64xf32> to vector<8x16xf32>
    %258 = vector.extract_strided_slice %237 {offsets = [0, 32], sizes = [8, 16], strides = [1, 1]} : vector<16x64xf32> to vector<8x16xf32>
    %259 = vector.extract_strided_slice %237 {offsets = [0, 48], sizes = [8, 16], strides = [1, 1]} : vector<16x64xf32> to vector<8x16xf32>
    %260 = vector.extract_strided_slice %237 {offsets = [8, 0], sizes = [8, 16], strides = [1, 1]} : vector<16x64xf32> to vector<8x16xf32>
    %261 = vector.extract_strided_slice %237 {offsets = [8, 16], sizes = [8, 16], strides = [1, 1]} : vector<16x64xf32> to vector<8x16xf32>
    %262 = vector.extract_strided_slice %237 {offsets = [8, 32], sizes = [8, 16], strides = [1, 1]} : vector<16x64xf32> to vector<8x16xf32>
    %263 = vector.extract_strided_slice %237 {offsets = [8, 48], sizes = [8, 16], strides = [1, 1]} : vector<16x64xf32> to vector<8x16xf32>
    %264 = vector.shape_cast %256 : vector<8x16xf32> to vector<1x8x16xf32>
    %265 = vector.shape_cast %257 : vector<8x16xf32> to vector<1x8x16xf32>
    %266 = vector.shape_cast %258 : vector<8x16xf32> to vector<1x8x16xf32>
    %267 = vector.shape_cast %259 : vector<8x16xf32> to vector<1x8x16xf32>
    %268 = vector.shape_cast %260 : vector<8x16xf32> to vector<1x8x16xf32>
    %269 = vector.shape_cast %261 : vector<8x16xf32> to vector<1x8x16xf32>
    %270 = vector.shape_cast %262 : vector<8x16xf32> to vector<1x8x16xf32>
    %271 = vector.shape_cast %263 : vector<8x16xf32> to vector<1x8x16xf32>
    %272 = tpu.concatenate %264, %265, %266, %267, %268, %269, %270, %271 in 0 : vector<1x8x16xf32>, vector<1x8x16xf32>, vector<1x8x16xf32>, vector<1x8x16xf32>, vector<1x8x16xf32>, vector<1x8x16xf32>, vector<1x8x16xf32>, vector<1x8x16xf32> -> vector<8x8x16xf32>
    %273 = vector.extract_strided_slice %238 {offsets = [0, 0], sizes = [8, 16], strides = [1, 1]} : vector<16x64xf32> to vector<8x16xf32>
    %274 = vector.extract_strided_slice %238 {offsets = [0, 16], sizes = [8, 16], strides = [1, 1]} : vector<16x64xf32> to vector<8x16xf32>
    %275 = vector.extract_strided_slice %238 {offsets = [0, 32], sizes = [8, 16], strides = [1, 1]} : vector<16x64xf32> to vector<8x16xf32>
    %276 = vector.extract_strided_slice %238 {offsets = [0, 48], sizes = [8, 16], strides = [1, 1]} : vector<16x64xf32> to vector<8x16xf32>
    %277 = vector.extract_strided_slice %238 {offsets = [8, 0], sizes = [8, 16], strides = [1, 1]} : vector<16x64xf32> to vector<8x16xf32>
    %278 = vector.extract_strided_slice %238 {offsets = [8, 16], sizes = [8, 16], strides = [1, 1]} : vector<16x64xf32> to vector<8x16xf32>
    %279 = vector.extract_strided_slice %238 {offsets = [8, 32], sizes = [8, 16], strides = [1, 1]} : vector<16x64xf32> to vector<8x16xf32>
    %280 = vector.extract_strided_slice %238 {offsets = [8, 48], sizes = [8, 16], strides = [1, 1]} : vector<16x64xf32> to vector<8x16xf32>
    %281 = vector.shape_cast %273 : vector<8x16xf32> to vector<1x8x16xf32>
    %282 = vector.shape_cast %274 : vector<8x16xf32> to vector<1x8x16xf32>
    %283 = vector.shape_cast %275 : vector<8x16xf32> to vector<1x8x16xf32>
    %284 = vector.shape_cast %276 : vector<8x16xf32> to vector<1x8x16xf32>
    %285 = vector.shape_cast %277 : vector<8x16xf32> to vector<1x8x16xf32>
    %286 = vector.shape_cast %278 : vector<8x16xf32> to vector<1x8x16xf32>
    %287 = vector.shape_cast %279 : vector<8x16xf32> to vector<1x8x16xf32>
    %288 = vector.shape_cast %280 : vector<8x16xf32> to vector<1x8x16xf32>
    %289 = tpu.concatenate %281, %282, %283, %284, %285, %286, %287, %288 in 0 : vector<1x8x16xf32>, vector<1x8x16xf32>, vector<1x8x16xf32>, vector<1x8x16xf32>, vector<1x8x16xf32>, vector<1x8x16xf32>, vector<1x8x16xf32>, vector<1x8x16xf32> -> vector<8x8x16xf32>
    %cst_77 = arith.constant dense<0.000000e+00> : vector<8x8x8xf32>
    %290 = tpu.matmul %255, %272, %cst_77 {dimension_numbers = #tpu.dot_dimension_numbers<[2], [2], [1], [1], [0, 0, 0, 1, 1, 1], [0], [0]>} : vector<8x8x16xf32>, vector<8x8x16xf32>, vector<8x8x8xf32> -> vector<8x8x8xf32>
    %cst_78 = arith.constant dense<0xFF800000> : vector<8x8xf32>
    %291 = vector.multi_reduction <maximumf>, %290, %cst_78 [2] : vector<8x8x8xf32> to vector<8x8xf32>
    %292 = vector.shape_cast %291 : vector<8x8xf32> to vector<8x8x1xf32>
    %293 = vector.broadcast %292 : vector<8x8x1xf32> to vector<8x8x8xf32>
    %294 = arith.subf %290, %293 : vector<8x8x8xf32>
    %295 = math.exp %294 : vector<8x8x8xf32>
    %cst_79 = arith.constant dense<0.000000e+00> : vector<8x8xf32>
    %296 = vector.multi_reduction <add>, %295, %cst_79 [2] : vector<8x8x8xf32> to vector<8x8xf32>
    %297 = vector.shape_cast %296 : vector<8x8xf32> to vector<8x8x1xf32>
    %298 = tpu.reciprocal %297 {approx = true} : vector<8x8x1xf32> -> vector<8x8x1xf32>
    %299 = vector.broadcast %298 : vector<8x8x1xf32> to vector<8x8x8xf32>
    %300 = arith.mulf %295, %299 : vector<8x8x8xf32>
    %cst_80 = arith.constant dense<0.000000e+00> : vector<8x8x16xf32>
    %301 = tpu.matmul %300, %289, %cst_80 {dimension_numbers = #tpu.dot_dimension_numbers<[2], [1], [1], [2], [0, 0, 0, 1, 1, 2], [0], [0]>} : vector<8x8x8xf32>, vector<8x8x16xf32>, vector<8x8x16xf32> -> vector<8x8x16xf32>
    %302 = vector.extract_strided_slice %301 {offsets = [0, 0, 0], sizes = [1, 8, 16], strides = [1, 1, 1]} : vector<8x8x16xf32> to vector<1x8x16xf32>
    %303 = vector.shape_cast %302 : vector<1x8x16xf32> to vector<8x16xf32>
    %304 = vector.extract_strided_slice %301 {offsets = [1, 0, 0], sizes = [1, 8, 16], strides = [1, 1, 1]} : vector<8x8x16xf32> to vector<1x8x16xf32>
    %305 = vector.shape_cast %304 : vector<1x8x16xf32> to vector<8x16xf32>
    %306 = vector.extract_strided_slice %301 {offsets = [2, 0, 0], sizes = [1, 8, 16], strides = [1, 1, 1]} : vector<8x8x16xf32> to vector<1x8x16xf32>
    %307 = vector.shape_cast %306 : vector<1x8x16xf32> to vector<8x16xf32>
    %308 = vector.extract_strided_slice %301 {offsets = [3, 0, 0], sizes = [1, 8, 16], strides = [1, 1, 1]} : vector<8x8x16xf32> to vector<1x8x16xf32>
    %309 = vector.shape_cast %308 : vector<1x8x16xf32> to vector<8x16xf32>
    %310 = tpu.concatenate %303, %305, %307, %309 in 1 : vector<8x16xf32>, vector<8x16xf32>, vector<8x16xf32>, vector<8x16xf32> -> vector<8x64xf32>
    %311 = vector.extract_strided_slice %301 {offsets = [4, 0, 0], sizes = [1, 8, 16], strides = [1, 1, 1]} : vector<8x8x16xf32> to vector<1x8x16xf32>
    %312 = vector.shape_cast %311 : vector<1x8x16xf32> to vector<8x16xf32>
    %313 = vector.extract_strided_slice %301 {offsets = [5, 0, 0], sizes = [1, 8, 16], strides = [1, 1, 1]} : vector<8x8x16xf32> to vector<1x8x16xf32>
    %314 = vector.shape_cast %313 : vector<1x8x16xf32> to vector<8x16xf32>
    %315 = vector.extract_strided_slice %301 {offsets = [6, 0, 0], sizes = [1, 8, 16], strides = [1, 1, 1]} : vector<8x8x16xf32> to vector<1x8x16xf32>
    %316 = vector.shape_cast %315 : vector<1x8x16xf32> to vector<8x16xf32>
    %317 = vector.extract_strided_slice %301 {offsets = [7, 0, 0], sizes = [1, 8, 16], strides = [1, 1, 1]} : vector<8x8x16xf32> to vector<1x8x16xf32>
    %318 = vector.shape_cast %317 : vector<1x8x16xf32> to vector<8x16xf32>
    %319 = tpu.concatenate %312, %314, %316, %318 in 1 : vector<8x16xf32>, vector<8x16xf32>, vector<8x16xf32>, vector<8x16xf32> -> vector<8x64xf32>
    %320 = tpu.concatenate %310, %319 in 0 : vector<8x64xf32>, vector<8x64xf32> -> vector<16x64xf32>
    %c0_81 = arith.constant 0 : index
    %c0_82 = arith.constant 0 : index
    %321 = vector.load %arg22[%c0_81, %c0_82] : memref<64x64xf32, #tpu.memory_space<vmem>>, vector<64x64xf32>
    %cst_83 = arith.constant dense<0.000000e+00> : vector<16x64xf32>
    %322 = tpu.matmul %320, %321, %cst_83 {dimension_numbers = #tpu.dot_dimension_numbers<[1], [0], [0], [1], [0, 0, 1, 1], [], []>} : vector<16x64xf32>, vector<64x64xf32>, vector<16x64xf32> -> vector<16x64xf32>
    %c0_84 = arith.constant 0 : index
    %c0_85 = arith.constant 0 : index
    %323 = vector.load %arg23[%c0_84, %c0_85] : memref<1x64xf32, #tpu.memory_space<vmem>>, vector<1x64xf32>
    %324 = vector.broadcast %323 : vector<1x64xf32> to vector<16x64xf32>
    %325 = arith.addf %322, %324 : vector<16x64xf32>
    %326 = arith.addf %220, %325 : vector<16x64xf32>
    %c0_86 = arith.constant 0 : index
    %c0_87 = arith.constant 0 : index
    %327 = vector.load %arg24[%c0_86, %c0_87] : memref<1x64xf32, #tpu.memory_space<vmem>>, vector<1x64xf32>
    %c0_88 = arith.constant 0 : index
    %c0_89 = arith.constant 0 : index
    %328 = vector.load %arg25[%c0_88, %c0_89] : memref<1x64xf32, #tpu.memory_space<vmem>>, vector<1x64xf32>
    %cst_90 = arith.constant dense<0.000000e+00> : vector<16xf32>
    %329 = vector.multi_reduction <add>, %326, %cst_90 [1] : vector<16x64xf32> to vector<16xf32>
    %330 = vector.shape_cast %329 : vector<16xf32> to vector<16x1xf32>
    %cst_91 = arith.constant 6.400000e+01 : f32
    %331 = vector.broadcast %cst_91 : f32 to vector<16x1xf32>
    %332 = arith.divf %330, %331 : vector<16x1xf32>
    %333 = vector.broadcast %332 : vector<16x1xf32> to vector<16x64xf32>
    %334 = arith.subf %326, %333 : vector<16x64xf32>
    %335 = arith.mulf %334, %334 : vector<16x64xf32>
    %cst_92 = arith.constant dense<0.000000e+00> : vector<16xf32>
    %336 = vector.multi_reduction <add>, %335, %cst_92 [1] : vector<16x64xf32> to vector<16xf32>
    %337 = vector.shape_cast %336 : vector<16xf32> to vector<16x1xf32>
    %cst_93 = arith.constant 6.400000e+01 : f32
    %338 = vector.broadcast %cst_93 : f32 to vector<16x1xf32>
    %339 = arith.divf %337, %338 : vector<16x1xf32>
    %340 = vector.broadcast %332 : vector<16x1xf32> to vector<16x64xf32>
    %341 = arith.subf %326, %340 : vector<16x64xf32>
    %cst_94 = arith.constant 9.99999974E-6 : f32
    %342 = vector.broadcast %cst_94 : f32 to vector<16x1xf32>
    %343 = arith.addf %339, %342 : vector<16x1xf32>
    %344 = math.rsqrt %343 : vector<16x1xf32>
    %345 = vector.broadcast %344 : vector<16x1xf32> to vector<16x64xf32>
    %346 = arith.mulf %341, %345 : vector<16x64xf32>
    %347 = vector.broadcast %327 : vector<1x64xf32> to vector<16x64xf32>
    %348 = arith.mulf %346, %347 : vector<16x64xf32>
    %349 = vector.broadcast %328 : vector<1x64xf32> to vector<16x64xf32>
    %350 = arith.addf %348, %349 : vector<16x64xf32>
    %c0_95 = arith.constant 0 : index
    %c0_96 = arith.constant 0 : index
    %351 = vector.load %arg26[%c0_95, %c0_96] : memref<64x64xf32, #tpu.memory_space<vmem>>, vector<64x64xf32>
    %cst_97 = arith.constant dense<0.000000e+00> : vector<16x64xf32>
    %352 = tpu.matmul %350, %351, %cst_97 {dimension_numbers = #tpu.dot_dimension_numbers<[1], [0], [0], [1], [0, 0, 1, 1], [], []>} : vector<16x64xf32>, vector<64x64xf32>, vector<16x64xf32> -> vector<16x64xf32>
    %c0_98 = arith.constant 0 : index
    %c0_99 = arith.constant 0 : index
    %353 = vector.load %arg27[%c0_98, %c0_99] : memref<1x64xf32, #tpu.memory_space<vmem>>, vector<1x64xf32>
    %354 = vector.broadcast %353 : vector<1x64xf32> to vector<16x64xf32>
    %355 = arith.addf %352, %354 : vector<16x64xf32>
    %cst_100 = arith.constant 5.000000e-01 : f32
    %356 = vector.broadcast %cst_100 : f32 to vector<16x64xf32>
    %357 = arith.mulf %356, %355 : vector<16x64xf32>
    %cst_101 = arith.constant 4.471500e-02 : f32
    %358 = vector.broadcast %cst_101 : f32 to vector<16x64xf32>
    %359 = arith.mulf %358, %355 : vector<16x64xf32>
    %360 = arith.mulf %359, %355 : vector<16x64xf32>
    %361 = arith.mulf %360, %355 : vector<16x64xf32>
    %362 = arith.addf %355, %361 : vector<16x64xf32>
    %cst_102 = arith.constant 0.797884583 : f32
    %363 = vector.broadcast %cst_102 : f32 to vector<16x64xf32>
    %364 = arith.mulf %363, %362 : vector<16x64xf32>
    %365 = math.tanh %364 : vector<16x64xf32>
    %cst_103 = arith.constant 1.000000e+00 : f32
    %366 = vector.broadcast %cst_103 : f32 to vector<16x64xf32>
    %367 = arith.addf %366, %365 : vector<16x64xf32>
    %368 = arith.mulf %357, %367 : vector<16x64xf32>
    %c0_104 = arith.constant 0 : index
    %c0_105 = arith.constant 0 : index
    %369 = vector.load %arg28[%c0_104, %c0_105] : memref<64x64xf32, #tpu.memory_space<vmem>>, vector<64x64xf32>
    %cst_106 = arith.constant dense<0.000000e+00> : vector<16x64xf32>
    %370 = tpu.matmul %368, %369, %cst_106 {dimension_numbers = #tpu.dot_dimension_numbers<[1], [0], [0], [1], [0, 0, 1, 1], [], []>} : vector<16x64xf32>, vector<64x64xf32>, vector<16x64xf32> -> vector<16x64xf32>
    %c0_107 = arith.constant 0 : index
    %c0_108 = arith.constant 0 : index
    %371 = vector.load %arg29[%c0_107, %c0_108] : memref<1x64xf32, #tpu.memory_space<vmem>>, vector<1x64xf32>
    %372 = vector.broadcast %371 : vector<1x64xf32> to vector<16x64xf32>
    %373 = arith.addf %370, %372 : vector<16x64xf32>
    %374 = arith.addf %350, %373 : vector<16x64xf32>
    %c0_109 = arith.constant 0 : index
    %c0_110 = arith.constant 0 : index
    %375 = vector.load %arg30[%c0_109, %c0_110] : memref<1x64xf32, #tpu.memory_space<vmem>>, vector<1x64xf32>
    %c0_111 = arith.constant 0 : index
    %c0_112 = arith.constant 0 : index
    %376 = vector.load %arg31[%c0_111, %c0_112] : memref<1x64xf32, #tpu.memory_space<vmem>>, vector<1x64xf32>
    %cst_113 = arith.constant dense<0.000000e+00> : vector<16xf32>
    %377 = vector.multi_reduction <add>, %374, %cst_113 [1] : vector<16x64xf32> to vector<16xf32>
    %378 = vector.shape_cast %377 : vector<16xf32> to vector<16x1xf32>
    %cst_114 = arith.constant 6.400000e+01 : f32
    %379 = vector.broadcast %cst_114 : f32 to vector<16x1xf32>
    %380 = arith.divf %378, %379 : vector<16x1xf32>
    %381 = vector.broadcast %380 : vector<16x1xf32> to vector<16x64xf32>
    %382 = arith.subf %374, %381 : vector<16x64xf32>
    %383 = arith.mulf %382, %382 : vector<16x64xf32>
    %cst_115 = arith.constant dense<0.000000e+00> : vector<16xf32>
    %384 = vector.multi_reduction <add>, %383, %cst_115 [1] : vector<16x64xf32> to vector<16xf32>
    %385 = vector.shape_cast %384 : vector<16xf32> to vector<16x1xf32>
    %cst_116 = arith.constant 6.400000e+01 : f32
    %386 = vector.broadcast %cst_116 : f32 to vector<16x1xf32>
    %387 = arith.divf %385, %386 : vector<16x1xf32>
    %388 = vector.broadcast %380 : vector<16x1xf32> to vector<16x64xf32>
    %389 = arith.subf %374, %388 : vector<16x64xf32>
    %cst_117 = arith.constant 9.99999974E-6 : f32
    %390 = vector.broadcast %cst_117 : f32 to vector<16x1xf32>
    %391 = arith.addf %387, %390 : vector<16x1xf32>
    %392 = math.rsqrt %391 : vector<16x1xf32>
    %393 = vector.broadcast %392 : vector<16x1xf32> to vector<16x64xf32>
    %394 = arith.mulf %389, %393 : vector<16x64xf32>
    %395 = vector.broadcast %375 : vector<1x64xf32> to vector<16x64xf32>
    %396 = arith.mulf %394, %395 : vector<16x64xf32>
    %397 = vector.broadcast %376 : vector<1x64xf32> to vector<16x64xf32>
    %398 = arith.addf %396, %397 : vector<16x64xf32>
    %c0_118 = arith.constant 0 : index
    %c0_119 = arith.constant 0 : index
    %399 = vector.load %arg32[%c0_118, %c0_119] : memref<16x64xf32, #tpu.memory_space<vmem>>, vector<16x64xf32>
    %c0_120 = arith.constant 0 : index
    %c0_121 = arith.constant 0 : index
    %400 = vector.load %arg33[%c0_120, %c0_121] : memref<16x64xf32, #tpu.memory_space<vmem>>, vector<16x64xf32>
    %c0_122 = arith.constant 0 : index
    %c0_123 = arith.constant 0 : index
    %401 = vector.load %arg20[%c0_122, %c0_123] : memref<64x320xf32, #tpu.memory_space<vmem>>, vector<64x320xf32>
    %cst_124 = arith.constant dense<0.000000e+00> : vector<16x320xf32>
    %402 = tpu.matmul %398, %401, %cst_124 {dimension_numbers = #tpu.dot_dimension_numbers<[1], [0], [0], [1], [0, 0, 1, 1], [], []>} : vector<16x64xf32>, vector<64x320xf32>, vector<16x320xf32> -> vector<16x320xf32>
    %c0_125 = arith.constant 0 : index
    %c0_126 = arith.constant 0 : index
    %403 = vector.load %arg21[%c0_125, %c0_126] : memref<1x320xf32, #tpu.memory_space<vmem>>, vector<1x320xf32>
    %404 = vector.broadcast %403 : vector<1x320xf32> to vector<16x320xf32>
    %405 = arith.addf %402, %404 : vector<16x320xf32>
    %406 = vector.extract_strided_slice %405 {offsets = [0, 0], sizes = [16, 64], strides = [1, 1]} : vector<16x320xf32> to vector<16x64xf32>
    %407 = arith.mulf %406, %399 : vector<16x64xf32>
    %408 = vector.extract_strided_slice %405 {offsets = [0, 192], sizes = [16, 64], strides = [1, 1]} : vector<16x320xf32> to vector<16x64xf32>
    %409 = arith.mulf %408, %400 : vector<16x64xf32>
    %410 = arith.addf %407, %409 : vector<16x64xf32>
    %411 = vector.extract_strided_slice %405 {offsets = [0, 64], sizes = [16, 64], strides = [1, 1]} : vector<16x320xf32> to vector<16x64xf32>
    %412 = arith.mulf %411, %399 : vector<16x64xf32>
    %413 = vector.extract_strided_slice %405 {offsets = [0, 256], sizes = [16, 64], strides = [1, 1]} : vector<16x320xf32> to vector<16x64xf32>
    %414 = arith.mulf %413, %400 : vector<16x64xf32>
    %415 = arith.addf %412, %414 : vector<16x64xf32>
    %416 = vector.extract_strided_slice %405 {offsets = [0, 128], sizes = [16, 64], strides = [1, 1]} : vector<16x320xf32> to vector<16x64xf32>
    %417 = vector.extract_strided_slice %410 {offsets = [0, 0], sizes = [8, 16], strides = [1, 1]} : vector<16x64xf32> to vector<8x16xf32>
    %418 = vector.extract_strided_slice %410 {offsets = [0, 16], sizes = [8, 16], strides = [1, 1]} : vector<16x64xf32> to vector<8x16xf32>
    %419 = vector.extract_strided_slice %410 {offsets = [0, 32], sizes = [8, 16], strides = [1, 1]} : vector<16x64xf32> to vector<8x16xf32>
    %420 = vector.extract_strided_slice %410 {offsets = [0, 48], sizes = [8, 16], strides = [1, 1]} : vector<16x64xf32> to vector<8x16xf32>
    %421 = vector.extract_strided_slice %410 {offsets = [8, 0], sizes = [8, 16], strides = [1, 1]} : vector<16x64xf32> to vector<8x16xf32>
    %422 = vector.extract_strided_slice %410 {offsets = [8, 16], sizes = [8, 16], strides = [1, 1]} : vector<16x64xf32> to vector<8x16xf32>
    %423 = vector.extract_strided_slice %410 {offsets = [8, 32], sizes = [8, 16], strides = [1, 1]} : vector<16x64xf32> to vector<8x16xf32>
    %424 = vector.extract_strided_slice %410 {offsets = [8, 48], sizes = [8, 16], strides = [1, 1]} : vector<16x64xf32> to vector<8x16xf32>
    %425 = vector.shape_cast %417 : vector<8x16xf32> to vector<1x8x16xf32>
    %426 = vector.shape_cast %418 : vector<8x16xf32> to vector<1x8x16xf32>
    %427 = vector.shape_cast %419 : vector<8x16xf32> to vector<1x8x16xf32>
    %428 = vector.shape_cast %420 : vector<8x16xf32> to vector<1x8x16xf32>
    %429 = vector.shape_cast %421 : vector<8x16xf32> to vector<1x8x16xf32>
    %430 = vector.shape_cast %422 : vector<8x16xf32> to vector<1x8x16xf32>
    %431 = vector.shape_cast %423 : vector<8x16xf32> to vector<1x8x16xf32>
    %432 = vector.shape_cast %424 : vector<8x16xf32> to vector<1x8x16xf32>
    %433 = tpu.concatenate %425, %426, %427, %428, %429, %430, %431, %432 in 0 : vector<1x8x16xf32>, vector<1x8x16xf32>, vector<1x8x16xf32>, vector<1x8x16xf32>, vector<1x8x16xf32>, vector<1x8x16xf32>, vector<1x8x16xf32>, vector<1x8x16xf32> -> vector<8x8x16xf32>
    %434 = vector.extract_strided_slice %415 {offsets = [0, 0], sizes = [8, 16], strides = [1, 1]} : vector<16x64xf32> to vector<8x16xf32>
    %435 = vector.extract_strided_slice %415 {offsets = [0, 16], sizes = [8, 16], strides = [1, 1]} : vector<16x64xf32> to vector<8x16xf32>
    %436 = vector.extract_strided_slice %415 {offsets = [0, 32], sizes = [8, 16], strides = [1, 1]} : vector<16x64xf32> to vector<8x16xf32>
    %437 = vector.extract_strided_slice %415 {offsets = [0, 48], sizes = [8, 16], strides = [1, 1]} : vector<16x64xf32> to vector<8x16xf32>
    %438 = vector.extract_strided_slice %415 {offsets = [8, 0], sizes = [8, 16], strides = [1, 1]} : vector<16x64xf32> to vector<8x16xf32>
    %439 = vector.extract_strided_slice %415 {offsets = [8, 16], sizes = [8, 16], strides = [1, 1]} : vector<16x64xf32> to vector<8x16xf32>
    %440 = vector.extract_strided_slice %415 {offsets = [8, 32], sizes = [8, 16], strides = [1, 1]} : vector<16x64xf32> to vector<8x16xf32>
    %441 = vector.extract_strided_slice %415 {offsets = [8, 48], sizes = [8, 16], strides = [1, 1]} : vector<16x64xf32> to vector<8x16xf32>
    %442 = vector.shape_cast %434 : vector<8x16xf32> to vector<1x8x16xf32>
    %443 = vector.shape_cast %435 : vector<8x16xf32> to vector<1x8x16xf32>
    %444 = vector.shape_cast %436 : vector<8x16xf32> to vector<1x8x16xf32>
    %445 = vector.shape_cast %437 : vector<8x16xf32> to vector<1x8x16xf32>
    %446 = vector.shape_cast %438 : vector<8x16xf32> to vector<1x8x16xf32>
    %447 = vector.shape_cast %439 : vector<8x16xf32> to vector<1x8x16xf32>
    %448 = vector.shape_cast %440 : vector<8x16xf32> to vector<1x8x16xf32>
    %449 = vector.shape_cast %441 : vector<8x16xf32> to vector<1x8x16xf32>
    %450 = tpu.concatenate %442, %443, %444, %445, %446, %447, %448, %449 in 0 : vector<1x8x16xf32>, vector<1x8x16xf32>, vector<1x8x16xf32>, vector<1x8x16xf32>, vector<1x8x16xf32>, vector<1x8x16xf32>, vector<1x8x16xf32>, vector<1x8x16xf32> -> vector<8x8x16xf32>
    %451 = vector.extract_strided_slice %416 {offsets = [0, 0], sizes = [8, 16], strides = [1, 1]} : vector<16x64xf32> to vector<8x16xf32>
    %452 = vector.extract_strided_slice %416 {offsets = [0, 16], sizes = [8, 16], strides = [1, 1]} : vector<16x64xf32> to vector<8x16xf32>
    %453 = vector.extract_strided_slice %416 {offsets = [0, 32], sizes = [8, 16], strides = [1, 1]} : vector<16x64xf32> to vector<8x16xf32>
    %454 = vector.extract_strided_slice %416 {offsets = [0, 48], sizes = [8, 16], strides = [1, 1]} : vector<16x64xf32> to vector<8x16xf32>
    %455 = vector.extract_strided_slice %416 {offsets = [8, 0], sizes = [8, 16], strides = [1, 1]} : vector<16x64xf32> to vector<8x16xf32>
    %456 = vector.extract_strided_slice %416 {offsets = [8, 16], sizes = [8, 16], strides = [1, 1]} : vector<16x64xf32> to vector<8x16xf32>
    %457 = vector.extract_strided_slice %416 {offsets = [8, 32], sizes = [8, 16], strides = [1, 1]} : vector<16x64xf32> to vector<8x16xf32>
    %458 = vector.extract_strided_slice %416 {offsets = [8, 48], sizes = [8, 16], strides = [1, 1]} : vector<16x64xf32> to vector<8x16xf32>
    %459 = vector.shape_cast %451 : vector<8x16xf32> to vector<1x8x16xf32>
    %460 = vector.shape_cast %452 : vector<8x16xf32> to vector<1x8x16xf32>
    %461 = vector.shape_cast %453 : vector<8x16xf32> to vector<1x8x16xf32>
    %462 = vector.shape_cast %454 : vector<8x16xf32> to vector<1x8x16xf32>
    %463 = vector.shape_cast %455 : vector<8x16xf32> to vector<1x8x16xf32>
    %464 = vector.shape_cast %456 : vector<8x16xf32> to vector<1x8x16xf32>
    %465 = vector.shape_cast %457 : vector<8x16xf32> to vector<1x8x16xf32>
    %466 = vector.shape_cast %458 : vector<8x16xf32> to vector<1x8x16xf32>
    %467 = tpu.concatenate %459, %460, %461, %462, %463, %464, %465, %466 in 0 : vector<1x8x16xf32>, vector<1x8x16xf32>, vector<1x8x16xf32>, vector<1x8x16xf32>, vector<1x8x16xf32>, vector<1x8x16xf32>, vector<1x8x16xf32>, vector<1x8x16xf32> -> vector<8x8x16xf32>
    %cst_127 = arith.constant dense<0.000000e+00> : vector<8x8x8xf32>
    %468 = tpu.matmul %433, %450, %cst_127 {dimension_numbers = #tpu.dot_dimension_numbers<[2], [2], [1], [1], [0, 0, 0, 1, 1, 1], [0], [0]>} : vector<8x8x16xf32>, vector<8x8x16xf32>, vector<8x8x8xf32> -> vector<8x8x8xf32>
    %cst_128 = arith.constant dense<0xFF800000> : vector<8x8xf32>
    %469 = vector.multi_reduction <maximumf>, %468, %cst_128 [2] : vector<8x8x8xf32> to vector<8x8xf32>
    %470 = vector.shape_cast %469 : vector<8x8xf32> to vector<8x8x1xf32>
    %471 = vector.broadcast %470 : vector<8x8x1xf32> to vector<8x8x8xf32>
    %472 = arith.subf %468, %471 : vector<8x8x8xf32>
    %473 = math.exp %472 : vector<8x8x8xf32>
    %cst_129 = arith.constant dense<0.000000e+00> : vector<8x8xf32>
    %474 = vector.multi_reduction <add>, %473, %cst_129 [2] : vector<8x8x8xf32> to vector<8x8xf32>
    %475 = vector.shape_cast %474 : vector<8x8xf32> to vector<8x8x1xf32>
    %476 = tpu.reciprocal %475 {approx = true} : vector<8x8x1xf32> -> vector<8x8x1xf32>
    %477 = vector.broadcast %476 : vector<8x8x1xf32> to vector<8x8x8xf32>
    %478 = arith.mulf %473, %477 : vector<8x8x8xf32>
    %cst_130 = arith.constant dense<0.000000e+00> : vector<8x8x16xf32>
    %479 = tpu.matmul %478, %467, %cst_130 {dimension_numbers = #tpu.dot_dimension_numbers<[2], [1], [1], [2], [0, 0, 0, 1, 1, 2], [0], [0]>} : vector<8x8x8xf32>, vector<8x8x16xf32>, vector<8x8x16xf32> -> vector<8x8x16xf32>
    %480 = vector.extract_strided_slice %479 {offsets = [0, 0, 0], sizes = [1, 8, 16], strides = [1, 1, 1]} : vector<8x8x16xf32> to vector<1x8x16xf32>
    %481 = vector.shape_cast %480 : vector<1x8x16xf32> to vector<8x16xf32>
    %482 = vector.extract_strided_slice %479 {offsets = [1, 0, 0], sizes = [1, 8, 16], strides = [1, 1, 1]} : vector<8x8x16xf32> to vector<1x8x16xf32>
    %483 = vector.shape_cast %482 : vector<1x8x16xf32> to vector<8x16xf32>
    %484 = vector.extract_strided_slice %479 {offsets = [2, 0, 0], sizes = [1, 8, 16], strides = [1, 1, 1]} : vector<8x8x16xf32> to vector<1x8x16xf32>
    %485 = vector.shape_cast %484 : vector<1x8x16xf32> to vector<8x16xf32>
    %486 = vector.extract_strided_slice %479 {offsets = [3, 0, 0], sizes = [1, 8, 16], strides = [1, 1, 1]} : vector<8x8x16xf32> to vector<1x8x16xf32>
    %487 = vector.shape_cast %486 : vector<1x8x16xf32> to vector<8x16xf32>
    %488 = tpu.concatenate %481, %483, %485, %487 in 1 : vector<8x16xf32>, vector<8x16xf32>, vector<8x16xf32>, vector<8x16xf32> -> vector<8x64xf32>
    %489 = vector.extract_strided_slice %479 {offsets = [4, 0, 0], sizes = [1, 8, 16], strides = [1, 1, 1]} : vector<8x8x16xf32> to vector<1x8x16xf32>
    %490 = vector.shape_cast %489 : vector<1x8x16xf32> to vector<8x16xf32>
    %491 = vector.extract_strided_slice %479 {offsets = [5, 0, 0], sizes = [1, 8, 16], strides = [1, 1, 1]} : vector<8x8x16xf32> to vector<1x8x16xf32>
    %492 = vector.shape_cast %491 : vector<1x8x16xf32> to vector<8x16xf32>
    %493 = vector.extract_strided_slice %479 {offsets = [6, 0, 0], sizes = [1, 8, 16], strides = [1, 1, 1]} : vector<8x8x16xf32> to vector<1x8x16xf32>
    %494 = vector.shape_cast %493 : vector<1x8x16xf32> to vector<8x16xf32>
    %495 = vector.extract_strided_slice %479 {offsets = [7, 0, 0], sizes = [1, 8, 16], strides = [1, 1, 1]} : vector<8x8x16xf32> to vector<1x8x16xf32>
    %496 = vector.shape_cast %495 : vector<1x8x16xf32> to vector<8x16xf32>
    %497 = tpu.concatenate %490, %492, %494, %496 in 1 : vector<8x16xf32>, vector<8x16xf32>, vector<8x16xf32>, vector<8x16xf32> -> vector<8x64xf32>
    %498 = tpu.concatenate %488, %497 in 0 : vector<8x64xf32>, vector<8x64xf32> -> vector<16x64xf32>
    %c0_131 = arith.constant 0 : index
    %c0_132 = arith.constant 0 : index
    %499 = vector.load %arg22[%c0_131, %c0_132] : memref<64x64xf32, #tpu.memory_space<vmem>>, vector<64x64xf32>
    %cst_133 = arith.constant dense<0.000000e+00> : vector<16x64xf32>
    %500 = tpu.matmul %498, %499, %cst_133 {dimension_numbers = #tpu.dot_dimension_numbers<[1], [0], [0], [1], [0, 0, 1, 1], [], []>} : vector<16x64xf32>, vector<64x64xf32>, vector<16x64xf32> -> vector<16x64xf32>
    %c0_134 = arith.constant 0 : index
    %c0_135 = arith.constant 0 : index
    %501 = vector.load %arg23[%c0_134, %c0_135] : memref<1x64xf32, #tpu.memory_space<vmem>>, vector<1x64xf32>
    %502 = vector.broadcast %501 : vector<1x64xf32> to vector<16x64xf32>
    %503 = arith.addf %500, %502 : vector<16x64xf32>
    %504 = arith.addf %398, %503 : vector<16x64xf32>
    %c0_136 = arith.constant 0 : index
    %c0_137 = arith.constant 0 : index
    %505 = vector.load %arg24[%c0_136, %c0_137] : memref<1x64xf32, #tpu.memory_space<vmem>>, vector<1x64xf32>
    %c0_138 = arith.constant 0 : index
    %c0_139 = arith.constant 0 : index
    %506 = vector.load %arg25[%c0_138, %c0_139] : memref<1x64xf32, #tpu.memory_space<vmem>>, vector<1x64xf32>
    %cst_140 = arith.constant dense<0.000000e+00> : vector<16xf32>
    %507 = vector.multi_reduction <add>, %504, %cst_140 [1] : vector<16x64xf32> to vector<16xf32>
    %508 = vector.shape_cast %507 : vector<16xf32> to vector<16x1xf32>
    %cst_141 = arith.constant 6.400000e+01 : f32
    %509 = vector.broadcast %cst_141 : f32 to vector<16x1xf32>
    %510 = arith.divf %508, %509 : vector<16x1xf32>
    %511 = vector.broadcast %510 : vector<16x1xf32> to vector<16x64xf32>
    %512 = arith.subf %504, %511 : vector<16x64xf32>
    %513 = arith.mulf %512, %512 : vector<16x64xf32>
    %cst_142 = arith.constant dense<0.000000e+00> : vector<16xf32>
    %514 = vector.multi_reduction <add>, %513, %cst_142 [1] : vector<16x64xf32> to vector<16xf32>
    %515 = vector.shape_cast %514 : vector<16xf32> to vector<16x1xf32>
    %cst_143 = arith.constant 6.400000e+01 : f32
    %516 = vector.broadcast %cst_143 : f32 to vector<16x1xf32>
    %517 = arith.divf %515, %516 : vector<16x1xf32>
    %518 = vector.broadcast %510 : vector<16x1xf32> to vector<16x64xf32>
    %519 = arith.subf %504, %518 : vector<16x64xf32>
    %cst_144 = arith.constant 9.99999974E-6 : f32
    %520 = vector.broadcast %cst_144 : f32 to vector<16x1xf32>
    %521 = arith.addf %517, %520 : vector<16x1xf32>
    %522 = math.rsqrt %521 : vector<16x1xf32>
    %523 = vector.broadcast %522 : vector<16x1xf32> to vector<16x64xf32>
    %524 = arith.mulf %519, %523 : vector<16x64xf32>
    %525 = vector.broadcast %505 : vector<1x64xf32> to vector<16x64xf32>
    %526 = arith.mulf %524, %525 : vector<16x64xf32>
    %527 = vector.broadcast %506 : vector<1x64xf32> to vector<16x64xf32>
    %528 = arith.addf %526, %527 : vector<16x64xf32>
    %c0_145 = arith.constant 0 : index
    %c0_146 = arith.constant 0 : index
    %529 = vector.load %arg26[%c0_145, %c0_146] : memref<64x64xf32, #tpu.memory_space<vmem>>, vector<64x64xf32>
    %cst_147 = arith.constant dense<0.000000e+00> : vector<16x64xf32>
    %530 = tpu.matmul %528, %529, %cst_147 {dimension_numbers = #tpu.dot_dimension_numbers<[1], [0], [0], [1], [0, 0, 1, 1], [], []>} : vector<16x64xf32>, vector<64x64xf32>, vector<16x64xf32> -> vector<16x64xf32>
    %c0_148 = arith.constant 0 : index
    %c0_149 = arith.constant 0 : index
    %531 = vector.load %arg27[%c0_148, %c0_149] : memref<1x64xf32, #tpu.memory_space<vmem>>, vector<1x64xf32>
    %532 = vector.broadcast %531 : vector<1x64xf32> to vector<16x64xf32>
    %533 = arith.addf %530, %532 : vector<16x64xf32>
    %cst_150 = arith.constant 5.000000e-01 : f32
    %534 = vector.broadcast %cst_150 : f32 to vector<16x64xf32>
    %535 = arith.mulf %534, %533 : vector<16x64xf32>
    %cst_151 = arith.constant 4.471500e-02 : f32
    %536 = vector.broadcast %cst_151 : f32 to vector<16x64xf32>
    %537 = arith.mulf %536, %533 : vector<16x64xf32>
    %538 = arith.mulf %537, %533 : vector<16x64xf32>
    %539 = arith.mulf %538, %533 : vector<16x64xf32>
    %540 = arith.addf %533, %539 : vector<16x64xf32>
    %cst_152 = arith.constant 0.797884583 : f32
    %541 = vector.broadcast %cst_152 : f32 to vector<16x64xf32>
    %542 = arith.mulf %541, %540 : vector<16x64xf32>
    %543 = math.tanh %542 : vector<16x64xf32>
    %cst_153 = arith.constant 1.000000e+00 : f32
    %544 = vector.broadcast %cst_153 : f32 to vector<16x64xf32>
    %545 = arith.addf %544, %543 : vector<16x64xf32>
    %546 = arith.mulf %535, %545 : vector<16x64xf32>
    %c0_154 = arith.constant 0 : index
    %c0_155 = arith.constant 0 : index
    %547 = vector.load %arg28[%c0_154, %c0_155] : memref<64x64xf32, #tpu.memory_space<vmem>>, vector<64x64xf32>
    %cst_156 = arith.constant dense<0.000000e+00> : vector<16x64xf32>
    %548 = tpu.matmul %546, %547, %cst_156 {dimension_numbers = #tpu.dot_dimension_numbers<[1], [0], [0], [1], [0, 0, 1, 1], [], []>} : vector<16x64xf32>, vector<64x64xf32>, vector<16x64xf32> -> vector<16x64xf32>
    %c0_157 = arith.constant 0 : index
    %c0_158 = arith.constant 0 : index
    %549 = vector.load %arg29[%c0_157, %c0_158] : memref<1x64xf32, #tpu.memory_space<vmem>>, vector<1x64xf32>
    %550 = vector.broadcast %549 : vector<1x64xf32> to vector<16x64xf32>
    %551 = arith.addf %548, %550 : vector<16x64xf32>
    %552 = arith.addf %528, %551 : vector<16x64xf32>
    %c0_159 = arith.constant 0 : index
    %c0_160 = arith.constant 0 : index
    %553 = vector.load %arg30[%c0_159, %c0_160] : memref<1x64xf32, #tpu.memory_space<vmem>>, vector<1x64xf32>
    %c0_161 = arith.constant 0 : index
    %c0_162 = arith.constant 0 : index
    %554 = vector.load %arg31[%c0_161, %c0_162] : memref<1x64xf32, #tpu.memory_space<vmem>>, vector<1x64xf32>
    %cst_163 = arith.constant dense<0.000000e+00> : vector<16xf32>
    %555 = vector.multi_reduction <add>, %552, %cst_163 [1] : vector<16x64xf32> to vector<16xf32>
    %556 = vector.shape_cast %555 : vector<16xf32> to vector<16x1xf32>
    %cst_164 = arith.constant 6.400000e+01 : f32
    %557 = vector.broadcast %cst_164 : f32 to vector<16x1xf32>
    %558 = arith.divf %556, %557 : vector<16x1xf32>
    %559 = vector.broadcast %558 : vector<16x1xf32> to vector<16x64xf32>
    %560 = arith.subf %552, %559 : vector<16x64xf32>
    %561 = arith.mulf %560, %560 : vector<16x64xf32>
    %cst_165 = arith.constant dense<0.000000e+00> : vector<16xf32>
    %562 = vector.multi_reduction <add>, %561, %cst_165 [1] : vector<16x64xf32> to vector<16xf32>
    %563 = vector.shape_cast %562 : vector<16xf32> to vector<16x1xf32>
    %cst_166 = arith.constant 6.400000e+01 : f32
    %564 = vector.broadcast %cst_166 : f32 to vector<16x1xf32>
    %565 = arith.divf %563, %564 : vector<16x1xf32>
    %566 = vector.broadcast %558 : vector<16x1xf32> to vector<16x64xf32>
    %567 = arith.subf %552, %566 : vector<16x64xf32>
    %cst_167 = arith.constant 9.99999974E-6 : f32
    %568 = vector.broadcast %cst_167 : f32 to vector<16x1xf32>
    %569 = arith.addf %565, %568 : vector<16x1xf32>
    %570 = math.rsqrt %569 : vector<16x1xf32>
    %571 = vector.broadcast %570 : vector<16x1xf32> to vector<16x64xf32>
    %572 = arith.mulf %567, %571 : vector<16x64xf32>
    %573 = vector.broadcast %553 : vector<1x64xf32> to vector<16x64xf32>
    %574 = arith.mulf %572, %573 : vector<16x64xf32>
    %575 = vector.broadcast %554 : vector<1x64xf32> to vector<16x64xf32>
    %576 = arith.addf %574, %575 : vector<16x64xf32>
    %c0_168 = arith.constant 0 : index
    %c0_169 = arith.constant 0 : index
    %577 = vector.load %arg34[%c0_168, %c0_169] : memref<64x32xf32, #tpu.memory_space<vmem>>, vector<64x32xf32>
    %cst_170 = arith.constant dense<0.000000e+00> : vector<16x32xf32>
    %578 = tpu.matmul %576, %577, %cst_170 {dimension_numbers = #tpu.dot_dimension_numbers<[1], [0], [0], [1], [0, 0, 1, 1], [], []>} : vector<16x64xf32>, vector<64x32xf32>, vector<16x32xf32> -> vector<16x32xf32>
    %c0_171 = arith.constant 0 : index
    %c0_172 = arith.constant 0 : index
    %579 = vector.load %arg35[%c0_171, %c0_172] : memref<1x32xf32, #tpu.memory_space<vmem>>, vector<1x32xf32>
    %580 = vector.broadcast %579 : vector<1x32xf32> to vector<16x32xf32>
    %581 = arith.addf %578, %580 : vector<16x32xf32>
    %c0_173 = arith.constant 0 : index
    %c0_174 = arith.constant 0 : index
    %582 = vector.load %arg36[%c0_173, %c0_174] : memref<1x32xf32, #tpu.memory_space<vmem>>, vector<1x32xf32>
    %c0_175 = arith.constant 0 : index
    %c0_176 = arith.constant 0 : index
    %583 = vector.load %arg37[%c0_175, %c0_176] : memref<1x32xf32, #tpu.memory_space<vmem>>, vector<1x32xf32>
    %cst_177 = arith.constant dense<0.000000e+00> : vector<16xf32>
    %584 = vector.multi_reduction <add>, %581, %cst_177 [1] : vector<16x32xf32> to vector<16xf32>
    %585 = vector.shape_cast %584 : vector<16xf32> to vector<16x1xf32>
    %cst_178 = arith.constant 3.200000e+01 : f32
    %586 = vector.broadcast %cst_178 : f32 to vector<16x1xf32>
    %587 = arith.divf %585, %586 : vector<16x1xf32>
    %588 = vector.broadcast %587 : vector<16x1xf32> to vector<16x32xf32>
    %589 = arith.subf %581, %588 : vector<16x32xf32>
    %590 = arith.mulf %589, %589 : vector<16x32xf32>
    %cst_179 = arith.constant dense<0.000000e+00> : vector<16xf32>
    %591 = vector.multi_reduction <add>, %590, %cst_179 [1] : vector<16x32xf32> to vector<16xf32>
    %592 = vector.shape_cast %591 : vector<16xf32> to vector<16x1xf32>
    %cst_180 = arith.constant 3.200000e+01 : f32
    %593 = vector.broadcast %cst_180 : f32 to vector<16x1xf32>
    %594 = arith.divf %592, %593 : vector<16x1xf32>
    %595 = vector.broadcast %587 : vector<16x1xf32> to vector<16x32xf32>
    %596 = arith.subf %581, %595 : vector<16x32xf32>
    %cst_181 = arith.constant 9.99999974E-6 : f32
    %597 = vector.broadcast %cst_181 : f32 to vector<16x1xf32>
    %598 = arith.addf %594, %597 : vector<16x1xf32>
    %599 = math.rsqrt %598 : vector<16x1xf32>
    %600 = vector.broadcast %599 : vector<16x1xf32> to vector<16x32xf32>
    %601 = arith.mulf %596, %600 : vector<16x32xf32>
    %602 = vector.broadcast %582 : vector<1x32xf32> to vector<16x32xf32>
    %603 = arith.mulf %601, %602 : vector<16x32xf32>
    %604 = vector.broadcast %583 : vector<1x32xf32> to vector<16x32xf32>
    %605 = arith.addf %603, %604 : vector<16x32xf32>
    %cst_182 = arith.constant 5.000000e-01 : f32
    %606 = vector.broadcast %cst_182 : f32 to vector<16x32xf32>
    %607 = arith.mulf %606, %605 : vector<16x32xf32>
    %cst_183 = arith.constant 4.471500e-02 : f32
    %608 = vector.broadcast %cst_183 : f32 to vector<16x32xf32>
    %609 = arith.mulf %608, %605 : vector<16x32xf32>
    %610 = arith.mulf %609, %605 : vector<16x32xf32>
    %611 = arith.mulf %610, %605 : vector<16x32xf32>
    %612 = arith.addf %605, %611 : vector<16x32xf32>
    %cst_184 = arith.constant 0.797884583 : f32
    %613 = vector.broadcast %cst_184 : f32 to vector<16x32xf32>
    %614 = arith.mulf %613, %612 : vector<16x32xf32>
    %615 = math.tanh %614 : vector<16x32xf32>
    %cst_185 = arith.constant 1.000000e+00 : f32
    %616 = vector.broadcast %cst_185 : f32 to vector<16x32xf32>
    %617 = arith.addf %616, %615 : vector<16x32xf32>
    %618 = arith.mulf %607, %617 : vector<16x32xf32>
    %c0_186 = arith.constant 0 : index
    %c0_187 = arith.constant 0 : index
    %619 = vector.load %arg14[%c0_186, %c0_187] : memref<16x32xf32, #tpu.memory_space<vmem>>, vector<16x32xf32>
    %c0_188 = arith.constant 0 : index
    %c0_189 = arith.constant 0 : index
    %620 = vector.load %arg15[%c0_188, %c0_189] : memref<16x32xf32, #tpu.memory_space<vmem>>, vector<16x32xf32>
    %c0_190 = arith.constant 0 : index
    %c0_191 = arith.constant 0 : index
    %621 = vector.load %arg38[%c0_190, %c0_191] : memref<32x160xf32, #tpu.memory_space<vmem>>, vector<32x160xf32>
    %cst_192 = arith.constant dense<0.000000e+00> : vector<16x160xf32>
    %622 = tpu.matmul %618, %621, %cst_192 {dimension_numbers = #tpu.dot_dimension_numbers<[1], [0], [0], [1], [0, 0, 1, 1], [], []>} : vector<16x32xf32>, vector<32x160xf32>, vector<16x160xf32> -> vector<16x160xf32>
    %c0_193 = arith.constant 0 : index
    %c0_194 = arith.constant 0 : index
    %623 = vector.load %arg39[%c0_193, %c0_194] : memref<1x160xf32, #tpu.memory_space<vmem>>, vector<1x160xf32>
    %624 = vector.broadcast %623 : vector<1x160xf32> to vector<16x160xf32>
    %625 = arith.addf %622, %624 : vector<16x160xf32>
    %626 = vector.extract_strided_slice %625 {offsets = [0, 0], sizes = [16, 32], strides = [1, 1]} : vector<16x160xf32> to vector<16x32xf32>
    %627 = arith.mulf %626, %619 : vector<16x32xf32>
    %628 = vector.extract_strided_slice %625 {offsets = [0, 96], sizes = [16, 32], strides = [1, 1]} : vector<16x160xf32> to vector<16x32xf32>
    %629 = arith.mulf %628, %620 : vector<16x32xf32>
    %630 = arith.addf %627, %629 : vector<16x32xf32>
    %631 = vector.extract_strided_slice %625 {offsets = [0, 32], sizes = [16, 32], strides = [1, 1]} : vector<16x160xf32> to vector<16x32xf32>
    %632 = arith.mulf %631, %619 : vector<16x32xf32>
    %633 = vector.extract_strided_slice %625 {offsets = [0, 128], sizes = [16, 32], strides = [1, 1]} : vector<16x160xf32> to vector<16x32xf32>
    %634 = arith.mulf %633, %620 : vector<16x32xf32>
    %635 = arith.addf %632, %634 : vector<16x32xf32>
    %636 = vector.extract_strided_slice %625 {offsets = [0, 64], sizes = [16, 32], strides = [1, 1]} : vector<16x160xf32> to vector<16x32xf32>
    %637 = vector.extract_strided_slice %630 {offsets = [0, 0], sizes = [8, 8], strides = [1, 1]} : vector<16x32xf32> to vector<8x8xf32>
    %638 = vector.extract_strided_slice %630 {offsets = [0, 8], sizes = [8, 8], strides = [1, 1]} : vector<16x32xf32> to vector<8x8xf32>
    %639 = vector.extract_strided_slice %630 {offsets = [0, 16], sizes = [8, 8], strides = [1, 1]} : vector<16x32xf32> to vector<8x8xf32>
    %640 = vector.extract_strided_slice %630 {offsets = [0, 24], sizes = [8, 8], strides = [1, 1]} : vector<16x32xf32> to vector<8x8xf32>
    %641 = vector.extract_strided_slice %630 {offsets = [8, 0], sizes = [8, 8], strides = [1, 1]} : vector<16x32xf32> to vector<8x8xf32>
    %642 = vector.extract_strided_slice %630 {offsets = [8, 8], sizes = [8, 8], strides = [1, 1]} : vector<16x32xf32> to vector<8x8xf32>
    %643 = vector.extract_strided_slice %630 {offsets = [8, 16], sizes = [8, 8], strides = [1, 1]} : vector<16x32xf32> to vector<8x8xf32>
    %644 = vector.extract_strided_slice %630 {offsets = [8, 24], sizes = [8, 8], strides = [1, 1]} : vector<16x32xf32> to vector<8x8xf32>
    %645 = vector.shape_cast %637 : vector<8x8xf32> to vector<1x8x8xf32>
    %646 = vector.shape_cast %638 : vector<8x8xf32> to vector<1x8x8xf32>
    %647 = vector.shape_cast %639 : vector<8x8xf32> to vector<1x8x8xf32>
    %648 = vector.shape_cast %640 : vector<8x8xf32> to vector<1x8x8xf32>
    %649 = vector.shape_cast %641 : vector<8x8xf32> to vector<1x8x8xf32>
    %650 = vector.shape_cast %642 : vector<8x8xf32> to vector<1x8x8xf32>
    %651 = vector.shape_cast %643 : vector<8x8xf32> to vector<1x8x8xf32>
    %652 = vector.shape_cast %644 : vector<8x8xf32> to vector<1x8x8xf32>
    %653 = tpu.concatenate %645, %646, %647, %648, %649, %650, %651, %652 in 0 : vector<1x8x8xf32>, vector<1x8x8xf32>, vector<1x8x8xf32>, vector<1x8x8xf32>, vector<1x8x8xf32>, vector<1x8x8xf32>, vector<1x8x8xf32>, vector<1x8x8xf32> -> vector<8x8x8xf32>
    %654 = vector.extract_strided_slice %635 {offsets = [0, 0], sizes = [8, 8], strides = [1, 1]} : vector<16x32xf32> to vector<8x8xf32>
    %655 = vector.extract_strided_slice %635 {offsets = [0, 8], sizes = [8, 8], strides = [1, 1]} : vector<16x32xf32> to vector<8x8xf32>
    %656 = vector.extract_strided_slice %635 {offsets = [0, 16], sizes = [8, 8], strides = [1, 1]} : vector<16x32xf32> to vector<8x8xf32>
    %657 = vector.extract_strided_slice %635 {offsets = [0, 24], sizes = [8, 8], strides = [1, 1]} : vector<16x32xf32> to vector<8x8xf32>
    %658 = vector.extract_strided_slice %635 {offsets = [8, 0], sizes = [8, 8], strides = [1, 1]} : vector<16x32xf32> to vector<8x8xf32>
    %659 = vector.extract_strided_slice %635 {offsets = [8, 8], sizes = [8, 8], strides = [1, 1]} : vector<16x32xf32> to vector<8x8xf32>
    %660 = vector.extract_strided_slice %635 {offsets = [8, 16], sizes = [8, 8], strides = [1, 1]} : vector<16x32xf32> to vector<8x8xf32>
    %661 = vector.extract_strided_slice %635 {offsets = [8, 24], sizes = [8, 8], strides = [1, 1]} : vector<16x32xf32> to vector<8x8xf32>
    %662 = vector.shape_cast %654 : vector<8x8xf32> to vector<1x8x8xf32>
    %663 = vector.shape_cast %655 : vector<8x8xf32> to vector<1x8x8xf32>
    %664 = vector.shape_cast %656 : vector<8x8xf32> to vector<1x8x8xf32>
    %665 = vector.shape_cast %657 : vector<8x8xf32> to vector<1x8x8xf32>
    %666 = vector.shape_cast %658 : vector<8x8xf32> to vector<1x8x8xf32>
    %667 = vector.shape_cast %659 : vector<8x8xf32> to vector<1x8x8xf32>
    %668 = vector.shape_cast %660 : vector<8x8xf32> to vector<1x8x8xf32>
    %669 = vector.shape_cast %661 : vector<8x8xf32> to vector<1x8x8xf32>
    %670 = tpu.concatenate %662, %663, %664, %665, %666, %667, %668, %669 in 0 : vector<1x8x8xf32>, vector<1x8x8xf32>, vector<1x8x8xf32>, vector<1x8x8xf32>, vector<1x8x8xf32>, vector<1x8x8xf32>, vector<1x8x8xf32>, vector<1x8x8xf32> -> vector<8x8x8xf32>
    %671 = vector.extract_strided_slice %636 {offsets = [0, 0], sizes = [8, 8], strides = [1, 1]} : vector<16x32xf32> to vector<8x8xf32>
    %672 = vector.extract_strided_slice %636 {offsets = [0, 8], sizes = [8, 8], strides = [1, 1]} : vector<16x32xf32> to vector<8x8xf32>
    %673 = vector.extract_strided_slice %636 {offsets = [0, 16], sizes = [8, 8], strides = [1, 1]} : vector<16x32xf32> to vector<8x8xf32>
    %674 = vector.extract_strided_slice %636 {offsets = [0, 24], sizes = [8, 8], strides = [1, 1]} : vector<16x32xf32> to vector<8x8xf32>
    %675 = vector.extract_strided_slice %636 {offsets = [8, 0], sizes = [8, 8], strides = [1, 1]} : vector<16x32xf32> to vector<8x8xf32>
    %676 = vector.extract_strided_slice %636 {offsets = [8, 8], sizes = [8, 8], strides = [1, 1]} : vector<16x32xf32> to vector<8x8xf32>
    %677 = vector.extract_strided_slice %636 {offsets = [8, 16], sizes = [8, 8], strides = [1, 1]} : vector<16x32xf32> to vector<8x8xf32>
    %678 = vector.extract_strided_slice %636 {offsets = [8, 24], sizes = [8, 8], strides = [1, 1]} : vector<16x32xf32> to vector<8x8xf32>
    %679 = vector.shape_cast %671 : vector<8x8xf32> to vector<1x8x8xf32>
    %680 = vector.shape_cast %672 : vector<8x8xf32> to vector<1x8x8xf32>
    %681 = vector.shape_cast %673 : vector<8x8xf32> to vector<1x8x8xf32>
    %682 = vector.shape_cast %674 : vector<8x8xf32> to vector<1x8x8xf32>
    %683 = vector.shape_cast %675 : vector<8x8xf32> to vector<1x8x8xf32>
    %684 = vector.shape_cast %676 : vector<8x8xf32> to vector<1x8x8xf32>
    %685 = vector.shape_cast %677 : vector<8x8xf32> to vector<1x8x8xf32>
    %686 = vector.shape_cast %678 : vector<8x8xf32> to vector<1x8x8xf32>
    %687 = tpu.concatenate %679, %680, %681, %682, %683, %684, %685, %686 in 0 : vector<1x8x8xf32>, vector<1x8x8xf32>, vector<1x8x8xf32>, vector<1x8x8xf32>, vector<1x8x8xf32>, vector<1x8x8xf32>, vector<1x8x8xf32>, vector<1x8x8xf32> -> vector<8x8x8xf32>
    %cst_195 = arith.constant dense<0.000000e+00> : vector<8x8x8xf32>
    %688 = tpu.matmul %653, %670, %cst_195 {dimension_numbers = #tpu.dot_dimension_numbers<[2], [2], [1], [1], [0, 0, 0, 1, 1, 1], [0], [0]>} : vector<8x8x8xf32>, vector<8x8x8xf32>, vector<8x8x8xf32> -> vector<8x8x8xf32>
    %cst_196 = arith.constant dense<0xFF800000> : vector<8x8xf32>
    %689 = vector.multi_reduction <maximumf>, %688, %cst_196 [2] : vector<8x8x8xf32> to vector<8x8xf32>
    %690 = vector.shape_cast %689 : vector<8x8xf32> to vector<8x8x1xf32>
    %691 = vector.broadcast %690 : vector<8x8x1xf32> to vector<8x8x8xf32>
    %692 = arith.subf %688, %691 : vector<8x8x8xf32>
    %693 = math.exp %692 : vector<8x8x8xf32>
    %cst_197 = arith.constant dense<0.000000e+00> : vector<8x8xf32>
    %694 = vector.multi_reduction <add>, %693, %cst_197 [2] : vector<8x8x8xf32> to vector<8x8xf32>
    %695 = vector.shape_cast %694 : vector<8x8xf32> to vector<8x8x1xf32>
    %696 = tpu.reciprocal %695 {approx = true} : vector<8x8x1xf32> -> vector<8x8x1xf32>
    %697 = vector.broadcast %696 : vector<8x8x1xf32> to vector<8x8x8xf32>
    %698 = arith.mulf %693, %697 : vector<8x8x8xf32>
    %cst_198 = arith.constant dense<0.000000e+00> : vector<8x8x8xf32>
    %699 = tpu.matmul %698, %687, %cst_198 {dimension_numbers = #tpu.dot_dimension_numbers<[2], [1], [1], [2], [0, 0, 0, 1, 1, 2], [0], [0]>} : vector<8x8x8xf32>, vector<8x8x8xf32>, vector<8x8x8xf32> -> vector<8x8x8xf32>
    %700 = vector.extract_strided_slice %699 {offsets = [0, 0, 0], sizes = [1, 8, 8], strides = [1, 1, 1]} : vector<8x8x8xf32> to vector<1x8x8xf32>
    %701 = vector.shape_cast %700 : vector<1x8x8xf32> to vector<8x8xf32>
    %702 = vector.extract_strided_slice %699 {offsets = [1, 0, 0], sizes = [1, 8, 8], strides = [1, 1, 1]} : vector<8x8x8xf32> to vector<1x8x8xf32>
    %703 = vector.shape_cast %702 : vector<1x8x8xf32> to vector<8x8xf32>
    %704 = vector.extract_strided_slice %699 {offsets = [2, 0, 0], sizes = [1, 8, 8], strides = [1, 1, 1]} : vector<8x8x8xf32> to vector<1x8x8xf32>
    %705 = vector.shape_cast %704 : vector<1x8x8xf32> to vector<8x8xf32>
    %706 = vector.extract_strided_slice %699 {offsets = [3, 0, 0], sizes = [1, 8, 8], strides = [1, 1, 1]} : vector<8x8x8xf32> to vector<1x8x8xf32>
    %707 = vector.shape_cast %706 : vector<1x8x8xf32> to vector<8x8xf32>
    %708 = tpu.concatenate %701, %703, %705, %707 in 1 : vector<8x8xf32>, vector<8x8xf32>, vector<8x8xf32>, vector<8x8xf32> -> vector<8x32xf32>
    %709 = vector.extract_strided_slice %699 {offsets = [4, 0, 0], sizes = [1, 8, 8], strides = [1, 1, 1]} : vector<8x8x8xf32> to vector<1x8x8xf32>
    %710 = vector.shape_cast %709 : vector<1x8x8xf32> to vector<8x8xf32>
    %711 = vector.extract_strided_slice %699 {offsets = [5, 0, 0], sizes = [1, 8, 8], strides = [1, 1, 1]} : vector<8x8x8xf32> to vector<1x8x8xf32>
    %712 = vector.shape_cast %711 : vector<1x8x8xf32> to vector<8x8xf32>
    %713 = vector.extract_strided_slice %699 {offsets = [6, 0, 0], sizes = [1, 8, 8], strides = [1, 1, 1]} : vector<8x8x8xf32> to vector<1x8x8xf32>
    %714 = vector.shape_cast %713 : vector<1x8x8xf32> to vector<8x8xf32>
    %715 = vector.extract_strided_slice %699 {offsets = [7, 0, 0], sizes = [1, 8, 8], strides = [1, 1, 1]} : vector<8x8x8xf32> to vector<1x8x8xf32>
    %716 = vector.shape_cast %715 : vector<1x8x8xf32> to vector<8x8xf32>
    %717 = tpu.concatenate %710, %712, %714, %716 in 1 : vector<8x8xf32>, vector<8x8xf32>, vector<8x8xf32>, vector<8x8xf32> -> vector<8x32xf32>
    %718 = tpu.concatenate %708, %717 in 0 : vector<8x32xf32>, vector<8x32xf32> -> vector<16x32xf32>
    %c0_199 = arith.constant 0 : index
    %c0_200 = arith.constant 0 : index
    %719 = vector.load %arg40[%c0_199, %c0_200] : memref<32x32xf32, #tpu.memory_space<vmem>>, vector<32x32xf32>
    %cst_201 = arith.constant dense<0.000000e+00> : vector<16x32xf32>
    %720 = tpu.matmul %718, %719, %cst_201 {dimension_numbers = #tpu.dot_dimension_numbers<[1], [0], [0], [1], [0, 0, 1, 1], [], []>} : vector<16x32xf32>, vector<32x32xf32>, vector<16x32xf32> -> vector<16x32xf32>
    %c0_202 = arith.constant 0 : index
    %c0_203 = arith.constant 0 : index
    %721 = vector.load %arg41[%c0_202, %c0_203] : memref<1x32xf32, #tpu.memory_space<vmem>>, vector<1x32xf32>
    %722 = vector.broadcast %721 : vector<1x32xf32> to vector<16x32xf32>
    %723 = arith.addf %720, %722 : vector<16x32xf32>
    %724 = arith.addf %618, %723 : vector<16x32xf32>
    %c0_204 = arith.constant 0 : index
    %c0_205 = arith.constant 0 : index
    %725 = vector.load %arg42[%c0_204, %c0_205] : memref<1x32xf32, #tpu.memory_space<vmem>>, vector<1x32xf32>
    %c0_206 = arith.constant 0 : index
    %c0_207 = arith.constant 0 : index
    %726 = vector.load %arg43[%c0_206, %c0_207] : memref<1x32xf32, #tpu.memory_space<vmem>>, vector<1x32xf32>
    %cst_208 = arith.constant dense<0.000000e+00> : vector<16xf32>
    %727 = vector.multi_reduction <add>, %724, %cst_208 [1] : vector<16x32xf32> to vector<16xf32>
    %728 = vector.shape_cast %727 : vector<16xf32> to vector<16x1xf32>
    %cst_209 = arith.constant 3.200000e+01 : f32
    %729 = vector.broadcast %cst_209 : f32 to vector<16x1xf32>
    %730 = arith.divf %728, %729 : vector<16x1xf32>
    %731 = vector.broadcast %730 : vector<16x1xf32> to vector<16x32xf32>
    %732 = arith.subf %724, %731 : vector<16x32xf32>
    %733 = arith.mulf %732, %732 : vector<16x32xf32>
    %cst_210 = arith.constant dense<0.000000e+00> : vector<16xf32>
    %734 = vector.multi_reduction <add>, %733, %cst_210 [1] : vector<16x32xf32> to vector<16xf32>
    %735 = vector.shape_cast %734 : vector<16xf32> to vector<16x1xf32>
    %cst_211 = arith.constant 3.200000e+01 : f32
    %736 = vector.broadcast %cst_211 : f32 to vector<16x1xf32>
    %737 = arith.divf %735, %736 : vector<16x1xf32>
    %738 = vector.broadcast %730 : vector<16x1xf32> to vector<16x32xf32>
    %739 = arith.subf %724, %738 : vector<16x32xf32>
    %cst_212 = arith.constant 9.99999974E-6 : f32
    %740 = vector.broadcast %cst_212 : f32 to vector<16x1xf32>
    %741 = arith.addf %737, %740 : vector<16x1xf32>
    %742 = math.rsqrt %741 : vector<16x1xf32>
    %743 = vector.broadcast %742 : vector<16x1xf32> to vector<16x32xf32>
    %744 = arith.mulf %739, %743 : vector<16x32xf32>
    %745 = vector.broadcast %725 : vector<1x32xf32> to vector<16x32xf32>
    %746 = arith.mulf %744, %745 : vector<16x32xf32>
    %747 = vector.broadcast %726 : vector<1x32xf32> to vector<16x32xf32>
    %748 = arith.addf %746, %747 : vector<16x32xf32>
    %c0_213 = arith.constant 0 : index
    %c0_214 = arith.constant 0 : index
    %749 = vector.load %arg44[%c0_213, %c0_214] : memref<32x64xf32, #tpu.memory_space<vmem>>, vector<32x64xf32>
    %cst_215 = arith.constant dense<0.000000e+00> : vector<16x64xf32>
    %750 = tpu.matmul %748, %749, %cst_215 {dimension_numbers = #tpu.dot_dimension_numbers<[1], [0], [0], [1], [0, 0, 1, 1], [], []>} : vector<16x32xf32>, vector<32x64xf32>, vector<16x64xf32> -> vector<16x64xf32>
    %c0_216 = arith.constant 0 : index
    %c0_217 = arith.constant 0 : index
    %751 = vector.load %arg45[%c0_216, %c0_217] : memref<1x64xf32, #tpu.memory_space<vmem>>, vector<1x64xf32>
    %752 = vector.broadcast %751 : vector<1x64xf32> to vector<16x64xf32>
    %753 = arith.addf %750, %752 : vector<16x64xf32>
    %cst_218 = arith.constant 5.000000e-01 : f32
    %754 = vector.broadcast %cst_218 : f32 to vector<16x64xf32>
    %755 = arith.mulf %754, %753 : vector<16x64xf32>
    %cst_219 = arith.constant 4.471500e-02 : f32
    %756 = vector.broadcast %cst_219 : f32 to vector<16x64xf32>
    %757 = arith.mulf %756, %753 : vector<16x64xf32>
    %758 = arith.mulf %757, %753 : vector<16x64xf32>
    %759 = arith.mulf %758, %753 : vector<16x64xf32>
    %760 = arith.addf %753, %759 : vector<16x64xf32>
    %cst_220 = arith.constant 0.797884583 : f32
    %761 = vector.broadcast %cst_220 : f32 to vector<16x64xf32>
    %762 = arith.mulf %761, %760 : vector<16x64xf32>
    %763 = math.tanh %762 : vector<16x64xf32>
    %cst_221 = arith.constant 1.000000e+00 : f32
    %764 = vector.broadcast %cst_221 : f32 to vector<16x64xf32>
    %765 = arith.addf %764, %763 : vector<16x64xf32>
    %766 = arith.mulf %755, %765 : vector<16x64xf32>
    %c0_222 = arith.constant 0 : index
    %c0_223 = arith.constant 0 : index
    %767 = vector.load %arg46[%c0_222, %c0_223] : memref<64x32xf32, #tpu.memory_space<vmem>>, vector<64x32xf32>
    %cst_224 = arith.constant dense<0.000000e+00> : vector<16x32xf32>
    %768 = tpu.matmul %766, %767, %cst_224 {dimension_numbers = #tpu.dot_dimension_numbers<[1], [0], [0], [1], [0, 0, 1, 1], [], []>} : vector<16x64xf32>, vector<64x32xf32>, vector<16x32xf32> -> vector<16x32xf32>
    %c0_225 = arith.constant 0 : index
    %c0_226 = arith.constant 0 : index
    %769 = vector.load %arg47[%c0_225, %c0_226] : memref<1x32xf32, #tpu.memory_space<vmem>>, vector<1x32xf32>
    %770 = vector.broadcast %769 : vector<1x32xf32> to vector<16x32xf32>
    %771 = arith.addf %768, %770 : vector<16x32xf32>
    %772 = arith.addf %748, %771 : vector<16x32xf32>
    %c0_227 = arith.constant 0 : index
    %c0_228 = arith.constant 0 : index
    %773 = vector.load %arg48[%c0_227, %c0_228] : memref<1x32xf32, #tpu.memory_space<vmem>>, vector<1x32xf32>
    %c0_229 = arith.constant 0 : index
    %c0_230 = arith.constant 0 : index
    %774 = vector.load %arg49[%c0_229, %c0_230] : memref<1x32xf32, #tpu.memory_space<vmem>>, vector<1x32xf32>
    %cst_231 = arith.constant dense<0.000000e+00> : vector<16xf32>
    %775 = vector.multi_reduction <add>, %772, %cst_231 [1] : vector<16x32xf32> to vector<16xf32>
    %776 = vector.shape_cast %775 : vector<16xf32> to vector<16x1xf32>
    %cst_232 = arith.constant 3.200000e+01 : f32
    %777 = vector.broadcast %cst_232 : f32 to vector<16x1xf32>
    %778 = arith.divf %776, %777 : vector<16x1xf32>
    %779 = vector.broadcast %778 : vector<16x1xf32> to vector<16x32xf32>
    %780 = arith.subf %772, %779 : vector<16x32xf32>
    %781 = arith.mulf %780, %780 : vector<16x32xf32>
    %cst_233 = arith.constant dense<0.000000e+00> : vector<16xf32>
    %782 = vector.multi_reduction <add>, %781, %cst_233 [1] : vector<16x32xf32> to vector<16xf32>
    %783 = vector.shape_cast %782 : vector<16xf32> to vector<16x1xf32>
    %cst_234 = arith.constant 3.200000e+01 : f32
    %784 = vector.broadcast %cst_234 : f32 to vector<16x1xf32>
    %785 = arith.divf %783, %784 : vector<16x1xf32>
    %786 = vector.broadcast %778 : vector<16x1xf32> to vector<16x32xf32>
    %787 = arith.subf %772, %786 : vector<16x32xf32>
    %cst_235 = arith.constant 9.99999974E-6 : f32
    %788 = vector.broadcast %cst_235 : f32 to vector<16x1xf32>
    %789 = arith.addf %785, %788 : vector<16x1xf32>
    %790 = math.rsqrt %789 : vector<16x1xf32>
    %791 = vector.broadcast %790 : vector<16x1xf32> to vector<16x32xf32>
    %792 = arith.mulf %787, %791 : vector<16x32xf32>
    %793 = vector.broadcast %773 : vector<1x32xf32> to vector<16x32xf32>
    %794 = arith.mulf %792, %793 : vector<16x32xf32>
    %795 = vector.broadcast %774 : vector<1x32xf32> to vector<16x32xf32>
    %796 = arith.addf %794, %795 : vector<16x32xf32>
    %797 = vector.extract_strided_slice %796 {offsets = [7, 0], sizes = [1, 32], strides = [1, 1]} : vector<16x32xf32> to vector<1x32xf32>
    %798 = vector.extract_strided_slice %796 {offsets = [15, 0], sizes = [1, 32], strides = [1, 1]} : vector<16x32xf32> to vector<1x32xf32>
    %799 = tpu.concatenate %797, %798 in 0 : vector<1x32xf32>, vector<1x32xf32> -> vector<2x32xf32>
    %c0_236 = arith.constant 0 : index
    %c0_237 = arith.constant 0 : index
    %800 = vector.load %arg50[%c0_236, %c0_237] : memref<32x128xf32, #tpu.memory_space<vmem>>, vector<32x128xf32>
    %cst_238 = arith.constant dense<0.000000e+00> : vector<2x128xf32>
    %801 = tpu.matmul %799, %800, %cst_238 {dimension_numbers = #tpu.dot_dimension_numbers<[1], [0], [0], [1], [0, 0, 1, 1], [], []>} : vector<2x32xf32>, vector<32x128xf32>, vector<2x128xf32> -> vector<2x128xf32>
    %c0_239 = arith.constant 0 : index
    %c0_240 = arith.constant 0 : index
    %802 = vector.load %arg51[%c0_239, %c0_240] : memref<1x128xf32, #tpu.memory_space<vmem>>, vector<1x128xf32>
    %803 = vector.broadcast %802 : vector<1x128xf32> to vector<2x128xf32>
    %804 = arith.addf %801, %803 : vector<2x128xf32>
    %c0_241 = arith.constant 0 : index
    %c0_242 = arith.constant 0 : index
    %805 = vector.load %arg52[%c0_241, %c0_242] : memref<2x128xf32, #tpu.memory_space<vmem>>, vector<2x128xf32>
    tpu.vector_store %arg52[%c0_241, %c0_242], %804 {strides = array<i32>} : memref<2x128xf32, #tpu.memory_space<vmem>>, vector<2x128xf32>,
    return
  }
  func.func @transform_0(%arg0: i32) -> (i32, i32) {
    %c0_i32 = arith.constant 0 : i32
    %c0_i32_0 = arith.constant 0 : i32
    %c0_i32_1 = arith.constant 0 : i32
    return %c0_i32, %c0_i32_0 : i32, i32
  }
  func.func @transform_1(%arg0: i32) -> (i32, i32) {
    %c0_i32 = arith.constant 0 : i32
    %c0_i32_0 = arith.constant 0 : i32
    %c0_i32_1 = arith.constant 0 : i32
    return %c0_i32, %c0_i32_0 : i32, i32
  }
  func.func @transform_2(%arg0: i32) -> (i32, i32) {
    %c0_i32 = arith.constant 0 : i32
    %c0_i32_0 = arith.constant 0 : i32
    %c0_i32_1 = arith.constant 0 : i32
    return %c0_i32, %c0_i32_0 : i32, i32
  }
  func.func @transform_3(%arg0: i32) -> (i32, i32) {
    %c0_i32 = arith.constant 0 : i32
    %c0_i32_0 = arith.constant 0 : i32
    %c0_i32_1 = arith.constant 0 : i32
    return %c0_i32, %c0_i32_0 : i32, i32
  }
  func.func @transform_4(%arg0: i32) -> (i32, i32) {
    %c0_i32 = arith.constant 0 : i32
    %c0_i32_0 = arith.constant 0 : i32
    %c0_i32_1 = arith.constant 0 : i32
    return %c0_i32, %c0_i32_0 : i32, i32
  }
  func.func @transform_5(%arg0: i32) -> (i32, i32) {
    %c0_i32 = arith.constant 0 : i32
    %c0_i32_0 = arith.constant 0 : i32
    %c0_i32_1 = arith.constant 0 : i32
    return %c0_i32, %c0_i32_0 : i32, i32
  }
  func.func @transform_6(%arg0: i32) -> (i32, i32) {
    %c0_i32 = arith.constant 0 : i32
    %c0_i32_0 = arith.constant 0 : i32
    %c0_i32_1 = arith.constant 0 : i32
    return %c0_i32, %c0_i32_0 : i32, i32
  }
  func.func @transform_7(%arg0: i32) -> (i32, i32) {
    %c0_i32 = arith.constant 0 : i32
    %c0_i32_0 = arith.constant 0 : i32
    %c0_i32_1 = arith.constant 0 : i32
    return %c0_i32, %c0_i32_0 : i32, i32
  }
  func.func @transform_8(%arg0: i32) -> (i32, i32) {
    %c0_i32 = arith.constant 0 : i32
    %c0_i32_0 = arith.constant 0 : i32
    %c0_i32_1 = arith.constant 0 : i32
    return %c0_i32, %c0_i32_0 : i32, i32
  }
  func.func @transform_9(%arg0: i32) -> (i32, i32) {
    %c0_i32 = arith.constant 0 : i32
    %c0_i32_0 = arith.constant 0 : i32
    %c0_i32_1 = arith.constant 0 : i32
    return %c0_i32, %c0_i32_0 : i32, i32
  }
  func.func @transform_10(%arg0: i32) -> (i32, i32) {
    %c0_i32 = arith.constant 0 : i32
    %c0_i32_0 = arith.constant 0 : i32
    %c0_i32_1 = arith.constant 0 : i32
    return %c0_i32, %c0_i32_0 : i32, i32
  }
  func.func @transform_11(%arg0: i32) -> (i32, i32) {
    %c0_i32 = arith.constant 0 : i32
    %c0_i32_0 = arith.constant 0 : i32
    %c0_i32_1 = arith.constant 0 : i32
    return %c0_i32, %c0_i32_0 : i32, i32
  }
  func.func @transform_12(%arg0: i32) -> (i32, i32) {
    %c0_i32 = arith.constant 0 : i32
    %c0_i32_0 = arith.constant 0 : i32
    %c0_i32_1 = arith.constant 0 : i32
    return %c0_i32, %c0_i32_0 : i32, i32
  }
  func.func @transform_13(%arg0: i32) -> (i32, i32) {
    %c0_i32 = arith.constant 0 : i32
    %c0_i32_0 = arith.constant 0 : i32
    %c0_i32_1 = arith.constant 0 : i32
    return %c0_i32, %c0_i32_0 : i32, i32
  }
  func.func @transform_14(%arg0: i32) -> (i32, i32) {
    %c0_i32 = arith.constant 0 : i32
    %c0_i32_0 = arith.constant 0 : i32
    %c0_i32_1 = arith.constant 0 : i32
    return %c0_i32, %c0_i32_0 : i32, i32
  }
  func.func @transform_15(%arg0: i32) -> (i32, i32) {
    %c0_i32 = arith.constant 0 : i32
    %c0_i32_0 = arith.constant 0 : i32
    %c0_i32_1 = arith.constant 0 : i32
    return %c0_i32, %c0_i32_0 : i32, i32
  }
  func.func @transform_16(%arg0: i32) -> (i32, i32) {
    %c0_i32 = arith.constant 0 : i32
    %c0_i32_0 = arith.constant 0 : i32
    %c0_i32_1 = arith.constant 0 : i32
    return %c0_i32, %c0_i32_0 : i32, i32
  }
  func.func @transform_17(%arg0: i32) -> (i32, i32) {
    %c0_i32 = arith.constant 0 : i32
    %c0_i32_0 = arith.constant 0 : i32
    %c0_i32_1 = arith.constant 0 : i32
    return %c0_i32, %c0_i32_0 : i32, i32
  }
  func.func @transform_18(%arg0: i32) -> (i32, i32) {
    %c0_i32 = arith.constant 0 : i32
    %c0_i32_0 = arith.constant 0 : i32
    %c0_i32_1 = arith.constant 0 : i32
    return %c0_i32, %c0_i32_0 : i32, i32
  }
  func.func @transform_19(%arg0: i32) -> (i32, i32) {
    %c0_i32 = arith.constant 0 : i32
    %c0_i32_0 = arith.constant 0 : i32
    %c0_i32_1 = arith.constant 0 : i32
    return %c0_i32, %c0_i32_0 : i32, i32
  }
  func.func @transform_20(%arg0: i32) -> (i32, i32) {
    %c0_i32 = arith.constant 0 : i32
    %c0_i32_0 = arith.constant 0 : i32
    %c0_i32_1 = arith.constant 0 : i32
    return %c0_i32, %c0_i32_0 : i32, i32
  }
  func.func @transform_21(%arg0: i32) -> (i32, i32) {
    %c0_i32 = arith.constant 0 : i32
    %c0_i32_0 = arith.constant 0 : i32
    %c0_i32_1 = arith.constant 0 : i32
    return %c0_i32, %c0_i32_0 : i32, i32
  }
  func.func @transform_22(%arg0: i32) -> (i32, i32) {
    %c0_i32 = arith.constant 0 : i32
    %c0_i32_0 = arith.constant 0 : i32
    %c0_i32_1 = arith.constant 0 : i32
    return %c0_i32, %c0_i32_0 : i32, i32
  }
  func.func @transform_23(%arg0: i32) -> (i32, i32) {
    %c0_i32 = arith.constant 0 : i32
    %c0_i32_0 = arith.constant 0 : i32
    %c0_i32_1 = arith.constant 0 : i32
    return %c0_i32, %c0_i32_0 : i32, i32
  }
  func.func @transform_24(%arg0: i32) -> (i32, i32) {
    %c0_i32 = arith.constant 0 : i32
    %c0_i32_0 = arith.constant 0 : i32
    %c0_i32_1 = arith.constant 0 : i32
    return %c0_i32, %c0_i32_0 : i32, i32
  }
  func.func @transform_25(%arg0: i32) -> (i32, i32) {
    %c0_i32 = arith.constant 0 : i32
    %c0_i32_0 = arith.constant 0 : i32
    %c0_i32_1 = arith.constant 0 : i32
    return %c0_i32, %c0_i32_0 : i32, i32
  }
  func.func @transform_26(%arg0: i32) -> (i32, i32) {
    %c0_i32 = arith.constant 0 : i32
    %c0_i32_0 = arith.constant 0 : i32
    %c0_i32_1 = arith.constant 0 : i32
    return %c0_i32, %c0_i32_0 : i32, i32
  }
  func.func @transform_27(%arg0: i32) -> (i32, i32) {
    %c0_i32 = arith.constant 0 : i32
    %c0_i32_0 = arith.constant 0 : i32
    %c0_i32_1 = arith.constant 0 : i32
    return %c0_i32, %c0_i32_0 : i32, i32
  }
  func.func @transform_28(%arg0: i32) -> (i32, i32) {
    %c0_i32 = arith.constant 0 : i32
    %c0_i32_0 = arith.constant 0 : i32
    %c0_i32_1 = arith.constant 0 : i32
    return %c0_i32, %c0_i32_0 : i32, i32
  }
  func.func @transform_29(%arg0: i32) -> (i32, i32) {
    %c0_i32 = arith.constant 0 : i32
    %c0_i32_0 = arith.constant 0 : i32
    %c0_i32_1 = arith.constant 0 : i32
    return %c0_i32, %c0_i32_0 : i32, i32
  }
  func.func @transform_30(%arg0: i32) -> (i32, i32) {
    %c0_i32 = arith.constant 0 : i32
    %c0_i32_0 = arith.constant 0 : i32
    %c0_i32_1 = arith.constant 0 : i32
    return %c0_i32, %c0_i32_0 : i32, i32
  }
  func.func @transform_31(%arg0: i32) -> (i32, i32) {
    %c0_i32 = arith.constant 0 : i32
    %c0_i32_0 = arith.constant 0 : i32
    %c0_i32_1 = arith.constant 0 : i32
    return %c0_i32, %c0_i32_0 : i32, i32
  }
  func.func @transform_32(%arg0: i32) -> (i32, i32) {
    %c0_i32 = arith.constant 0 : i32
    %c0_i32_0 = arith.constant 0 : i32
    %c0_i32_1 = arith.constant 0 : i32
    return %c0_i32, %c0_i32_0 : i32, i32
  }
  func.func @transform_33(%arg0: i32) -> (i32, i32) {
    %c0_i32 = arith.constant 0 : i32
    %c0_i32_0 = arith.constant 0 : i32
    %c0_i32_1 = arith.constant 0 : i32
    return %c0_i32, %c0_i32_0 : i32, i32
  }
  func.func @transform_34(%arg0: i32) -> (i32, i32) {
    %c0_i32 = arith.constant 0 : i32
    %c0_i32_0 = arith.constant 0 : i32
    %c0_i32_1 = arith.constant 0 : i32
    return %c0_i32, %c0_i32_0 : i32, i32
  }
  func.func @transform_35(%arg0: i32) -> (i32, i32) {
    %c0_i32 = arith.constant 0 : i32
    %c0_i32_0 = arith.constant 0 : i32
    %c0_i32_1 = arith.constant 0 : i32
    return %c0_i32, %c0_i32_0 : i32, i32
  }
  func.func @transform_36(%arg0: i32) -> (i32, i32) {
    %c0_i32 = arith.constant 0 : i32
    %c0_i32_0 = arith.constant 0 : i32
    %c0_i32_1 = arith.constant 0 : i32
    return %c0_i32, %c0_i32_0 : i32, i32
  }
  func.func @transform_37(%arg0: i32) -> (i32, i32) {
    %c0_i32 = arith.constant 0 : i32
    %c0_i32_0 = arith.constant 0 : i32
    %c0_i32_1 = arith.constant 0 : i32
    return %c0_i32, %c0_i32_0 : i32, i32
  }
  func.func @transform_38(%arg0: i32) -> (i32, i32) {
    %c0_i32 = arith.constant 0 : i32
    %c0_i32_0 = arith.constant 0 : i32
    %c0_i32_1 = arith.constant 0 : i32
    return %c0_i32, %c0_i32_0 : i32, i32
  }
  func.func @transform_39(%arg0: i32) -> (i32, i32) {
    %c0_i32 = arith.constant 0 : i32
    %c0_i32_0 = arith.constant 0 : i32
    %c0_i32_1 = arith.constant 0 : i32
    return %c0_i32, %c0_i32_0 : i32, i32
  }
  func.func @transform_40(%arg0: i32) -> (i32, i32) {
    %c0_i32 = arith.constant 0 : i32
    %c0_i32_0 = arith.constant 0 : i32
    %c0_i32_1 = arith.constant 0 : i32
    return %c0_i32, %c0_i32_0 : i32, i32
  }
  func.func @transform_41(%arg0: i32) -> (i32, i32) {
    %c0_i32 = arith.constant 0 : i32
    %c0_i32_0 = arith.constant 0 : i32
    %c0_i32_1 = arith.constant 0 : i32
    return %c0_i32, %c0_i32_0 : i32, i32
  }
  func.func @transform_42(%arg0: i32) -> (i32, i32) {
    %c0_i32 = arith.constant 0 : i32
    %c0_i32_0 = arith.constant 0 : i32
    %c0_i32_1 = arith.constant 0 : i32
    return %c0_i32, %c0_i32_0 : i32, i32
  }
  func.func @transform_43(%arg0: i32) -> (i32, i32) {
    %c0_i32 = arith.constant 0 : i32
    %c0_i32_0 = arith.constant 0 : i32
    %c0_i32_1 = arith.constant 0 : i32
    return %c0_i32, %c0_i32_0 : i32, i32
  }
  func.func @transform_44(%arg0: i32) -> (i32, i32) {
    %c0_i32 = arith.constant 0 : i32
    %c0_i32_0 = arith.constant 0 : i32
    %c0_i32_1 = arith.constant 0 : i32
    return %c0_i32, %c0_i32_0 : i32, i32
  }
  func.func @transform_45(%arg0: i32) -> (i32, i32) {
    %c0_i32 = arith.constant 0 : i32
    %c0_i32_0 = arith.constant 0 : i32
    %c0_i32_1 = arith.constant 0 : i32
    return %c0_i32, %c0_i32_0 : i32, i32
  }
  func.func @transform_46(%arg0: i32) -> (i32, i32) {
    %c0_i32 = arith.constant 0 : i32
    %c0_i32_0 = arith.constant 0 : i32
    %c0_i32_1 = arith.constant 0 : i32
    return %c0_i32, %c0_i32_0 : i32, i32
  }
  func.func @transform_47(%arg0: i32) -> (i32, i32) {
    %c0_i32 = arith.constant 0 : i32
    %c0_i32_0 = arith.constant 0 : i32
    %c0_i32_1 = arith.constant 0 : i32
    return %c0_i32, %c0_i32_0 : i32, i32
  }
  func.func @transform_48(%arg0: i32) -> (i32, i32) {
    %c0_i32 = arith.constant 0 : i32
    %c0_i32_0 = arith.constant 0 : i32
    %c0_i32_1 = arith.constant 0 : i32
    return %c0_i32, %c0_i32_0 : i32, i32
  }
  func.func @transform_49(%arg0: i32) -> (i32, i32) {
    %c0_i32 = arith.constant 0 : i32
    %c0_i32_0 = arith.constant 0 : i32
    %c0_i32_1 = arith.constant 0 : i32
    return %c0_i32, %c0_i32_0 : i32, i32
  }
  func.func @transform_50(%arg0: i32) -> (i32, i32) {
    %c0_i32 = arith.constant 0 : i32
    %c0_i32_0 = arith.constant 0 : i32
    %c0_i32_1 = arith.constant 0 : i32
    return %c0_i32, %c0_i32_0 : i32, i32
  }
  func.func @transform_51(%arg0: i32) -> (i32, i32) {
    %c0_i32 = arith.constant 0 : i32
    %c0_i32_0 = arith.constant 0 : i32
    %c0_i32_1 = arith.constant 0 : i32
    return %c0_i32, %c0_i32_0 : i32, i32
  }
}

</mosaic_0001>

<bundles_post_ra>
// kernel: _lambda_.1
= control target key start
LH: loop header
LB: loop body
LE: loop exit
PB: predicated region body
PF: predicated region fallthrough
CT: control target
= control target key end

     0   :  { %s9891_s6 = smov 1   ;;  %s9892_s10 = smov 2   ;;  %s11492_s0 = inlined_call_operand.smem [shape: u32[52], index: -1, kind: input, shape index: {}] }
   0x1   :  { %s9969_s5 = sld [smem:[%s11492_s0]]   ;;  %s9893_s14 = smov 3  }
   0x2   :  { %s9974_s9 = sld [smem:[%s11492_s0 + %s9891_s6]]   ;;  %s9894_s18 = smov 4  }
   0x3   :  { %s9979_s13 = sld [smem:[%s11492_s0 + %s9892_s10]]   ;;  %s9895_s22 = smov 5  }
   0x4   :  { %s9984_s17 = sld [smem:[%s11492_s0 + %s9893_s14]]   ;;  %s9896_s26 = smov 6  }
   0x5   :  { %s9989_s21 = sld [smem:[%s11492_s0 + %s9894_s18]]   ;;  %s9897_s30 = smov 7  }
   0x6   :  { %s9994_s25 = sld [smem:[%s11492_s0 + %s9895_s22]]   ;;  %s9898_s4 = smov 8  }
   0x7   :  { %s9999_s29 = sld [smem:[%s11492_s0 + %s9896_s26]]   ;;  %s9899_s10 = smov 9  }
   0x8   :  { %s10004_s3 = sld [smem:[%s11492_s0 + %s9897_s30]]   ;;  %s9900_s15 = smov 10  }
   0x9   :  { %s10009_s8 = sld [smem:[%s11492_s0 + %s9898_s4]]   ;;  %s9901_s20 = smov 11  }
   0xa   :  { %s10014_s14 = sld [smem:[%s11492_s0 + %s9899_s10]]   ;;  %s9902_s26 = smov 12  }
   0xb   :  { %s10019_s19 = sld [smem:[%s11492_s0 + %s9900_s15]]   ;;  %s9903_s1 = smov 13  }
   0xc   :  { %s10024_s24 = sld [smem:[%s11492_s0 + %s9901_s20]]   ;;  %s9904_s7 = smov 14  }
   0xd   :  { %s10029_s30 = sld [smem:[%s11492_s0 + %s9902_s26]]   ;;  %s9905_s15 = smov 15  }
   0xe   :  { %s10034_s6 = sld [smem:[%s11492_s0 + %s9903_s1]]   ;;  %s9906_s22 = smov 16  }
   0xf   :  { %11509 = sst [smem:[#allocation16_spill]] %s10009_s8  ;;  %s9907_s28 = smov 17  }
  0x10   :  { %11510 = sst [smem:[#allocation17_spill]] %s10014_s14 }
  0x11   :  { %11511 = sst [smem:[#allocation18_spill]] %s10019_s19 }
  0x12   :  { %11512 = sst [smem:[#allocation19_spill]] %s10024_s24 }
  0x13   :  { %11513 = sst [smem:[#allocation20_spill]] %s10029_s30 }
  0x14   :  { %s10039_s12 = sld [smem:[%s11492_s0 + %s9904_s7]]   ;;  %s9908_s7 = smov 18  }
  0x15   :  { %s10044_s20 = sld [smem:[%s11492_s0 + %s9905_s15]]   ;;  %s9909_s15 = smov 19  }
  0x16   :  { %s10049_s27 = sld [smem:[%s11492_s0 + %s9906_s22]]   ;;  %s9910_s22 = smov 20  }
  0x17   :  { %s10054_s4 = sld [smem:[%s11492_s0 + %s9907_s28]]   ;;  %s9911_s28 = smov 21  }
  0x18   :  { %s10059_s30 = sld [smem:[%s11492_s0 + %s9908_s7]]   ;;  %s9912_s7 = smov 22  }
  0x19   :  { %s10064_s24 = sld [smem:[%s11492_s0 + %s9909_s15]]   ;;  %s9913_s15 = smov 23  }
  0x1b   :  { %11514 = sst [smem:[#allocation21_spill]] %s10044_s20 }
  0x1c   :  { %11515 = sst [smem:[#allocation22_spill]] %s10049_s27 }
  0x1d   :  { %11516 = sst [smem:[#allocation23_spill]] %s10054_s4 }
  0x1e   :  { %11517 = sst [smem:[#allocation24_spill]] %s10059_s30 }
  0x1f   :  { %11518 = sst [smem:[#allocation25_spill]] %s10064_s24 }
  0x20   :  { %s10069_s27 = sld [smem:[%s11492_s0 + %s9910_s22]]   ;;  %s9914_s22 = smov 24  }
  0x21   :  { %s10074_s4 = sld [smem:[%s11492_s0 + %s9911_s28]]   ;;  %s9915_s28 = smov 25  }
  0x22   :  { %s10079_s30 = sld [smem:[%s11492_s0 + %s9912_s7]]   ;;  %s9916_s7 = smov 26  }
  0x23   :  { %s10084_s24 = sld [smem:[%s11492_s0 + %s9913_s15]]   ;;  %s9917_s15 = smov 27  }
  0x26   :  { %11519 = sst [smem:[#allocation26_spill]] %s10069_s27 }
  0x27   :  { %11520 = sst [smem:[#allocation27_spill]] %s10074_s4 }
  0x28   :  { %11521 = sst [smem:[#allocation28_spill]] %s10079_s30 }
  0x29   :  { %11522 = sst [smem:[#allocation29_spill]] %s10084_s24 }
  0x2a   :  { %s10089_s27 = sld [smem:[%s11492_s0 + %s9914_s22]]   ;;  %s9918_s22 = smov 28  }
  0x2b   :  { %s10094_s4 = sld [smem:[%s11492_s0 + %s9915_s28]]   ;;  %s9919_s28 = smov 29  }
  0x2c   :  { %s10099_s30 = sld [smem:[%s11492_s0 + %s9916_s7]]   ;;  %s9920_s7 = smov 30  }
  0x2d   :  { %s10104_s24 = sld [smem:[%s11492_s0 + %s9917_s15]]   ;;  %s9921_s15 = smov 31  }
  0x30   :  { %11523 = sst [smem:[#allocation30_spill]] %s10089_s27 }
  0x31   :  { %11524 = sst [smem:[#allocation31_spill]] %s10094_s4 }
  0x32   :  { %11525 = sst [smem:[#allocation32_spill]] %s10099_s30 }
  0x33   :  { %11526 = sst [smem:[#allocation33_spill]] %s10104_s24 }
  0x34   :  { %s10109_s27 = sld [smem:[%s11492_s0 + %s9918_s22]]   ;;  %s9922_s22 = smov 32  }
  0x35   :  { %s10114_s4 = sld [smem:[%s11492_s0 + %s9919_s28]]   ;;  %s9923_s28 = smov 33  }
  0x36   :  { %s10119_s30 = sld [smem:[%s11492_s0 + %s9920_s7]]   ;;  %s9924_s7 = smov 34  }
  0x37   :  { %s10124_s24 = sld [smem:[%s11492_s0 + %s9921_s15]]   ;;  %s9925_s15 = smov 35  }
  0x3a   :  { %11527 = sst [smem:[#allocation34_spill]] %s10109_s27 }
  0x3b   :  { %11528 = sst [smem:[#allocation35_spill]] %s10114_s4 }
  0x3c   :  { %11529 = sst [smem:[#allocation36_spill]] %s10119_s30 }
  0x3d   :  { %11530 = sst [smem:[#allocation37_spill]] %s10124_s24 }
  0x3e   :  { %s10129_s27 = sld [smem:[%s11492_s0 + %s9922_s22]]   ;;  %s9926_s22 = smov 36  }
  0x3f   :  { %s10134_s4 = sld [smem:[%s11492_s0 + %s9923_s28]]   ;;  %s9927_s28 = smov 37  }
  0x40   :  { %s10139_s30 = sld [smem:[%s11492_s0 + %s9924_s7]]   ;;  %s9928_s7 = smov 38  }
  0x41   :  { %s10144_s24 = sld [smem:[%s11492_s0 + %s9925_s15]]   ;;  %s9929_s15 = smov 39  }
  0x44   :  { %11531 = sst [smem:[#allocation38_spill]] %s10129_s27 }
  0x45   :  { %11532 = sst [smem:[#allocation39_spill]] %s10134_s4 }
  0x46   :  { %11533 = sst [smem:[#allocation40_spill]] %s10139_s30 }
  0x47   :  { %11534 = sst [smem:[#allocation41_spill]] %s10144_s24 }
  0x48   :  { %s10149_s27 = sld [smem:[%s11492_s0 + %s9926_s22]]   ;;  %s9930_s22 = smov 40  }
  0x49   :  { %s10154_s4 = sld [smem:[%s11492_s0 + %s9927_s28]]   ;;  %s9931_s28 = smov 41  }
  0x4a   :  { %s10159_s30 = sld [smem:[%s11492_s0 + %s9928_s7]]   ;;  %s9932_s7 = smov 42  }
  0x4b   :  { %s10164_s24 = sld [smem:[%s11492_s0 + %s9929_s15]]   ;;  %s9933_s15 = smov 43  }
  0x4e   :  { %11535 = sst [smem:[#allocation42_spill]] %s10149_s27 }
  0x4f   :  { %11536 = sst [smem:[#allocation43_spill]] %s10154_s4 }
  0x50   :  { %11537 = sst [smem:[#allocation44_spill]] %s10159_s30 }
  0x51   :  { %11538 = sst [smem:[#allocation45_spill]] %s10164_s24 }
  0x52   :  { %s10169_s27 = sld [smem:[%s11492_s0 + %s9930_s22]]   ;;  %s9934_s22 = smov 44  }
  0x53   :  { %s10174_s4 = sld [smem:[%s11492_s0 + %s9931_s28]]   ;;  %s9935_s28 = smov 45  }
  0x54   :  { %s10179_s30 = sld [smem:[%s11492_s0 + %s9932_s7]]   ;;  %s9936_s7 = smov 46  }
  0x55   :  { %s10184_s24 = sld [smem:[%s11492_s0 + %s9933_s15]]   ;;  %s9937_s15 = smov 47  }
  0x56   :  { %s10199_s20 = sld [smem:[%s11492_s0 + %s9936_s7]]   ;;  %s9940_s7 = smov 50  }
  0x57   :  { %s10219_s8 = sld [smem:[%s11492_s0 + %s9940_s7]]  }
  0x58   :  { %11539 = sst [smem:[#allocation46_spill]] %s10169_s27 }
  0x59   :  { %11540 = sst [smem:[#allocation47_spill]] %s10174_s4 }
  0x5a   :  { %s10189_s27 = sld [smem:[%s11492_s0 + %s9934_s22]]   ;;  %s9938_s22 = smov 48  }
  0x5b   :  { %11541 = sst [smem:[#allocation48_spill]] %s10184_s24 }
  0x5c   :  { %s10194_s4 = sld [smem:[%s11492_s0 + %s9935_s28]]   ;;  %s9939_s28 = smov 49  }
  0x5d   :  { %s10204_s24 = sld [smem:[%s11492_s0 + %s9937_s15]]   ;;  %s9941_s15 = smov 51  }
  0x5e   :  { %s10209_s19 = sld [smem:[%s11492_s0 + %s9938_s22]]  }
  0x5f   :  { %s10224_s14 = sld [smem:[%s11492_s0 + %s9941_s15]]  }
  0x62   :  { %11542 = sst [smem:[#allocation49_spill]] %s10194_s4 }
  0x63   :  { %s10214_s4 = sld [smem:[%s11492_s0 + %s9939_s28]]  }
  0x64   :  { %108 = vsyncpa [#allocation3], 0 }
  0x65   :  { %109 = vsyncpa [#allocation6], 0 }
  0x66   :  { %110 = vsyncpa [#allocation9], 0 }
  0x67   :  { %111 = vsyncpa [#allocation4], 0  ;;  %s9942_s22 = smov [#allocation5]   ;;  %s9943_s26 = smov [#allocation8]  }
  0x68   :  { %s214_s23 = sshll.u32 %s9942_s22, 4  ;;  %s236_s28 = sshll.u32 %s9943_s26, 4  ;;  %s215_s23 = int_to_ptr.vmem [resolvable:$true] %s214_s23  ;;  %s237_s28 = int_to_ptr.vmem [resolvable:$true] %s236_s28 }
  0x69   :  { %s9771_s1 = scalar_lea.vmem %s215_s23, 16  ;;  %s9775_s2 = scalar_lea.vmem %s215_s23, 32 }
  0x6a   :  { %p9772_p0 = scmp.ne.s32.totalorder %s215_s23, %s9771_s1  ;;  %p9776_p1 = scmp.lt.s32.totalorder %s215_s23, %s215_s23 }
  0x6b   :  { %p9777_p2 = scmp.lt.s32.totalorder %s9775_s2, %s9771_s1 }
  0x6d   :  { %p9778_p3 = por %p9777_p2, %p9776_p1 }
  0x6f   :  { %p9779_p4 = pnand %p9778_p3, %p9772_p0 }
  0x71   :  { %9782 = shalt.err (!%p9779_p4)
}
  0x72   :  { %217 = dma.hbm_to_vmem [thread:$0]  %s10189_s27, 16, %s215_s23, [#allocation6]  }
  0x73   :  { %s9791_s0 = scalar_lea.vmem %s237_s28, 16  ;;  %s9795_s7 = scalar_lea.vmem %s237_s28, 32 }
  0x74   :  { %p9792_p5 = scmp.ne.s32.totalorder %s237_s28, %s9791_s0  ;;  %p9796_p6 = scmp.lt.s32.totalorder %s237_s28, %s237_s28 }
  0x75   :  { %p9797_p7 = scmp.lt.s32.totalorder %s9795_s7, %s9791_s0 }
  0x77   :  { %p9798_p8 = por %p9797_p7, %p9796_p6 }
  0x79   :  { %p9799_p9 = pnand %p9798_p8, %p9792_p5 }
  0x7b   :  { %9802 = shalt.err (!%p9799_p9)
}
  0x7c   :  { %239 = dma.hbm_to_vmem [thread:$0]  %s10204_s24, 16, %s237_s28, [#allocation9]  }
  0x7d   :  { %s9944_s10 = smov [#allocation2]   ;;  %s9945_s15 = smov [#allocation7]  }
  0x7e   :  { %s202_s11 = sshll.u32 %s9944_s10, 4  ;;  %s226_s16 = sshll.u32 %s9945_s15, 4  ;;  %s203_s11 = int_to_ptr.vmem [resolvable:$true] %s202_s11  ;;  %s227_s16 = int_to_ptr.vmem [resolvable:$true] %s226_s16 }
  0x7f   :  { %s9811_s18 = scalar_lea.vmem %s203_s11, 16  ;;  %s9815_s22 = scalar_lea.vmem %s203_s11, 32 }
  0x80   :  { %p9812_p10 = scmp.ne.s32.totalorder %s203_s11, %s9811_s18  ;;  %p9816_p11 = scmp.lt.s32.totalorder %s203_s11, %s203_s11 }
  0x81   :  { %p9817_p12 = scmp.lt.s32.totalorder %s9815_s22, %s9811_s18 }
  0x83   :  { %p9818_p13 = por %p9817_p12, %p9816_p11 }
  0x85   :  { %p9819_p0 = pnand %p9818_p13, %p9812_p10 }
  0x87   :  { %9822 = shalt.err (!%p9819_p0)
}
  0x88   :  { %205 = dma.hbm_to_vmem [thread:$0]  %s10179_s30, 16, %s203_s11, [#allocation3]  }
  0x89   :  { %s9831_s27 = scalar_lea.vmem %s227_s16, 16  ;;  %s9835_s23 = scalar_lea.vmem %s227_s16, 32 }
  0x8a   :  { %p9832_p1 = scmp.ne.s32.totalorder %s227_s16, %s9831_s27  ;;  %p9836_p2 = scmp.lt.s32.totalorder %s227_s16, %s227_s16 }
  0x8b   :  { %p9837_p3 = scmp.lt.s32.totalorder %s9835_s23, %s9831_s27 }
  0x8d   :  { %p9838_p4 = por %p9837_p3, %p9836_p2 }
  0x8f   :  { %p9839_p5 = pnand %p9838_p4, %p9832_p1 }
  0x91   :  { %9842 = shalt.err (!%p9839_p5)
}
  0x92   :  { %229 = dma.hbm_to_vmem [thread:$0]  %s10199_s20, 16, %s227_s16, [#allocation6]  }
  0x93   :  { %s9946_s24 = smov [#allocation10]  }
  0x94   :  { %s246_s26 = sshll.u32 %s9946_s24, 4  ;;  %s247_s26 = int_to_ptr.vmem [resolvable:$true] %s246_s26 }
  0x95   :  { %s9851_s28 = scalar_lea.vmem %s247_s26, 16  ;;  %s9855_s1 = scalar_lea.vmem %s247_s26, 32 }
  0x96   :  { %p9852_p6 = scmp.ne.s32.totalorder %s247_s26, %s9851_s28  ;;  %p9856_p7 = scmp.lt.s32.totalorder %s247_s26, %s247_s26 }
  0x97   :  { %p9857_p8 = scmp.lt.s32.totalorder %s9855_s1, %s9851_s28 }
  0x99   :  { %p9858_p9 = por %p9857_p8, %p9856_p7 }
  0x9b   :  { %p9859_p10 = pnand %p9858_p9, %p9852_p6 }
  0x9d   :  { %9862 = shalt.err (!%p9859_p10)
}
  0x9e   :  { %249 = dma.hbm_to_vmem [thread:$0]  %s10209_s19, 16, %s247_s26, [#allocation9]  }
  0x9f   :  { %9883 = dma.done.wait [#allocation3], 16  }
  0xa0   :  { %9884 = vsyncadd [#allocation3], 4294967280 }
  0xa1   :  { %9885 = dma.done.wait [#allocation6], 32  }
  0xa2   :  { %9886 = vsyncadd [#allocation6], 4294967264 }
  0xa3   :  { %9887 = dma.done.wait [#allocation9], 32  }
  0xa4   :  { %9888 = vsyncadd [#allocation9], 4294967264  ;;  %v9947_v0 = vmov 0.0   ;;  %v282_v1 = vld [vmem:[%s9974_s9 + $0x38] sm:$0xff]  ;;  %v281_v2 = vld [vmem:[%s9974_s9 + $0x30] sm:$0xff]  ;;  %s9948_s19 = smov 96   ;;  %v285_v15 = vlaneseq }
  0xa5   :  { %366 = vmatprep.mubr.f32.mxu0 %v9947_v0  ;;  %8876 = vmatprep.subr.mxu1 %v9947_v0  ;;  %v280_v3 = vld [vmem:[%s9974_s9 + $0x28] sm:$0xff]  ;;  %v279_v4 = vld [vmem:[%s9974_s9 + $0x20] sm:$0xff]  ;;  %v278_v5 = vld [vmem:[%s9974_s9 + $0x18] sm:$0xff]  ;;  %s9949_s30 = smov 32   ;;  %vm295_vm0 = vcmask 261120   ;;  %vm9953_vm1 = vmmov 0  }
  0xa6   :  { %326 = vmatprep.subr.mxu0 %v282_v1  ;;  %v277_v6 = vld [vmem:[%s9974_s9 + $0x10] sm:$0xff]  ;;  %v273_v7 = vld [vmem:[%s10039_s12] sm:$0xff]  ;;  %v276_v9 = vld [vmem:[%s9974_s9 + $0x8] sm:$0xff]  ;;  %v10267_v16 = vshrl.u32 %v285_v15, 7  ;;  %8878 = vmatprep.mubr.msk.f32.mxu1 %vm9953_vm1, %v9947_v0  ;;  %vm467_vm2 = vcmask 64512   ;;  %s9954_s20 = smov 64  }
  0xa7   :  { %327 = vmatpush1.msra.mxu0 %v281_v2  ;;  %v10241_v8 = vld [vmem:[%s10034_s6] sm:$0xff]  ;;  %383 = vrot.lane.b32.xlu1 %v273_v7, %s9948_s19  ;;  %v10249_v11 = vld [vmem:[%s10034_s6 + $0x8] sm:$0xff]  ;;  %s9955_s2 = smov 16   ;;  %s9956_s0 = smov 8   ;;  %vm1783_vm3 = vcmask 130048   ;;  %vm1785_vm4 = vcmask 195584  }
  0xa8   :  { %328 = vmatprep.subr.mxu0 %v280_v3  ;;  %v275_v10 = vld [vmem:[%s9974_s9] sm:$0xff]  ;;  %403 = vrot.lane.b32.xlu0 %v10241_v8, %s9949_s30  ;;  %v274_v13 = vld [vmem:[%s10039_s12 + $0x8] sm:$0xff]  ;;  %v10270_v17 = vsub.s32 0, %v10267_v16  ;;  %v10274_v19 = vsub.s32 1, %v10267_v16  ;;  %s9951_s9 = smov 104   ;;  %s9957_s7 = smov 24  }
  0xa9   :  { %329 = vmatpush1.msra.mxu0 %v279_v4  ;;  %v10252_v12 = vld [vmem:[%s9969_s5] sm:$0xff]  ;;  %v10262_v14 = vld [vmem:[%s9969_s5 + $0x8] sm:$0xff]  ;;  %s9950_s5 = smov 120   ;;  %vm2066_vm5 = vcmask 523264   ;;  %s11548_s10 = sld [smem:[#allocation20_spill]]  ;;  %vm3938_vm6 = vcmask 392192  }
  0xaa   :  { %330 = vmatprep.subr.mxu0 %v278_v5  ;;  %v283_v18 = vld [vmem:[%s9979_s13] sm:$0x3]  ;;  %s9952_s13 = smov 112   ;;  %s11549_s11 = sld [smem:[#allocation22_spill]]  ;;  %vm8283_vm7 = vcmask 1040384  }
  0xab   :  { %331 = vmatpush1.msra.mxu0 %v277_v6  ;;  %405 = vrot.lane.b32.xlu1 %v10249_v11, %s9949_s30  ;;  %v288_v20 = vrot.slane %v283_v18, %v10270_v17  ;;  %v292_v21 = vrot.slane %v283_v18, %v10274_v19  ;;  %s11550_s15 = sld [smem:[#allocation25_spill]]  ;;  %s9958_s24 = smov 80  }
  0xac   :  { %332 = vmatprep.subr.mxu0 %v276_v9  ;;  %s11551_s16 = sld [smem:[#allocation37_spill]]  ;;  %s9959_s28 = smov 48  }
  0xad   :  { %333 = vmatpush1.msra.mxu0 %v275_v10  ;;  %s11552_s18 = sld [smem:[#allocation38_spill]] }
  0xae   :  { %8438 = vmatmul.mubr.msk.f32.vlgmr.msra.gmra.mxu0 %vm295_vm0, %v10252_v12  ;;  %8901 = vmatprep.subr.mxu0 %v9947_v0  ;;  %s11553_s22 = sld [smem:[#allocation23_spill]] }
  0xaf   :  { %372 = vmatprep.mubr.f32.mxu0 %v9947_v0  ;;  %385 = vrot.lane.b32.xlu1 %v274_v13, %s9948_s19  ;;  %s11554_s27 = sld [smem:[#allocation24_spill]] }
  0xb0   :  { %s11555_s23 = sld [smem:[#allocation26_spill]] }
  0xb1   :  { %s11556_s26 = sld [smem:[#allocation27_spill]] }
  0xb2   :  { %8439 = vmatmul.mubr.msk.f32.gmra.mxu0 %vm295_vm0, %v10262_v14  ;;  %s11557_s1 = sld [smem:[#allocation28_spill]] }
  0xb3   :  { %8903 = vmatprep.mubr.msk.f32.mxu0 %vm9953_vm1, %v9947_v0 }
 0x119   :  { %v10278_v23 = vpop.permute.xlu1 %383 }
 0x11a   :  { %v10289_v34 = vpop.permute.xlu0 %403 }
 0x11d   :  { %v10291_v35 = vpop.permute.xlu1 %405 }
 0x121   :  { %v10295_v39 = vpop.permute.xlu1 %385 }
 0x16e   :  { %v368_v22 = vpop.f32.mrf.mxu0 }
 0x16f   :  { %v10280_v24 = vadd.f32 %v368_v22, %v288_v20 }
 0x170   :  { %v370_v25 = vpop.f32.mrf.mxu0 }
 0x171   :  { %v389_v26 = vmul.f32 %v10278_v23, %v10280_v24  ;;  %v371_v27 = vadd.f32 %v370_v25, %v292_v21  ;;  %v409_v36 = vmul.f32 %v10289_v34, %v10280_v24  ;;  %v379_v45 = vmul.f32 %v10280_v24, %v10241_v8 }
 0x172   :  { %v374_v28 = vpop.f32.mrf.mxu0 }
 0x173   :  { %v411_v29 = vmul.f32 %v371_v27, %v273_v7  ;;  %v10284_v30 = vadd.f32 %v374_v28, %v288_v20  ;;  %393 = vrot.lane.b32.xlu1 %v389_v26, %s9949_s30 }
 0x174   :  { %v376_v31 = vpop.f32.mrf.mxu0 }
 0x175   :  { %v377_v32 = vadd.f32 %v376_v31, %v292_v21  ;;  %415 = vrot.lane.b32.xlu0 %v411_v29, %s9949_s30  ;;  %v390_v40 = vmul.f32 %v10295_v39, %v10284_v30  ;;  %v410_v42 = vmul.f32 %v10291_v35, %v10284_v30  ;;  %v380_v52 = vmul.f32 %v10284_v30, %v10249_v11 }
 0x177   :  { %v412_v33 = vmul.f32 %v377_v32, %v274_v13 }
 0x179   :  { %417 = vrot.lane.b32.xlu0 %v412_v33, %s9949_s30 }
 0x1e5   :  { %v394_v44 = vpop.permute.xlu1 %393 }
 0x1e6   :  { %v399_v46 = vadd.f32 %v394_v44, %v379_v45 }
 0x1e7   :  { %v416_v37 = vpop.permute.xlu0 %415 }
 0x1e8   :  { %v421_v38 = vadd.f32 %v416_v37, %v409_v36 }
 0x1ea   :  { %438 = vrot.lane.b32.xlu0 %v421_v38, %s9950_s5  ;;  %442 = vrot.lane.b32.xlu1 %v421_v38, %s9951_s9 }
 0x1eb   :  { %v418_v41 = vpop.permute.xlu0 %417 }
 0x1ec   :  { %v422_v43 = vadd.f32 %v418_v41, %v410_v42 }
 0x1ee   :  { %440 = vrot.lane.b32.xlu0 %v421_v38, %s9952_s13  ;;  %395 = vrot.lane.b32.xlu1 %v390_v40, %s9949_s30 }
 0x1f2   :  { %445 = vrot.lane.b32.xlu0 %v422_v43, %s9950_s5  ;;  %449 = vrot.lane.b32.xlu1 %v422_v43, %s9951_s9 }
 0x1f6   :  { %447 = vrot.lane.b32.xlu0 %v422_v43, %s9952_s13  ;;  %770 = vrot.lane.b32.xlu1 %v422_v43, %s9948_s19 }
 0x1fa   :  { %465 = vrot.lane.b32.xlu0 %v421_v38, %s9948_s19 }
 0x1fe   :  { %424 = vrot.lane.b32.xlu0 %v399_v46, %s9950_s5 }
 0x202   :  { %426 = vrot.lane.b32.xlu0 %v399_v46, %s9952_s13 }
 0x206   :  { %428 = vrot.lane.b32.xlu0 %v399_v46, %s9951_s9 }
 0x25c   :  { %v439_v47 = vpop.permute.xlu0 %438  ;;  %v443_v48 = vpop.permute.xlu1 %442 }
 0x25d   :  { %542 = vrot.lane.b32.xlu1 %v439_v47, %s9948_s19 }
 0x260   :  { %v441_v49 = vpop.permute.xlu0 %440  ;;  %v396_v50 = vpop.permute.xlu1 %395 }
 0x261   :  { %618 = vrot.lane.b32.xlu1 %v441_v49, %s9948_s19  ;;  %v400_v53 = vadd.f32 %v396_v50, %v380_v52 }
 0x264   :  { %v446_v51 = vpop.permute.xlu0 %445  ;;  %v450_v55 = vpop.permute.xlu1 %449 }
 0x265   :  { %694 = vrot.lane.b32.xlu1 %v443_v48, %s9948_s19  ;;  %846 = vrot.lane.b32.xlu0 %v446_v51, %s9948_s19 }
 0x268   :  { %v448_v54 = vpop.permute.xlu0 %447  ;;  %v771_v58 = vpop.permute.xlu1 %770 }
 0x269   :  { %431 = vrot.lane.b32.xlu1 %v400_v53, %s9950_s5  ;;  %922 = vrot.lane.b32.xlu0 %v448_v54, %s9948_s19 }
 0x26c   :  { %v466_v56 = vpop.permute.xlu0 %465 }
 0x26d   :  { %8877 = vmatpush3.xpose.msk.msra.mxu1 %vm467_vm2, %v466_v56  ;;  %998 = vrot.lane.b32.xlu1 %v450_v55, %s9948_s19 }
 0x26e   :  { %433 = vrot.lane.b32.xlu0 %v400_v53, %s9952_s13  ;;  %8881 = vmatprep.subr.mxu1 %v9947_v0 }
 0x270   :  { %8879 = vmatmul.mubr.msk.f32.vlgmr.msra.gmra.mxu1 %vm467_vm2, %v399_v46  ;;  %v425_v57 = vpop.permute.xlu0 %424 }
 0x271   :  { %435 = vrot.lane.b32.xlu1 %v400_v53, %s9951_s9  ;;  %8883 = vmatprep.mubr.msk.f32.mxu1 %vm9953_vm1, %v9947_v0 }
 0x274   :  { %v427_v59 = vpop.permute.xlu0 %426 }
 0x278   :  { %v429_v61 = vpop.permute.xlu0 %428 }
 0x2cf   :  { %v543_v60 = vpop.permute.xlu1 %542 }
 0x2d0   :  { %8882 = vmatpush3.xpose.msk.msra.mxu1 %vm467_vm2, %v543_v60 }
 0x2d1   :  { %8886 = vmatprep.subr.mxu1 %v9947_v0 }
 0x2d3   :  { %v619_v62 = vpop.permute.xlu1 %618  ;;  %8884 = vmatmul.mubr.msk.f32.vlgmr.msra.gmra.mxu1 %vm467_vm2, %v425_v57 }
 0x2d4   :  { %8887 = vmatpush3.xpose.msk.msra.mxu1 %vm467_vm2, %v619_v62  ;;  %8888 = vmatprep.mubr.msk.f32.mxu1 %vm9953_vm1, %v9947_v0 }
 0x2d5   :  { %8891 = vmatprep.subr.mxu1 %v9947_v0 }
 0x2d7   :  { %v695_v63 = vpop.permute.xlu1 %694  ;;  %v847_v1 = vpop.permute.xlu0 %846  ;;  %8889 = vmatmul.mubr.msk.f32.vlgmr.msra.gmra.mxu1 %vm467_vm2, %v427_v59 }
 0x2d8   :  { %8892 = vmatpush3.xpose.msk.msra.mxu1 %vm467_vm2, %v695_v63  ;;  %8902 = vmatpush3.xpose.msk.msra.mxu0 %vm467_vm2, %v847_v1 }
 0x2d9   :  { %8893 = vmatprep.mubr.msk.f32.mxu1 %vm9953_vm1, %v9947_v0  ;;  %8896 = vmatprep.subr.mxu1 %v9947_v0 }
 0x2da   :  { %8911 = vmatprep.subr.mxu0 %v9947_v0 }
 0x2db   :  { %v432_v2 = vpop.permute.xlu1 %431  ;;  %8894 = vmatmul.mubr.msk.f32.vlgmr.msra.gmra.mxu1 %vm467_vm2, %v429_v61  ;;  %v923_v3 = vpop.permute.xlu0 %922 }
 0x2dc   :  { %8897 = vmatpush3.xpose.msk.msra.mxu1 %vm467_vm2, %v771_v58  ;;  %8904 = vmatmul.mubr.msk.f32.vlgmr.msra.gmra.mxu0 %vm467_vm2, %v432_v2 }
 0x2dd   :  { %8898 = vmatprep.mubr.msk.f32.mxu1 %vm9953_vm1, %v9947_v0  ;;  %8906 = vmatprep.subr.mxu1 %v9947_v0 }
 0x2de   :  { %8913 = vmatprep.mubr.msk.f32.mxu0 %vm9953_vm1, %v9947_v0 }
 0x2df   :  { %v999_v4 = vpop.permute.xlu1 %998  ;;  %8899 = vmatmul.mubr.msk.f32.vlgmr.msra.gmra.mxu1 %vm467_vm2, %v400_v53 }
 0x2e0   :  { %8907 = vmatpush3.xpose.msk.msra.mxu1 %vm467_vm2, %v923_v3  ;;  %8912 = vmatpush3.xpose.msk.msra.mxu0 %vm467_vm2, %v999_v4  ;;  %v434_v5 = vpop.permute.xlu0 %433 }
 0x2e1   :  { %8908 = vmatprep.mubr.msk.f32.mxu1 %vm9953_vm1, %v9947_v0  ;;  %8916 = vmatprep.subr.mxu1 %v9947_v0 }
 0x2e2   :  { %8921 = vmatprep.subr.mxu0 %v9947_v0 }
 0x2e3   :  { %v436_v6 = vpop.permute.xlu1 %435  ;;  %8909 = vmatmul.mubr.msk.f32.vlgmr.msra.gmra.mxu1 %vm467_vm2, %v434_v5 }
 0x2e4   :  { %8914 = vmatmul.mubr.msk.f32.vlgmr.msra.gmra.mxu0 %vm467_vm2, %v436_v6  ;;  %8918 = vmatprep.mubr.msk.f32.mxu1 %vm9953_vm1, %v9947_v0 }
 0x2e5   :  { %8923 = vmatprep.mubr.msk.f32.mxu0 %vm9953_vm1, %v9947_v0 }
 0x330   :  { %v538_v7 = vpop.f32.mrf.mxu1 }
 0x331   :  { %v1074_v8 = vsel %vm467_vm2, %v538_v7, -inf }
 0x332   :  { %1075 = vmax.xlane.f32.xlu0 %v1074_v8  ;;  %v8880_v9 = vpop.f32.mrf.mxu1 }
 0x393   :  { %v10371_v10 = vpop.f32.mrf.mxu1 }
 0x394   :  { %v1077_v11 = vsel %vm467_vm2, %v10371_v10, -inf }
 0x395   :  { %1078 = vmax.xlane.f32.xlu1 %v1077_v11  ;;  %v8885_v13 = vpop.f32.mrf.mxu1 }
 0x397   :  { %v690_v15 = vpop.f32.mrf.mxu1 }
 0x398   :  { %v1080_v18 = vsel %vm467_vm2, %v690_v15, -inf }
 0x399   :  { %1081 = vmax.xlane.f32.xlu0 %v1080_v18  ;;  %v8890_v20 = vpop.f32.mrf.mxu1 }
 0x39b   :  { %v766_v21 = vpop.f32.mrf.mxu1 }
 0x39c   :  { %v918_v22 = vpop.f32.mrf.mxu0  ;;  %v1083_v25 = vsel %vm467_vm2, %v766_v21, -inf }
 0x39d   :  { %1084 = vmax.xlane.f32.xlu0 %v1083_v25  ;;  %v8895_v26 = vpop.f32.mrf.mxu1  ;;  %v1089_v29 = vsel %vm467_vm2, %v918_v22, -inf }
 0x39e   :  { %v8905_v27 = vpop.f32.mrf.mxu0 }
 0x39f   :  { %v10377_v28 = vpop.f32.mrf.mxu1 }
 0x3a0   :  { %v1086_v40 = vsel %vm467_vm2, %v10377_v28, -inf }
 0x3a1   :  { %1090 = vmax.xlane.f32.xlu0 %v1089_v29  ;;  %v8900_v31 = vpop.f32.mrf.mxu1 }
 0x3a3   :  { %v10380_v32 = vpop.f32.mrf.mxu1 }
 0x3a4   :  { %v1070_v33 = vpop.f32.mrf.mxu0  ;;  %v1092_v41 = vsel %vm467_vm2, %v10380_v32, -inf }
 0x3a5   :  { %v8910_v36 = vpop.f32.mrf.mxu1  ;;  %v1095_v37 = vsel %vm467_vm2, %v1070_v33, -inf }
 0x3a6   :  { %v8915_v38 = vpop.f32.mrf.mxu0  ;;  %452 = vrot.lane.b32.xlu1 %v10280_v24, %s9950_s5  ;;  %1096 = vmax.xlane.f32.xlu0 %v1095_v37 }
 0x3aa   :  { %456 = vrot.lane.b32.xlu1 %v10280_v24, %s9951_s9 }
 0x3bb   :  { %v1076_v42 = vpop.xlane.xlu0 %1075 }
 0x3bc   :  { %454 = vrot.lane.b32.xlu0 %v10280_v24, %s9952_s13  ;;  %v1098_v48 = vsub.f32 %v538_v7, %v1076_v42 }
 0x3be   :  { %v1106_v50 = vmul.f32 1.442695, %v1098_v48 }
 0x3c0   :  { %461 = vrot.lane.b32.xlu0 %v10284_v30, %s9952_s13  ;;  %9541 = vpow2.f32 %v1106_v50 }
 0x3cd   :  { %v9542_v59 = vpop.eup %9541 }
 0x3ce   :  { %1087 = vmax.xlane.f32.xlu1 %v1086_v40  ;;  %v1122_v60 = vsel %vm467_vm2, %v9542_v59, 0.0 }
 0x3d2   :  { %1093 = vmax.xlane.f32.xlu1 %v1092_v41 }
 0x3e3   :  { %459 = vrot.lane.b32.xlu1 %v10284_v30, %s9950_s5 }
 0x3e7   :  { %463 = vrot.lane.b32.xlu1 %v10284_v30, %s9951_s9 }
 0x3eb   :  { %1162 = vrot.lane.b32.xlu1 %v10280_v24, %s9954_s20 }
 0x41e   :  { %v1079_v43 = vpop.xlane.xlu1 %1078 }
 0x41f   :  { %v1099_v13 = vsub.f32 %v10371_v10, %v1079_v43 }
 0x421   :  { %v1108_v18 = vmul.f32 1.442695, %v1099_v13 }
 0x422   :  { %v453_v44 = vpop.permute.xlu1 %452  ;;  %v1082_v45 = vpop.xlane.xlu0 %1081 }
 0x423   :  { %1238 = vrot.lane.b32.xlu0 %v453_v44, %s9954_s20  ;;  %v1100_v51 = vsub.f32 %v690_v15, %v1082_v45 }
 0x425   :  { %v1110_v24 = vmul.f32 1.442695, %v1100_v51 }
 0x426   :  { %v1085_v46 = vpop.xlane.xlu0 %1084  ;;  %v457_v54 = vpop.permute.xlu1 %456 }
 0x427   :  { %1466 = vrot.lane.b32.xlu0 %v10284_v30, %s9954_s20  ;;  %9543 = vpow2.f32 %v1110_v24  ;;  %v1101_v55 = vsub.f32 %v766_v21, %v1085_v46 }
 0x429   :  { %v1112_v57 = vmul.f32 1.442695, %v1101_v55 }
 0x42a   :  { %v1091_v47 = vpop.xlane.xlu0 %1090 }
 0x42b   :  { %v1103_v53 = vsub.f32 %v918_v22, %v1091_v47 }
 0x42d   :  { %v1116_v56 = vmul.f32 1.442695, %v1103_v53 }
 0x42f   :  { %v1097_v49 = vpop.xlane.xlu0 %1096  ;;  %9545 = vpow2.f32 %v1116_v56 }
 0x430   :  { %v1105_v30 = vsub.f32 %v1070_v33, %v1097_v49  ;;  %9547 = vpow2.f32 %v1112_v57 }
 0x432   :  { %v1120_v58 = vmul.f32 1.442695, %v1105_v30 }
 0x433   :  { %v455_v52 = vpop.permute.xlu0 %454 }
 0x434   :  { %1314 = vrot.lane.b32.xlu1 %v455_v52, %s9954_s20  ;;  %9549 = vpow2.f32 %v1120_v58  ;;  %v9544_v61 = vpop.eup %9543 }
 0x435   :  { %v1128_v62 = vsel %vm467_vm2, %v9544_v61, 0.0  ;;  %9551 = vpow2.f32 %v1108_v18 }
 0x437   :  { %v462_v15 = vpop.permute.xlu0 %461 }
 0x438   :  { %1390 = vrot.lane.b32.xlu1 %v457_v54, %s9954_s20 }
 0x43c   :  { %v10408_v63 = vpop.eup %9545 }
 0x43d   :  { %v1137_v1 = vsel %vm467_vm2, %v10408_v63, 0.0  ;;  %v10412_v2 = vpop.eup %9547 }
 0x43e   :  { %v1131_v3 = vsel %vm467_vm2, %v10412_v2, 0.0 }
 0x441   :  { %v10416_v4 = vpop.eup %9549 }
 0x442   :  { %v1143_v5 = vsel %vm467_vm2, %v10416_v4, 0.0  ;;  %v9552_v26 = vpop.eup %9551 }
 0x443   :  { %v1125_v27 = vsel %vm467_vm2, %v9552_v26, 0.0 }
 0x446   :  { %1123 = vadd.xlane.f32.xlu0 %v1122_v60 }
 0x44a   :  { %1129 = vadd.xlane.f32.xlu0 %v1128_v62 }
 0x44e   :  { %1138 = vadd.xlane.f32.xlu0 %v1137_v1 }
 0x452   :  { %1132 = vadd.xlane.f32.xlu0 %v1131_v3 }
 0x456   :  { %1144 = vadd.xlane.f32.xlu0 %v1143_v5 }
 0x457   :  { %v1088_v6 = vpop.xlane.xlu1 %1087 }
 0x458   :  { %v1102_v20 = vsub.f32 %v10377_v28, %v1088_v6  ;;  %v1805_v6 = vld [vmem:[%s9984_s17 + $0x18] sm:$0xff] }
 0x45a   :  { %v1114_v21 = vmul.f32 1.442695, %v1102_v20 }
 0x45b   :  { %v1094_v7 = vpop.xlane.xlu1 %1093 }
 0x45c   :  { %v1104_v22 = vsub.f32 %v10380_v32, %v1094_v7  ;;  %9553 = vpow2.f32 %v1114_v21  ;;  %v1804_v7 = vld [vmem:[%s9984_s17 + $0x10] sm:$0xff] }
 0x45e   :  { %v1118_v25 = vmul.f32 1.442695, %v1104_v22 }
 0x45f   :  { %v460_v8 = vpop.permute.xlu1 %459 }
 0x460   :  { %1542 = vrot.lane.b32.xlu1 %v460_v8, %s9954_s20  ;;  %9555 = vpow2.f32 %v1118_v25  ;;  %v1803_v8 = vld [vmem:[%s9984_s17 + $0x8] sm:$0xff] }
 0x463   :  { %v464_v9 = vpop.permute.xlu1 %463 }
 0x467   :  { %v1163_v11 = vpop.permute.xlu1 %1162 }
 0x468   :  { %8917 = vmatpush3.msra.mxu1 %v1163_v11 }
 0x469   :  { %8926 = vmatprep.subr.mxu1 %v9947_v0  ;;  %v9554_v29 = vpop.eup %9553 }
 0x46a   :  { %v1134_v10 = vsel %vm467_vm2, %v9554_v29, 0.0 }
 0x46c   :  { %1618 = vrot.lane.b32.xlu0 %v462_v15, %s9954_s20 }
 0x46d   :  { %v9556_v31 = vpop.eup %9555 }
 0x46e   :  { %v1140_v33 = vsel %vm467_vm2, %v9556_v31, 0.0 }
 0x484   :  { %1126 = vadd.xlane.f32.xlu1 %v1125_v27 }
 0x488   :  { %1135 = vadd.xlane.f32.xlu1 %v1134_v10 }
 0x48c   :  { %1141 = vadd.xlane.f32.xlu1 %v1140_v33 }
 0x495   :  { %v1239_v28 = vpop.permute.xlu0 %1238 }
 0x496   :  { %8922 = vmatpush3.msra.mxu0 %v1239_v28 }
 0x497   :  { %8931 = vmatprep.subr.mxu0 %v9947_v0 }
 0x499   :  { %v1467_v32 = vpop.permute.xlu0 %1466 }
 0x49d   :  { %1694 = vrot.lane.b32.xlu1 %v464_v9, %s9954_s20 }
 0x4a6   :  { %v1315_v41 = vpop.permute.xlu1 %1314 }
 0x4aa   :  { %v1391_v44 = vpop.permute.xlu1 %1390 }
 0x4cf   :  { %v1124_v36 = vpop.xlane.xlu0 %1123 }
 0x4d0   :  { %9557 = vrcp.f32 %v1124_v36 }
 0x4d2   :  { %v1543_v46 = vpop.permute.xlu1 %1542 }
 0x4d3   :  { %v1130_v37 = vpop.xlane.xlu0 %1129 }
 0x4d4   :  { %9559 = vrcp.f32 %v1130_v37 }
 0x4d7   :  { %v1139_v45 = vpop.xlane.xlu0 %1138 }
 0x4db   :  { %v1133_v47 = vpop.xlane.xlu0 %1132 }
 0x4dd   :  { %v9558_v38 = vpop.eup %9557 }
 0x4de   :  { %v1154_v40 = vmul.f32 %v9558_v38, %v9542_v59 }
 0x4df   :  { %v1145_v50 = vpop.xlane.xlu0 %1144 }
 0x4e0   :  { %8919 = vmatmul.mubr.msk.f32.vlgmr.msra.gmra.mxu1 %vm467_vm2, %v1154_v40 }
 0x4e1   :  { %v9560_v42 = vpop.eup %9559  ;;  %8927 = vmatpush3.msra.mxu1 %v1315_v41  ;;  %8928 = vmatprep.mubr.msk.f32.mxu1 %vm9953_vm1, %v9947_v0 }
 0x4e2   :  { %8936 = vmatprep.subr.mxu1 %v9947_v0  ;;  %v1156_v43 = vmul.f32 %v9560_v42, %v9544_v61 }
 0x4e3   :  { %v1619_v30 = vpop.permute.xlu0 %1618 }
 0x4e4   :  { %8929 = vmatmul.mubr.msk.f32.vlgmr.msra.gmra.mxu1 %vm467_vm2, %v1156_v43 }
 0x4e5   :  { %8937 = vmatpush3.msra.mxu1 %v1467_v32  ;;  %8938 = vmatprep.mubr.msk.f32.mxu1 %vm9953_vm1, %v9947_v0 }
 0x4e6   :  { %8946 = vmatprep.subr.mxu1 %v9947_v0 }
 0x50d   :  { %v1127_v48 = vpop.xlane.xlu1 %1126 }
 0x50e   :  { %9561 = vrcp.f32 %v1127_v48 }
 0x50f   :  { %9563 = vrcp.f32 %v1133_v47 }
 0x511   :  { %v1136_v49 = vpop.xlane.xlu1 %1135 }
 0x512   :  { %9565 = vrcp.f32 %v1136_v49 }
 0x513   :  { %9567 = vrcp.f32 %v1139_v45 }
 0x515   :  { %v1142_v51 = vpop.xlane.xlu1 %1141 }
 0x516   :  { %9569 = vrcp.f32 %v1142_v51 }
 0x517   :  { %9571 = vrcp.f32 %v1145_v50 }
 0x519   :  { %v1695_v62 = vpop.permute.xlu1 %1694 }
 0x51b   :  { %v9562_v52 = vpop.eup %9561 }
 0x51c   :  { %v1155_v24 = vmul.f32 %v9562_v52, %v9552_v26  ;;  %v9564_v53 = vpop.eup %9563 }
 0x51d   :  { %v1157_v55 = vmul.f32 %v9564_v53, %v10412_v2 }
 0x51e   :  { %8924 = vmatmul.mubr.msk.f32.vlgmr.msra.gmra.mxu0 %vm467_vm2, %v1155_v24 }
 0x51f   :  { %v9566_v54 = vpop.eup %9565  ;;  %8932 = vmatpush3.msra.mxu0 %v1391_v44  ;;  %8933 = vmatprep.mubr.msk.f32.mxu0 %vm9953_vm1, %v9947_v0  ;;  %v8464_v44 = vld [vmem:[%s9989_s21] ss:$0 sm:$0xff]  ;;  %s11544_s21 = sld [smem:[#allocation16_spill]] }
 0x520   :  { %8941 = vmatprep.subr.mxu0 %v9947_v0  ;;  %v1158_v56 = vmul.f32 %v9566_v54, %v9554_v29  ;;  %v9568_v57 = vpop.eup %9567 }
 0x521   :  { %v1159_v59 = vmul.f32 %v9568_v57, %v10408_v63 }
 0x522   :  { %8934 = vmatmul.mubr.msk.f32.vlgmr.msra.gmra.mxu0 %vm467_vm2, %v1157_v55  ;;  %8939 = vmatmul.mubr.msk.f32.vlgmr.msra.gmra.mxu1 %vm467_vm2, %v1158_v56 }
 0x523   :  { %v9570_v58 = vpop.eup %9569  ;;  %8942 = vmatpush3.msra.mxu0 %v1543_v46  ;;  %8947 = vmatpush3.msra.mxu1 %v1619_v30 }
 0x524   :  { %8943 = vmatprep.mubr.msk.f32.mxu0 %vm9953_vm1, %v9947_v0  ;;  %8948 = vmatprep.mubr.msk.f32.mxu1 %vm9953_vm1, %v9947_v0  ;;  %v1160_v60 = vmul.f32 %v9570_v58, %v9556_v31  ;;  %v9572_v61 = vpop.eup %9571 }
 0x525   :  { %8951 = vmatprep.subr.mxu0 %v9947_v0  ;;  %v1161_v1 = vmul.f32 %v9572_v61, %v10416_v4  ;;  %8956 = vmatprep.subr.mxu1 %v1805_v6  ;;  %v1802_v4 = vld [vmem:[%s9984_s17] sm:$0xff]  ;;  %v1942_v61 = vld [vmem:[%s10004_s3 + $0x8] sm:$0xff]  ;;  %s11543_s17 = sld [smem:[#allocation17_spill]] }
 0x526   :  { %8944 = vmatmul.mubr.msk.f32.vlgmr.msra.gmra.mxu0 %vm467_vm2, %v1159_v59  ;;  %8949 = vmatmul.mubr.msk.f32.vlgmr.msra.gmra.mxu1 %vm467_vm2, %v1160_v60  ;;  %v1944_v59 = vld [vmem:[%s10004_s3 + $0x18] sm:$0xff]  ;;  %v1943_v60 = vld [vmem:[%s10004_s3 + $0x10] sm:$0xff] }
 0x527   :  { %8952 = vmatpush3.msra.mxu0 %v1695_v62  ;;  %8953 = vmatprep.mubr.msk.f32.mxu0 %vm9953_vm1, %v9947_v0  ;;  %v1941_v62 = vld [vmem:[%s10004_s3] sm:$0xff]  ;;  %s11547_s3 = sld [smem:[#allocation19_spill]] }
 0x528   :  { %8957 = vmatpush3.msra.mxu1 %v1805_v6  ;;  %8967 = vmatprep.subr.mxu0 %v1944_v59 }
 0x529   :  { %8958 = vmatprep.subr.mxu1 %v1804_v7 }
 0x52a   :  { %8954 = vmatmul.mubr.msk.f32.vlgmr.msra.gmra.mxu0 %vm467_vm2, %v1161_v1  ;;  %8959 = vmatpush3.msra.mxu1 %v1804_v7 }
 0x52b   :  { %8960 = vmatprep.subr.mxu1 %v1803_v8  ;;  %8968 = vmatpush3.msra.mxu0 %v1944_v59 }
 0x52c   :  { %8961 = vmatpush3.msra.mxu1 %v1803_v8  ;;  %8969 = vmatprep.subr.mxu0 %v1943_v60  ;;  %v8467_v8 = vld [vmem:[%s9994_s25] ss:$0 sm:$0xff]  ;;  %s11545_s25 = sld [smem:[#allocation18_spill]] }
 0x52d   :  { %8962 = vmatprep.subr.mxu1 %v1802_v4  ;;  %8970 = vmatpush3.msra.mxu0 %v1943_v60 }
 0x52e   :  { %8963 = vmatpush3.msra.mxu1 %v1802_v4  ;;  %8971 = vmatprep.subr.mxu0 %v1942_v61  ;;  %v8468_v4 = vld [vmem:[%s9999_s29] ss:$0 sm:$0xff]  ;;  %s11546_s29 = sld [smem:[#allocation21_spill]] }
 0x52f   :  { %8972 = vmatpush3.msra.mxu0 %v1942_v61 }
 0x530   :  { %8973 = vmatprep.subr.mxu0 %v1941_v62 }
 0x531   :  { %8974 = vmatpush3.msra.mxu0 %v1941_v62 }
 0x5a0   :  { %v1234_v63 = vpop.f32.mrf.mxu1 }
 0x5a2   :  { %v8920_v2 = vpop.f32.mrf.mxu1 }
 0x5a4   :  { %v1386_v3 = vpop.f32.mrf.mxu1 }
 0x5a5   :  { %1775 = vrot.lane.b32.xlu1 %v1386_v3, %s9955_s2 }
 0x5a6   :  { %v8930_v5 = vpop.f32.mrf.mxu1 }
 0x5de   :  { %v1310_v9 = vpop.f32.mrf.mxu0 }
 0x5df   :  { %1771 = vrot.lane.b32.xlu0 %v1310_v9, %s9956_s0 }
 0x5e0   :  { %v8925_v11 = vpop.f32.mrf.mxu0 }
 0x5e2   :  { %v1462_v13 = vpop.f32.mrf.mxu0  ;;  %v1538_v15 = vpop.f32.mrf.mxu1 }
 0x5e3   :  { %1779 = vrot.lane.b32.xlu1 %v1462_v13, %s9957_s7 }
 0x5e4   :  { %v8935_v18 = vpop.f32.mrf.mxu0  ;;  %v8940_v20 = vpop.f32.mrf.mxu1 }
 0x5e6   :  { %v1614_v21 = vpop.f32.mrf.mxu0  ;;  %v1690_v22 = vpop.f32.mrf.mxu1 }
 0x5e7   :  { %1788 = vrot.lane.b32.xlu0 %v1614_v21, %s9956_s0 }
 0x5e8   :  { %v8945_v25 = vpop.f32.mrf.mxu0  ;;  %v8950_v26 = vpop.f32.mrf.mxu1 }
 0x5e9   :  { %v2057_v25 = vld [vmem:[%s11543_s17 + $0x30] sm:$0xff]  ;;  %v2056_v26 = vld [vmem:[%s11543_s17 + $0x28] sm:$0xff] }
 0x5ea   :  { %v1766_v27 = vpop.f32.mrf.mxu0 }
 0x5eb   :  { %1796 = vrot.lane.b32.xlu1 %v1766_v27, %s9957_s7  ;;  %1792 = vrot.lane.b32.xlu0 %v1690_v22, %s9955_s2  ;;  %v2058_v22 = vld [vmem:[%s11543_s17 + $0x38] sm:$0xff]  ;;  %v2055_v27 = vld [vmem:[%s11543_s17 + $0x20] sm:$0xff] }
 0x5ec   :  { %v8955_v29 = vpop.f32.mrf.mxu0  ;;  %8978 = vmatprep.subr.mxu1 %v2058_v22 }
 0x5ed   :  { %v2054_v29 = vld [vmem:[%s11543_s17 + $0x18] sm:$0xff] }
 0x617   :  { %v1776_v10 = vpop.permute.xlu1 %1775 }
 0x651   :  { %v1772_v31 = vpop.permute.xlu0 %1771 }
 0x652   :  { %v1782_v33 = vsel %vm467_vm2, %v1234_v63, %v1772_v31  ;;  %v2052_v31 = vld [vmem:[%s11543_s17 + $0x8] sm:$0xff] }
 0x653   :  { %v1784_v28 = vsel %vm1783_vm3, %v1782_v33, %v1776_v10  ;;  %v2053_v10 = vld [vmem:[%s11543_s17 + $0x10] sm:$0xff]  ;;  %v2051_v33 = vld [vmem:[%s11543_s17] sm:$0xff]  ;;  %s11558_s17 = sld [smem:[#allocation31_spill]] }
 0x655   :  { %v1780_v32 = vpop.permute.xlu1 %1779 }
 0x656   :  { %v1786_v36 = vsel %vm1785_vm4, %v1784_v28, %v1780_v32  ;;  %v8469_v28 = vld [vmem:[%s11544_s21] ss:$0 sm:$0xff]  ;;  %s11559_s21 = sld [smem:[#allocation29_spill]] }
 0x657   :  { %8964 = vmatprep.mubr.msk.f32.mxu1 %vm295_vm0, %v1786_v36 }
 0x659   :  { %v1789_v37 = vpop.permute.xlu0 %1788 }
 0x65a   :  { %v1799_v38 = vsel %vm467_vm2, %v1538_v15, %v1789_v37 }
 0x65d   :  { %v1797_v40 = vpop.permute.xlu1 %1796  ;;  %v1793_v41 = vpop.permute.xlu0 %1792 }
 0x65e   :  { %v1800_v42 = vsel %vm1783_vm3, %v1799_v38, %v1793_v41 }
 0x65f   :  { %v1801_v43 = vsel %vm1785_vm4, %v1800_v42, %v1797_v40 }
 0x660   :  { %8965 = vmatmul.mubr.msk.f32.vlgmr.msra.gmra.mxu1 %vm295_vm0, %v1801_v43 }
 0x661   :  { %8979 = vmatpush3.msra.mxu1 %v2058_v22 }
 0x662   :  { %8980 = vmatprep.subr.mxu1 %v2057_v25 }
 0x663   :  { %8981 = vmatpush3.msra.mxu1 %v2057_v25 }
 0x664   :  { %8982 = vmatprep.subr.mxu1 %v2056_v26 }
 0x665   :  { %8983 = vmatpush3.msra.mxu1 %v2056_v26 }
 0x666   :  { %8984 = vmatprep.subr.mxu1 %v2055_v27 }
 0x667   :  { %8985 = vmatpush3.msra.mxu1 %v2055_v27 }
 0x668   :  { %8986 = vmatprep.subr.mxu1 %v2054_v29 }
 0x669   :  { %8987 = vmatpush3.msra.mxu1 %v2054_v29 }
 0x66a   :  { %8988 = vmatprep.subr.mxu1 %v2053_v10 }
 0x66b   :  { %8989 = vmatpush3.msra.mxu1 %v2053_v10  ;;  %v8475_v10 = vld [vmem:[%s11547_s3] ss:$0 sm:$0xff]  ;;  %s11562_s3 = sld [smem:[#allocation32_spill]] }
 0x66c   :  { %8990 = vmatprep.subr.mxu1 %v2052_v31 }
 0x66d   :  { %8991 = vmatpush3.msra.mxu1 %v2052_v31 }
 0x66e   :  { %8992 = vmatprep.subr.mxu1 %v2051_v33 }
 0x66f   :  { %8993 = vmatpush3.msra.mxu1 %v2051_v33 }
 0x720   :  { %v8966_v45 = vpop.f32.mrf.mxu1 }
 0x721   :  { %v1891_v46 = vadd.f32 %v8966_v45, %v8464_v44 }
 0x722   :  { %v1885_v47 = vpop.f32.mrf.mxu1 }
 0x723   :  { %v1886_v48 = vadd.f32 %v8464_v44, %v1885_v47  ;;  %v1895_v49 = vadd.f32 %v1891_v46, %v10262_v14 }
 0x725   :  { %v1901_v50 = vsel %vm295_vm0, %v1895_v49, 0.0  ;;  %v1894_v51 = vadd.f32 %v1886_v48, %v10252_v12 }
 0x726   :  { %1902 = vadd.xlane.f32.xlu1 %v1901_v50 }
 0x727   :  { %v1898_v52 = vsel %vm295_vm0, %v1894_v51, 0.0 }
 0x728   :  { %1899 = vadd.xlane.f32.xlu0 %v1898_v52 }
 0x7af   :  { %v1903_v24 = vpop.xlane.xlu1 %1902 }
 0x7b0   :  { %v1906_v53 = vmul.f32 0.03125, %v1903_v24 }
 0x7b1   :  { %v1900_v54 = vpop.xlane.xlu0 %1899 }
 0x7b2   :  { %v1905_v55 = vmul.f32 0.03125, %v1900_v54  ;;  %v1908_v56 = vsub.f32 %v1895_v49, %v1906_v53 }
 0x7b4   :  { %v1907_v57 = vsub.f32 %v1894_v51, %v1905_v55  ;;  %v1910_v58 = vmul.f32 %v1908_v56, %v1908_v56 }
 0x7b6   :  { %v1909_v30 = vmul.f32 %v1907_v57, %v1907_v57  ;;  %v1914_v12 = vsel %vm295_vm0, %v1910_v58, 0.0 }
 0x7b8   :  { %v1911_v14 = vsel %vm295_vm0, %v1909_v30, 0.0 }
 0x7b9   :  { %1912 = vadd.xlane.f32.xlu0 %v1911_v14 }
 0x7bd   :  { %1915 = vadd.xlane.f32.xlu0 %v1914_v12 }
 0x842   :  { %v1913_v1 = vpop.xlane.xlu0 %1912 }
 0x843   :  { %v1917_v63 = vmul.f32 0.03125, %v1913_v1 }
 0x845   :  { %v1919_v2 = vadd.f32 1e-05, %v1917_v63 }
 0x846   :  { %v1916_v3 = vpop.xlane.xlu0 %1915 }
 0x847   :  { %9573 = vrsqrt.f32 %v1919_v2  ;;  %v1918_v5 = vmul.f32 0.03125, %v1916_v3 }
 0x849   :  { %v1920_v6 = vadd.f32 1e-05, %v1918_v5 }
 0x84b   :  { %9575 = vrsqrt.f32 %v1920_v6 }
 0x854   :  { %v9574_v7 = vpop.eup %9573 }
 0x855   :  { %v1923_v9 = vmul.f32 %v9574_v7, %v1907_v57  ;;  %v8472_v57 = vld [vmem:[%s11545_s25] ss:$0 sm:$0xff]  ;;  %s11560_s25 = sld [smem:[#allocation30_spill]] }
 0x857   :  { %v1931_v11 = vmul.f32 %v8467_v8, %v1923_v9 }
 0x858   :  { %v9576_v13 = vpop.eup %9575 }
 0x859   :  { %v1924_v15 = vmul.f32 %v9576_v13, %v1908_v56  ;;  %v10489_v18 = vadd.f32 %v8468_v4, %v1931_v11  ;;  %v2197_v11 = vld [vmem:[%s11546_s29 + $0x18] sm:$0xff]  ;;  %v2196_v13 = vld [vmem:[%s11546_s29 + $0x10] sm:$0xff] }
 0x85a   :  { %8997 = vmatprep.subr.mxu0 %v2197_v11 }
 0x85b   :  { %v1932_v20 = vmul.f32 %v8467_v8, %v1924_v15  ;;  %8975 = vmatprep.mubr.msk.f32.mxu0 %vm295_vm0, %v10489_v18  ;;  %v2195_v15 = vld [vmem:[%s11546_s29 + $0x8] sm:$0xff] }
 0x85d   :  { %v1940_v21 = vadd.f32 %v8468_v4, %v1932_v20 }
 0x85f   :  { %8976 = vmatmul.mubr.msk.f32.vlgmr.msra.gmra.mxu0 %vm295_vm0, %v1940_v21 }
 0x860   :  { %8998 = vmatpush3.msra.mxu0 %v2197_v11  ;;  %v2358_v11 = vld [vmem:[%s11550_s15 + $0x28] sm:$0xff] }
 0x861   :  { %8999 = vmatprep.subr.mxu0 %v2196_v13 }
 0x862   :  { %9000 = vmatpush3.msra.mxu0 %v2196_v13  ;;  %v10582_v13 = vld [vmem:[%s11550_s15 + $0x18] sm:$0xff] }
 0x863   :  { %9001 = vmatprep.subr.mxu0 %v2195_v15 }
 0x864   :  { %9002 = vmatpush3.msra.mxu0 %v2195_v15  ;;  %v10586_v15 = vld [vmem:[%s11550_s15 + $0x8] sm:$0xff] }
 0x91f   :  { %v8977_v32 = vpop.f32.mrf.mxu0 }
 0x920   :  { %v2030_v36 = vadd.f32 %v8977_v32, %v8469_v28 }
 0x921   :  { %v2024_v37 = vpop.f32.mrf.mxu0 }
 0x922   :  { %v2036_v38 = vmul.f32 0.044715, %v2030_v36  ;;  %v2025_v40 = vadd.f32 %v8469_v28, %v2024_v37  ;;  %v2034_v54 = vmul.f32 0.5, %v2030_v36 }
 0x924   :  { %v2038_v41 = vmul.f32 %v2036_v38, %v2030_v36  ;;  %v2035_v42 = vmul.f32 0.044715, %v2025_v40  ;;  %v2033_v24 = vmul.f32 0.5, %v2025_v40 }
 0x926   :  { %v2040_v43 = vmul.f32 %v2038_v41, %v2030_v36  ;;  %v2037_v44 = vmul.f32 %v2035_v42, %v2025_v40  ;;  %v8477_v41 = vld [vmem:[%s11549_s11] ss:$0 sm:$0xff]  ;;  %s11564_s11 = sld [smem:[#allocation35_spill]] }
 0x928   :  { %v2042_v45 = vadd.f32 %v2040_v43, %v2030_v36  ;;  %v2039_v46 = vmul.f32 %v2037_v44, %v2025_v40  ;;  %v8476_v36 = vld [vmem:[%s11548_s10] ss:$0 sm:$0xff]  ;;  %s11563_s10 = sld [smem:[#allocation34_spill]] }
 0x92a   :  { %v2044_v47 = vmul.f32 0.7978846, %v2042_v45  ;;  %v2041_v48 = vadd.f32 %v2039_v46, %v2025_v40 }
 0x92c   :  { %9577 = vtanh.f32 %v2044_v47  ;;  %v2043_v49 = vmul.f32 0.7978846, %v2041_v48 }
 0x92e   :  { %9579 = vtanh.f32 %v2043_v49 }
 0x939   :  { %v9578_v50 = vpop.eup %9577 }
 0x93a   :  { %v2048_v52 = vadd.f32 1.0, %v9578_v50 }
 0x93b   :  { %v9580_v51 = vpop.eup %9579 }
 0x93c   :  { %v2047_v53 = vadd.f32 1.0, %v9580_v51  ;;  %v2050_v56 = vmul.f32 %v2048_v52, %v2034_v54 }
 0x93e   :  { %v2049_v55 = vmul.f32 %v2047_v53, %v2033_v24 }
 0x940   :  { %8994 = vmatprep.mubr.msk.f32.mxu1 %vm2066_vm5, %v2049_v55 }
 0x941   :  { %8995 = vmatmul.mubr.msk.f32.vlgmr.msra.gmra.mxu1 %vm2066_vm5, %v2050_v56 }
 0xa01   :  { %v8996_v30 = vpop.f32.mrf.mxu1 }
 0xa02   :  { %v2145_v14 = vadd.f32 %v8996_v30, %v8472_v57  ;;  %v2374_v30 = vld [vmem:[%s11550_s15 + $0xa8] sm:$0xff] }
 0xa03   :  { %v2139_v58 = vpop.f32.mrf.mxu1 }
 0xa04   :  { %v2140_v12 = vadd.f32 %v8472_v57, %v2139_v58  ;;  %v2149_v59 = vadd.f32 %v2145_v14, %v1940_v21  ;;  %v10534_v57 = vld [vmem:[%s11550_s15 + $0xb0] sm:$0xff]  ;;  %v2376_v14 = vld [vmem:[%s11550_s15 + $0xb8] sm:$0xff] }
 0xa05   :  { %9008 = vmatprep.subr.mxu1 %v2376_v14  ;;  %v2372_v58 = vld [vmem:[%s11550_s15 + $0x98] sm:$0xff] }
 0xa06   :  { %v2155_v60 = vsel %vm295_vm0, %v2149_v59, 0.0  ;;  %v2148_v61 = vadd.f32 %v2140_v12, %v10489_v18  ;;  %v2194_v18 = vld [vmem:[%s11546_s29] sm:$0xff]  ;;  %v2371_v12 = vld [vmem:[%s11550_s15 + $0x90] sm:$0xff]  ;;  %9009 = vmatpush3.msra.mxu1 %v2376_v14  ;;  %s11561_s29 = sld [smem:[#allocation33_spill]] }
 0xa07   :  { %2156 = vadd.xlane.f32.xlu0 %v2155_v60  ;;  %9003 = vmatprep.subr.mxu0 %v2194_v18  ;;  %v10543_v60 = vld [vmem:[%s11550_s15 + $0x80] sm:$0xff] }
 0xa08   :  { %v2152_v62 = vsel %vm295_vm0, %v2148_v61, 0.0  ;;  %9004 = vmatpush3.msra.mxu0 %v2194_v18  ;;  %v2355_v18 = vld [vmem:[%s11550_s15 + $0x10] sm:$0xff] }
 0xa09   :  { %2153 = vadd.xlane.f32.xlu1 %v2152_v62  ;;  %2416 = vmatprep.subr.mxu0 %v10534_v57  ;;  %v10547_v62 = vld [vmem:[%s11550_s15 + $0x78] sm:$0xff] }
 0xa90   :  { %v2157_v1 = vpop.xlane.xlu0 %2156 }
 0xa91   :  { %v2159_v63 = vmul.f32 0.03125, %v2157_v1  ;;  %v10550_v1 = vld [vmem:[%s11550_s15 + $0x68] sm:$0xff] }
 0xa92   :  { %v2154_v2 = vpop.xlane.xlu1 %2153 }
 0xa93   :  { %v2161_v3 = vsub.f32 %v2149_v59, %v2159_v63  ;;  %v2158_v5 = vmul.f32 0.03125, %v2154_v2  ;;  %v2373_v59 = vld [vmem:[%s11550_s15 + $0xa0] sm:$0xff]  ;;  %v2367_v63 = vld [vmem:[%s11550_s15 + $0x70] sm:$0xff] }
 0xa94   :  { %9010 = vmatprep.subr.mxu1 %v2373_v59  ;;  %v10555_v2 = vld [vmem:[%s11550_s15 + $0x60] sm:$0xff] }
 0xa95   :  { %v2160_v6 = vsub.f32 %v2148_v61, %v2158_v5  ;;  %v2163_v7 = vmul.f32 %v2161_v3, %v2161_v3  ;;  %v2370_v61 = vld [vmem:[%s11550_s15 + $0x88] sm:$0xff]  ;;  %9011 = vmatpush3.msra.mxu1 %v2373_v59  ;;  %v2364_v5 = vld [vmem:[%s11550_s15 + $0x58] sm:$0xff] }
 0xa96   :  { %9012 = vmatprep.subr.mxu1 %v2370_v61 }
 0xa97   :  { %v2167_v8 = vsel %vm295_vm0, %v2163_v7, 0.0  ;;  %v2162_v9 = vmul.f32 %v2160_v6, %v2160_v6  ;;  %9013 = vmatpush3.msra.mxu1 %v2370_v61  ;;  %v10568_v7 = vld [vmem:[%s11550_s15 + $0x38] sm:$0xff] }
 0xa98   :  { %2168 = vadd.xlane.f32.xlu0 %v2167_v8  ;;  %9014 = vmatprep.subr.mxu1 %v2367_v63  ;;  %v2361_v8 = vld [vmem:[%s11550_s15 + $0x40] sm:$0xff] }
 0xa99   :  { %v2164_v4 = vsel %vm295_vm0, %v2162_v9, 0.0  ;;  %9015 = vmatpush3.msra.mxu1 %v2367_v63  ;;  %v10573_v9 = vld [vmem:[%s11550_s15 + $0x30] sm:$0xff] }
 0xa9a   :  { %2165 = vadd.xlane.f32.xlu1 %v2164_v4  ;;  %9016 = vmatprep.subr.mxu1 %v2364_v5  ;;  %v10577_v4 = vld [vmem:[%s11550_s15 + $0x20] sm:$0xff] }
 0xa9b   :  { %9017 = vmatpush3.msra.mxu1 %v2364_v5  ;;  %v2377_v5 = vld [vmem:[%s11555_s23] sm:$0x7]  ;;  %s11570_s23 = sld [smem:[#allocation42_spill]] }
 0xa9c   :  { %9018 = vmatprep.subr.mxu1 %v2361_v8 }
 0xa9d   :  { %9019 = vmatpush3.msra.mxu1 %v2361_v8  ;;  %v2389_v8 = vsub.s32 2, %v10267_v16 }
 0xa9e   :  { %9020 = vmatprep.subr.mxu1 %v2358_v11 }
 0xa9f   :  { %9021 = vmatpush3.msra.mxu1 %v2358_v11  ;;  %v10644_v11 = vrot.slane %v2377_v5, %v10274_v19 }
 0xaa0   :  { %9022 = vmatprep.subr.mxu1 %v2355_v18 }
 0xaa1   :  { %9023 = vmatpush3.msra.mxu1 %v2355_v18 }
 0xaa2   :  { %9032 = vmatprep.subr.mxu1 %v9947_v0 }
 0xb21   :  { %v2169_v20 = vpop.xlane.xlu0 %2168 }
 0xb22   :  { %v2171_v21 = vmul.f32 0.03125, %v2169_v20  ;;  %v10591_v20 = vld [vmem:[%s11550_s15] sm:$0xff] }
 0xb23   :  { %v2166_v22 = vpop.xlane.xlu1 %2165 }
 0xb24   :  { %v2173_v25 = vadd.f32 1e-05, %v2171_v21  ;;  %v2170_v26 = vmul.f32 0.03125, %v2166_v22  ;;  %v10599_v21 = vld [vmem:[%s11551_s16] sm:$0xff] }
 0xb25   :  { %v10604_v22 = vld [vmem:[%s11552_s18] sm:$0xff] }
 0xb26   :  { %9581 = vrsqrt.f32 %v2173_v25  ;;  %v2172_v27 = vadd.f32 1e-05, %v2170_v26  ;;  %v10609_v25 = vld [vmem:[%s11551_s16 + $0x8] sm:$0xff] }
 0xb27   :  { %v10614_v26 = vld [vmem:[%s11552_s18 + $0x8] sm:$0xff] }
 0xb28   :  { %9583 = vrsqrt.f32 %v2172_v27 }
 0xb33   :  { %v9582_v29 = vpop.eup %9581 }
 0xb34   :  { %v2177_v31 = vmul.f32 %v9582_v29, %v2161_v3  ;;  %v10559_v3 = vld [vmem:[%s11550_s15 + $0x50] sm:$0xff] }
 0xb35   :  { %v9584_v33 = vpop.eup %9583 }
 0xb36   :  { %v2176_v28 = vmul.f32 %v9584_v33, %v2160_v6  ;;  %v2185_v32 = vmul.f32 %v8475_v10, %v2177_v31  ;;  %v10564_v6 = vld [vmem:[%s11550_s15 + $0x48] sm:$0xff] }
 0xb38   :  { %v2184_v37 = vmul.f32 %v8475_v10, %v2176_v28  ;;  %v2193_v40 = vadd.f32 %v8476_v36, %v2185_v32 }
 0xb3a   :  { %v2192_v38 = vadd.f32 %v8476_v36, %v2184_v37  ;;  %v8480_v36 = vld [vmem:[%s11553_s22] ss:$0 sm:$0xff]  ;;  %s11568_s22 = sld [smem:[#allocation43_spill]] }
 0xb3c   :  { %9005 = vmatprep.mubr.msk.f32.mxu0 %vm295_vm0, %v2192_v38 }
 0xb3d   :  { %9006 = vmatmul.mubr.msk.f32.vlgmr.msra.gmra.mxu0 %vm295_vm0, %v2193_v40  ;;  %v8481_v40 = vld [vmem:[%s11554_s27] ss:$0 sm:$0xff]  ;;  %s11569_s27 = sld [smem:[#allocation41_spill]] }
 0xb3e   :  { %2464 = vmatprep.mubr.f32.mxu0 %v9947_v0  ;;  %2417 = vmatpush1.msra.mxu0 %v2374_v30 }
 0xb3f   :  { %2418 = vmatprep.subr.mxu0 %v2372_v58 }
 0xb40   :  { %2419 = vmatpush1.msra.mxu0 %v2371_v12 }
 0xb41   :  { %2420 = vmatprep.subr.mxu0 %v10543_v60 }
 0xb42   :  { %2421 = vmatpush1.msra.mxu0 %v10547_v62 }
 0xb43   :  { %2422 = vmatprep.subr.mxu0 %v10550_v1 }
 0xb44   :  { %2423 = vmatpush1.msra.mxu0 %v10555_v2 }
 0xb45   :  { %2424 = vmatprep.subr.mxu0 %v10559_v3 }
 0xb46   :  { %2425 = vmatpush1.msra.mxu0 %v10564_v6 }
 0xb47   :  { %2426 = vmatprep.subr.mxu0 %v10568_v7 }
 0xb48   :  { %2427 = vmatpush1.msra.mxu0 %v10573_v9 }
 0xb49   :  { %2428 = vmatprep.subr.mxu0 %v10577_v4 }
 0xb4a   :  { %2429 = vmatpush1.msra.mxu0 %v10582_v13 }
 0xb4b   :  { %2430 = vmatprep.subr.mxu0 %v10586_v15 }
 0xb4c   :  { %2431 = vmatpush1.msra.mxu0 %v10591_v20 }
 0xb4d   :  { %9027 = vmatprep.subr.mxu0 %v9947_v0 }
 0xbfd   :  { %v9007_v42 = vpop.f32.mrf.mxu0 }
 0xbfe   :  { %v2283_v43 = vadd.f32 %v9007_v42, %v8477_v41 }
 0xbff   :  { %v2277_v44 = vpop.f32.mrf.mxu0 }
 0xc00   :  { %v2278_v45 = vadd.f32 %v8477_v41, %v2277_v44  ;;  %v2291_v46 = vsel %vm2066_vm5, %v2283_v43, 0.0 }
 0xc01   :  { %2292 = vadd.xlane.f32.xlu0 %v2291_v46 }
 0xc02   :  { %v2288_v47 = vsel %vm2066_vm5, %v2278_v45, 0.0 }
 0xc03   :  { %2289 = vadd.xlane.f32.xlu1 %v2288_v47 }
 0xc8a   :  { %v2293_v48 = vpop.xlane.xlu0 %2292 }
 0xc8b   :  { %v2296_v49 = vmul.f32 0.015625, %v2293_v48 }
 0xc8c   :  { %v2290_v50 = vpop.xlane.xlu1 %2289 }
 0xc8d   :  { %v10523_v51 = vsub.f32 %v2283_v43, %v2296_v49  ;;  %v2295_v52 = vmul.f32 0.015625, %v2290_v50 }
 0xc8f   :  { %v10525_v24 = vsub.f32 %v2278_v45, %v2295_v52  ;;  %v2300_v53 = vmul.f32 %v10523_v51, %v10523_v51 }
 0xc91   :  { %v2304_v54 = vsel %vm2066_vm5, %v2300_v53, 0.0  ;;  %v2299_v55 = vmul.f32 %v10525_v24, %v10525_v24 }
 0xc92   :  { %2305 = vadd.xlane.f32.xlu0 %v2304_v54 }
 0xc93   :  { %v2301_v56 = vsel %vm2066_vm5, %v2299_v55, 0.0 }
 0xc94   :  { %2302 = vadd.xlane.f32.xlu1 %v2301_v56 }
 0xca5   :  { %2576 = vrot.lane.b32.xlu1 %v10599_v21, %s9954_s20 }
 0xca9   :  { %2556 = vrot.lane.b32.xlu1 %v10604_v22, %s9954_s20 }
 0xcad   :  { %2578 = vrot.lane.b32.xlu1 %v10609_v25, %s9954_s20 }
 0xcb1   :  { %2558 = vrot.lane.b32.xlu1 %v10614_v26, %s9954_s20 }
 0xd1b   :  { %v2306_v27 = vpop.xlane.xlu0 %2305 }
 0xd1c   :  { %v2308_v29 = vmul.f32 0.015625, %v2306_v27 }
 0xd1d   :  { %v2303_v10 = vpop.xlane.xlu1 %2302 }
 0xd1e   :  { %v2310_v31 = vadd.f32 1e-05, %v2308_v29  ;;  %v2307_v33 = vmul.f32 0.015625, %v2303_v10  ;;  %v10646_v29 = vrot.slane %v2377_v5, %v2389_v8 }
 0xd20   :  { %9585 = vrsqrt.f32 %v2310_v31  ;;  %v2309_v28 = vadd.f32 1e-05, %v2307_v33 }
 0xd21   :  { %v10639_v63 = vpop.permute.xlu1 %2576 }
 0xd22   :  { %9587 = vrsqrt.f32 %v2309_v28 }
 0xd25   :  { %v10651_v28 = vpop.permute.xlu1 %2556 }
 0xd2d   :  { %v9586_v32 = vpop.eup %9585 }
 0xd2e   :  { %v2314_v37 = vmul.f32 %v9586_v32, %v10523_v51 }
 0xd2f   :  { %v9588_v38 = vpop.eup %9587 }
 0xd30   :  { %v2322_v41 = vmul.f32 %v8480_v36, %v2314_v37  ;;  %v2313_v42 = vmul.f32 %v9588_v38, %v10525_v24 }
 0xd32   :  { %v2330_v43 = vadd.f32 %v8481_v40, %v2322_v41  ;;  %v2321_v44 = vmul.f32 %v8480_v36, %v2313_v42 }
 0xd34   :  { %v2329_v45 = vadd.f32 %v8481_v40, %v2321_v44  ;;  %v2334_v46 = vmul.f32 0.044715, %v2330_v43  ;;  %v2332_v12 = vmul.f32 0.5, %v2330_v43  ;;  %v10663_v40 = vrot.slane %v2377_v5, %v10270_v17 }
 0xd36   :  { %v2333_v47 = vmul.f32 0.044715, %v2329_v45  ;;  %v2336_v48 = vmul.f32 %v2334_v46, %v2330_v43  ;;  %v2331_v24 = vmul.f32 0.5, %v2329_v45 }
 0xd38   :  { %v2335_v49 = vmul.f32 %v2333_v47, %v2329_v45  ;;  %v2338_v50 = vmul.f32 %v2336_v48, %v2330_v43 }
 0xd3a   :  { %v2337_v52 = vmul.f32 %v2335_v49, %v2329_v45  ;;  %v2340_v53 = vadd.f32 %v2338_v50, %v2330_v43  ;;  %v10666_v43 = vpop.permute.xlu1 %2578 }
 0xd3c   :  { %v2339_v54 = vadd.f32 %v2337_v52, %v2329_v45  ;;  %v2342_v55 = vmul.f32 0.7978846, %v2340_v53 }
 0xd3e   :  { %v2341_v56 = vmul.f32 0.7978846, %v2339_v54  ;;  %9589 = vtanh.f32 %v2342_v55  ;;  %v10672_v48 = vpop.permute.xlu1 %2558 }
 0xd40   :  { %9591 = vtanh.f32 %v2341_v56 }
 0xd4b   :  { %v9590_v51 = vpop.eup %9589 }
 0xd4c   :  { %v2346_v14 = vadd.f32 1.0, %v9590_v51 }
 0xd4d   :  { %v9592_v30 = vpop.eup %9591 }
 0xd4e   :  { %v2345_v58 = vadd.f32 1.0, %v9592_v30  ;;  %v10624_v61 = vmul.f32 %v2346_v14, %v2332_v12 }
 0xd50   :  { %v10622_v59 = vmul.f32 %v2345_v58, %v2331_v24 }
 0xd52   :  { %8482 = vmatmul.mubr.msk.f32.vlgmr.msra.gmra.mxu0 %vm2066_vm5, %v10622_v59  ;;  %9024 = vmatprep.mubr.msk.f32.mxu1 %vm2066_vm5, %v10622_v59 }
 0xd53   :  { %9025 = vmatmul.mubr.msk.f32.vlgmr.msra.gmra.mxu1 %vm2066_vm5, %v10624_v61  ;;  %2470 = vmatprep.mubr.f32.mxu0 %v9947_v0 }
 0xd54   :  { %9034 = vmatprep.mubr.msk.f32.mxu1 %vm9953_vm1, %v9947_v0 }
 0xd56   :  { %8483 = vmatmul.mubr.msk.f32.gmra.mxu0 %vm2066_vm5, %v10624_v61 }
 0xd57   :  { %9029 = vmatprep.mubr.msk.f32.mxu0 %vm9953_vm1, %v9947_v0 }
 0xe12   :  { %v2466_v18 = vpop.f32.mrf.mxu0 }
 0xe13   :  { %v9026_v27 = vpop.f32.mrf.mxu1  ;;  %v2467_v42 = vadd.f32 %v2466_v18, %v10663_v40 }
 0xe14   :  { %v2468_v10 = vpop.f32.mrf.mxu0  ;;  %v2549_v16 = vadd.f32 %v9026_v27, %v10646_v29 }
 0xe15   :  { %v10649_v31 = vadd.f32 %v2468_v10, %v10644_v11  ;;  %v2543_v33 = vpop.f32.mrf.mxu1  ;;  %v2582_v45 = vmul.f32 %v10639_v63, %v2467_v42  ;;  %v2552_v55 = vmul.f32 %v2467_v42, %v10599_v21 }
 0xe16   :  { %v2544_v32 = vadd.f32 %v2543_v33, %v10646_v29  ;;  %v2585_v38 = vmul.f32 %v2549_v16, %v10614_v26  ;;  %v2472_v41 = vpop.f32.mrf.mxu0 }
 0xe17   :  { %v2562_v36 = vmul.f32 %v10651_v28, %v10649_v31  ;;  %v2473_v26 = vadd.f32 %v2472_v41, %v10663_v40 }
 0xe18   :  { %v2584_v37 = vmul.f32 %v2544_v32, %v10604_v22  ;;  %v2474_v44 = vpop.f32.mrf.mxu0 }
 0xe19   :  { %2566 = vrot.lane.b32.xlu1 %v2562_v36, %s9954_s20  ;;  %v10670_v46 = vadd.f32 %v2474_v44, %v10644_v11  ;;  %v2583_v52 = vmul.f32 %v10666_v43, %v2473_v26  ;;  %v2553_v24 = vmul.f32 %v2473_v26, %v10609_v25 }
 0xe1a   :  { %2588 = vrot.lane.b32.xlu0 %v2584_v37, %s9954_s20 }
 0xe1b   :  { %v2563_v49 = vmul.f32 %v10672_v48, %v10670_v46 }
 0xe1e   :  { %2590 = vrot.lane.b32.xlu0 %v2585_v38, %s9954_s20 }
 0xe8b   :  { %v2567_v54 = vpop.permute.xlu1 %2566 }
 0xe8c   :  { %v2589_v22 = vpop.permute.xlu0 %2588  ;;  %v2572_v56 = vadd.f32 %v2567_v54, %v2552_v55 }
 0xe8d   :  { %v2594_v47 = vadd.f32 %v2589_v22, %v2582_v45 }
 0xe8f   :  { %2611 = vrot.lane.b32.xlu0 %v2594_v47, %s9952_s13  ;;  %2615 = vrot.lane.b32.xlu1 %v2594_v47, %s9958_s24 }
 0xe90   :  { %v2591_v50 = vpop.permute.xlu0 %2590 }
 0xe91   :  { %v2595_v53 = vadd.f32 %v2591_v50, %v2583_v52 }
 0xe93   :  { %2613 = vrot.lane.b32.xlu0 %v2594_v47, %s9948_s19  ;;  %2568 = vrot.lane.b32.xlu1 %v2563_v49, %s9954_s20 }
 0xe97   :  { %2618 = vrot.lane.b32.xlu0 %v2595_v53, %s9952_s13  ;;  %2622 = vrot.lane.b32.xlu1 %v2595_v53, %s9958_s24 }
 0xe9b   :  { %2620 = vrot.lane.b32.xlu0 %v2595_v53, %s9948_s19  ;;  %2599 = vrot.lane.b32.xlu1 %v2572_v56, %s9948_s19 }
 0xe9f   :  { %2948 = vrot.lane.b32.xlu1 %v2595_v53, %s9954_s20  ;;  %2597 = vrot.lane.b32.xlu0 %v2572_v56, %s9952_s13 }
 0xea3   :  { %2601 = vrot.lane.b32.xlu0 %v2572_v56, %s9958_s24 }
 0xea7   :  { %2644 = vrot.lane.b32.xlu0 %v2594_v47, %s9954_s20 }
 0xf01   :  { %v2612_v51 = vpop.permute.xlu0 %2611  ;;  %v2616_v30 = vpop.permute.xlu1 %2615 }
 0xf02   :  { %2720 = vrot.lane.b32.xlu1 %v2612_v51, %s9954_s20  ;;  %2872 = vrot.lane.b32.xlu0 %v2616_v30, %s9954_s20 }
 0xf05   :  { %v2614_v21 = vpop.permute.xlu0 %2613  ;;  %v2569_v14 = vpop.permute.xlu1 %2568 }
 0xf06   :  { %2796 = vrot.lane.b32.xlu1 %v2614_v21, %s9954_s20  ;;  %v2573_v58 = vadd.f32 %v2569_v14, %v2553_v24 }
 0xf09   :  { %v2619_v12 = vpop.permute.xlu0 %2618  ;;  %v2623_v5 = vpop.permute.xlu1 %2622 }
 0xf0a   :  { %3024 = vrot.lane.b32.xlu0 %v2619_v12, %s9954_s20  ;;  %2604 = vrot.lane.b32.xlu1 %v2573_v58, %s9952_s13 }
 0xf0d   :  { %v2621_v8 = vpop.permute.xlu0 %2620  ;;  %v2600_v10 = vpop.permute.xlu1 %2599 }
 0xf0e   :  { %3100 = vrot.lane.b32.xlu0 %v2621_v8, %s9954_s20  ;;  %3176 = vrot.lane.b32.xlu1 %v2623_v5, %s9954_s20 }
 0xf11   :  { %v2598_v18 = vpop.permute.xlu0 %2597  ;;  %v2949_v33 = vpop.permute.xlu1 %2948 }
 0xf12   :  { %2606 = vrot.lane.b32.xlu0 %v2573_v58, %s9948_s19  ;;  %2608 = vrot.lane.b32.xlu1 %v2573_v58, %s9958_s24 }
 0xf15   :  { %v2602_v25 = vpop.permute.xlu0 %2601 }
 0xf19   :  { %v2645_v27 = vpop.permute.xlu0 %2644 }
 0xf1a   :  { %9028 = vmatpush3.xpose.msk.msra.mxu0 %vm1783_vm3, %v2645_v27 }
 0xf1b   :  { %9037 = vmatprep.subr.mxu0 %v9947_v0 }
 0xf1d   :  { %9030 = vmatmul.mubr.msk.f32.vlgmr.msra.gmra.mxu0 %vm1783_vm3, %v2572_v56 }
 0xf1e   :  { %9039 = vmatprep.mubr.msk.f32.mxu0 %vm9953_vm1, %v9947_v0 }
 0xf74   :  { %v2721_v32 = vpop.permute.xlu1 %2720  ;;  %v2873_v36 = vpop.permute.xlu0 %2872 }
 0xf75   :  { %9033 = vmatpush3.xpose.msk.msra.mxu1 %vm1783_vm3, %v2721_v32 }
 0xf76   :  { %9042 = vmatprep.subr.mxu1 %v9947_v0 }
 0xf78   :  { %9035 = vmatmul.mubr.msk.f32.vlgmr.msra.gmra.mxu1 %vm1783_vm3, %v2598_v18  ;;  %v2797_v16 = vpop.permute.xlu1 %2796 }
 0xf79   :  { %9038 = vmatpush3.xpose.msk.msra.mxu0 %vm1783_vm3, %v2797_v16  ;;  %9043 = vmatpush3.xpose.msk.msra.mxu1 %vm1783_vm3, %v2873_v36 }
 0xf7a   :  { %9044 = vmatprep.mubr.msk.f32.mxu1 %vm9953_vm1, %v9947_v0  ;;  %9047 = vmatprep.subr.mxu0 %v9947_v0 }
 0xf7b   :  { %9052 = vmatprep.subr.mxu1 %v9947_v0 }
 0xf7c   :  { %v3025_v37 = vpop.permute.xlu0 %3024  ;;  %9040 = vmatmul.mubr.msk.f32.vlgmr.msra.gmra.mxu0 %vm1783_vm3, %v2600_v10  ;;  %9045 = vmatmul.mubr.msk.f32.vlgmr.msra.gmra.mxu1 %vm1783_vm3, %v2602_v25  ;;  %v2605_v38 = vpop.permute.xlu1 %2604 }
 0xf7d   :  { %9048 = vmatpush3.xpose.msk.msra.mxu0 %vm1783_vm3, %v2949_v33  ;;  %9053 = vmatpush3.xpose.msk.msra.mxu1 %vm1783_vm3, %v3025_v37 }
 0xf7e   :  { %9049 = vmatprep.mubr.msk.f32.mxu0 %vm9953_vm1, %v9947_v0  ;;  %9054 = vmatprep.mubr.msk.f32.mxu1 %vm9953_vm1, %v9947_v0 }
 0xf7f   :  { %9057 = vmatprep.subr.mxu0 %v9947_v0  ;;  %9062 = vmatprep.subr.mxu1 %v9947_v0 }
 0xf80   :  { %v3101_v41 = vpop.permute.xlu0 %3100  ;;  %9050 = vmatmul.mubr.msk.f32.vlgmr.msra.gmra.mxu0 %vm1783_vm3, %v2573_v58  ;;  %9055 = vmatmul.mubr.msk.f32.vlgmr.msra.gmra.mxu1 %vm1783_vm3, %v2605_v38  ;;  %v3177_v42 = vpop.permute.xlu1 %3176 }
 0xf81   :  { %9058 = vmatpush3.xpose.msk.msra.mxu0 %vm1783_vm3, %v3101_v41  ;;  %9063 = vmatpush3.xpose.msk.msra.mxu1 %vm1783_vm3, %v3177_v42 }
 0xf82   :  { %9059 = vmatprep.mubr.msk.f32.mxu0 %vm9953_vm1, %v9947_v0  ;;  %9064 = vmatprep.mubr.msk.f32.mxu1 %vm9953_vm1, %v9947_v0 }
 0xf83   :  { %9067 = vmatprep.subr.mxu0 %v9947_v0  ;;  %9072 = vmatprep.subr.mxu1 %v9947_v0 }
 0xf84   :  { %v2607_v44 = vpop.permute.xlu0 %2606  ;;  %v2609_v45 = vpop.permute.xlu1 %2608 }
 0xf85   :  { %9060 = vmatmul.mubr.msk.f32.vlgmr.msra.gmra.mxu0 %vm1783_vm3, %v2607_v44  ;;  %9065 = vmatmul.mubr.msk.f32.vlgmr.msra.gmra.mxu1 %vm1783_vm3, %v2609_v45 }
 0xf86   :  { %9068 = vmatpush3.msra.mxu0 %v10649_v31  ;;  %9069 = vmatprep.mubr.msk.f32.mxu0 %vm9953_vm1, %v9947_v0 }
 0xf87   :  { %9077 = vmatprep.subr.mxu0 %v9947_v0  ;;  %9074 = vmatprep.mubr.msk.f32.mxu1 %vm9953_vm1, %v9947_v0 }
 0xfdd   :  { %v2716_v22 = vpop.f32.mrf.mxu0 }
 0xfde   :  { %v3252_v47 = vsel %vm467_vm2, %v2716_v22, -inf }
 0xfdf   :  { %v9031_v26 = vpop.f32.mrf.mxu0  ;;  %3253 = vmax.xlane.f32.xlu0 %v3252_v47 }
0x1038   :  { %v2792_v49 = vpop.f32.mrf.mxu1 }
0x1039   :  { %v3255_v50 = vsel %vm467_vm2, %v2792_v49, -inf }
0x103a   :  { %3256 = vmax.xlane.f32.xlu1 %v3255_v50  ;;  %v9036_v52 = vpop.f32.mrf.mxu1 }
0x103c   :  { %v2868_v53 = vpop.f32.mrf.mxu0  ;;  %v2944_v54 = vpop.f32.mrf.mxu1 }
0x103d   :  { %v3258_v55 = vsel %vm467_vm2, %v2868_v53, -inf  ;;  %v3261_v14 = vsel %vm467_vm2, %v2944_v54, -inf }
0x103e   :  { %v9046_v56 = vpop.f32.mrf.mxu1  ;;  %3259 = vmax.xlane.f32.xlu0 %v3258_v55  ;;  %v9041_v51 = vpop.f32.mrf.mxu0 }
0x1040   :  { %v3020_v30 = vpop.f32.mrf.mxu0  ;;  %v3096_v21 = vpop.f32.mrf.mxu1 }
0x1041   :  { %v3264_v24 = vsel %vm467_vm2, %v3020_v30, -inf  ;;  %v3267_v18 = vsel %vm467_vm2, %v3096_v21, -inf }
0x1042   :  { %3262 = vmax.xlane.f32.xlu0 %v3261_v14  ;;  %3265 = vmax.xlane.f32.xlu1 %v3264_v24  ;;  %v9051_v58 = vpop.f32.mrf.mxu0  ;;  %v9056_v12 = vpop.f32.mrf.mxu1 }
0x1045   :  { %v3172_v5 = vpop.f32.mrf.mxu0  ;;  %v3248_v8 = vpop.f32.mrf.mxu1 }
0x1046   :  { %3268 = vmax.xlane.f32.xlu0 %v3267_v18  ;;  %v3270_v25 = vsel %vm467_vm2, %v3172_v5, -inf  ;;  %v3273_v33 = vsel %vm467_vm2, %v3248_v8, -inf }
0x1047   :  { %3271 = vmax.xlane.f32.xlu1 %v3270_v25  ;;  %v9061_v27 = vpop.f32.mrf.mxu0  ;;  %v9066_v10 = vpop.f32.mrf.mxu1 }
0x104a   :  { %3274 = vmax.xlane.f32.xlu0 %v3273_v33 }
0x1058   :  { %2625 = vrot.lane.b32.xlu1 %v10649_v31, %s9952_s13 }
0x105c   :  { %2631 = vrot.lane.b32.xlu1 %v10649_v31, %s9958_s24 }
0x1060   :  { %2635 = vrot.lane.b32.xlu1 %v10670_v46, %s9952_s13  ;;  %2628 = vrot.lane.b32.xlu0 %v10649_v31, %s9948_s19 }
0x1068   :  { %v3254_v32 = vpop.xlane.xlu0 %3253 }
0x1069   :  { %v3276_v36 = vsub.f32 %v2716_v22, %v3254_v32 }
0x106b   :  { %v3284_v16 = vmul.f32 1.442695, %v3276_v36 }
0x106d   :  { %9593 = vpow2.f32 %v3284_v16 }
0x107a   :  { %v9594_v37 = vpop.eup %9593 }
0x107b   :  { %v3300_v38 = vsel %vm467_vm2, %v9594_v37, 0.0 }
0x1084   :  { %3301 = vadd.xlane.f32.xlu1 %v3300_v38 }
0x10c3   :  { %v3257_v41 = vpop.xlane.xlu1 %3256 }
0x10c4   :  { %v3277_v42 = vsub.f32 %v2792_v49, %v3257_v41 }
0x10c6   :  { %v3286_v44 = vmul.f32 1.442695, %v3277_v42 }
0x10c7   :  { %v3260_v45 = vpop.xlane.xlu0 %3259 }
0x10c8   :  { %9595 = vpow2.f32 %v3286_v44  ;;  %v3278_v47 = vsub.f32 %v2868_v53, %v3260_v45 }
0x10ca   :  { %v3288_v26 = vmul.f32 1.442695, %v3278_v47 }
0x10cb   :  { %v3263_v50 = vpop.xlane.xlu0 %3262  ;;  %v3266_v52 = vpop.xlane.xlu1 %3265 }
0x10cc   :  { %9597 = vpow2.f32 %v3288_v26  ;;  %v3279_v55 = vsub.f32 %v2944_v54, %v3263_v50  ;;  %v3280_v31 = vsub.f32 %v3020_v30, %v3266_v52 }
0x10ce   :  { %v3290_v56 = vmul.f32 1.442695, %v3279_v55  ;;  %v3292_v22 = vmul.f32 1.442695, %v3280_v31 }
0x10cf   :  { %v3269_v51 = vpop.xlane.xlu0 %3268 }
0x10d0   :  { %9599 = vpow2.f32 %v3290_v56  ;;  %v3281_v14 = vsub.f32 %v3096_v21, %v3269_v51  ;;  %v3272_v24 = vpop.xlane.xlu1 %3271 }
0x10d1   :  { %9601 = vpow2.f32 %v3292_v22  ;;  %v3282_v58 = vsub.f32 %v3172_v5, %v3272_v24 }
0x10d2   :  { %v3294_v12 = vmul.f32 1.442695, %v3281_v14 }
0x10d3   :  { %v3296_v49 = vmul.f32 1.442695, %v3282_v58  ;;  %v3275_v18 = vpop.xlane.xlu0 %3274 }
0x10d4   :  { %9603 = vpow2.f32 %v3294_v12  ;;  %v3283_v25 = vsub.f32 %v3248_v8, %v3275_v18  ;;  %v2626_v53 = vpop.permute.xlu1 %2625 }
0x10d5   :  { %v9596_v27 = vpop.eup %9595  ;;  %9605 = vpow2.f32 %v3296_v49  ;;  %9073 = vmatpush3.msra.mxu1 %v2626_v53 }
0x10d6   :  { %v3298_v10 = vmul.f32 1.442695, %v3283_v25  ;;  %v3303_v54 = vsel %vm467_vm2, %v9596_v27, 0.0  ;;  %9082 = vmatprep.subr.mxu1 %v9947_v0 }
0x10d7   :  { %3304 = vadd.xlane.f32.xlu0 %v3303_v54  ;;  %v2629_v55 = vpop.permute.xlu0 %2628 }
0x10d8   :  { %9607 = vpow2.f32 %v3298_v10  ;;  %v2632_v45 = vpop.permute.xlu1 %2631 }
0x10d9   :  { %v9598_v30 = vpop.eup %9597 }
0x10da   :  { %v3306_v21 = vsel %vm467_vm2, %v9598_v30, 0.0 }
0x10db   :  { %3307 = vadd.xlane.f32.xlu1 %v3306_v21 }
0x10dc   :  { %v2636_v47 = vpop.permute.xlu1 %2635 }
0x10dd   :  { %v9600_v5 = vpop.eup %9599 }
0x10de   :  { %v9602_v33 = vpop.eup %9601  ;;  %v3309_v32 = vsel %vm467_vm2, %v9600_v5, 0.0 }
0x10df   :  { %3310 = vadd.xlane.f32.xlu0 %v3309_v32  ;;  %v3312_v8 = vsel %vm467_vm2, %v9602_v33, 0.0 }
0x10e0   :  { %3313 = vadd.xlane.f32.xlu1 %v3312_v8 }
0x10e1   :  { %v9604_v36 = vpop.eup %9603 }
0x10e2   :  { %v9606_v16 = vpop.eup %9605  ;;  %v3315_v38 = vsel %vm467_vm2, %v9604_v36, 0.0 }
0x10e3   :  { %3316 = vadd.xlane.f32.xlu0 %v3315_v38  ;;  %v3318_v41 = vsel %vm467_vm2, %v9606_v16, 0.0 }
0x10e4   :  { %3319 = vadd.xlane.f32.xlu1 %v3318_v41  ;;  %v3962_v41 = vld [vmem:[%s11556_s26 + $0x38] sm:$0xff] }
0x10e5   :  { %v10767_v42 = vpop.eup %9607 }
0x10e6   :  { %v3321_v44 = vsel %vm467_vm2, %v10767_v42, 0.0 }
0x10e7   :  { %3322 = vadd.xlane.f32.xlu0 %v3321_v44  ;;  %v3960_v44 = vld [vmem:[%s11556_s26 + $0x28] sm:$0xff] }
0x10f5   :  { %2641 = vrot.lane.b32.xlu1 %v10670_v46, %s9958_s24 }
0x10fd   :  { %2638 = vrot.lane.b32.xlu0 %v10670_v46, %s9948_s19 }
0x110d   :  { %v3302_v26 = vpop.xlane.xlu1 %3301 }
0x110e   :  { %9609 = vrcp.f32 %v3302_v26  ;;  %v3957_v26 = vld [vmem:[%s11556_s26 + $0x10] sm:$0xff] }
0x111b   :  { %v9610_v50 = vpop.eup %9609 }
0x111c   :  { %v3332_v52 = vmul.f32 %v9610_v50, %v9594_v37  ;;  %v3956_v50 = vld [vmem:[%s11556_s26 + $0x8] sm:$0xff] }
0x111e   :  { %9070 = vmatmul.mubr.msk.f32.vlgmr.msra.gmra.mxu0 %vm467_vm2, %v3332_v52 }
0x111f   :  { %9078 = vmatpush3.msra.mxu0 %v2629_v55  ;;  %9079 = vmatprep.mubr.msk.f32.mxu0 %vm9953_vm1, %v9947_v0 }
0x1120   :  { %9087 = vmatprep.subr.mxu0 %v9947_v0 }
0x1160   :  { %v3305_v31 = vpop.xlane.xlu0 %3304 }
0x1161   :  { %9611 = vrcp.f32 %v3305_v31  ;;  %v3955_v31 = vld [vmem:[%s11556_s26] sm:$0xff] }
0x1164   :  { %v3308_v56 = vpop.xlane.xlu1 %3307 }
0x1165   :  { %9613 = vrcp.f32 %v3308_v56 }
0x1168   :  { %v3311_v22 = vpop.xlane.xlu0 %3310 }
0x1169   :  { %9615 = vrcp.f32 %v3311_v22  ;;  %v3314_v51 = vpop.xlane.xlu1 %3313 }
0x116a   :  { %9617 = vrcp.f32 %v3314_v51 }
0x116c   :  { %v3317_v14 = vpop.xlane.xlu0 %3316 }
0x116d   :  { %9619 = vrcp.f32 %v3317_v14  ;;  %v3320_v37 = vpop.xlane.xlu1 %3319 }
0x116e   :  { %v9612_v24 = vpop.eup %9611  ;;  %9621 = vrcp.f32 %v3320_v37 }
0x116f   :  { %v3333_v58 = vmul.f32 %v9612_v24, %v9596_v27 }
0x1170   :  { %v3323_v12 = vpop.xlane.xlu0 %3322 }
0x1171   :  { %9623 = vrcp.f32 %v3323_v12  ;;  %9075 = vmatmul.mubr.msk.f32.vlgmr.msra.gmra.mxu1 %vm467_vm2, %v3333_v58 }
0x1172   :  { %v9614_v49 = vpop.eup %9613  ;;  %9083 = vmatpush3.msra.mxu1 %v2632_v45  ;;  %9084 = vmatprep.mubr.msk.f32.mxu1 %vm9953_vm1, %v9947_v0  ;;  %v3959_v45 = vld [vmem:[%s11556_s26 + $0x20] sm:$0xff] }
0x1173   :  { %v3334_v18 = vmul.f32 %v9614_v49, %v9598_v30  ;;  %9092 = vmatprep.subr.mxu1 %v9947_v0 }
0x1174   :  { %v2639_v21 = vpop.permute.xlu0 %2638 }
0x1175   :  { %9080 = vmatmul.mubr.msk.f32.vlgmr.msra.gmra.mxu0 %vm467_vm2, %v3334_v18 }
0x1176   :  { %v9616_v25 = vpop.eup %9615  ;;  %9088 = vmatpush3.msra.mxu0 %v10670_v46  ;;  %9089 = vmatprep.mubr.msk.f32.mxu0 %vm9953_vm1, %v9947_v0 }
0x1177   :  { %v9618_v53 = vpop.eup %9617  ;;  %9097 = vmatprep.subr.mxu0 %v9947_v0  ;;  %v3335_v27 = vmul.f32 %v9616_v25, %v9600_v5 }
0x1178   :  { %v3336_v10 = vmul.f32 %v9618_v53, %v9602_v33  ;;  %v2642_v33 = vpop.permute.xlu1 %2641 }
0x1179   :  { %9085 = vmatmul.mubr.msk.f32.vlgmr.msra.gmra.mxu1 %vm467_vm2, %v3335_v27 }
0x117a   :  { %v9620_v54 = vpop.eup %9619  ;;  %9090 = vmatmul.mubr.msk.f32.vlgmr.msra.gmra.mxu0 %vm467_vm2, %v3336_v10  ;;  %9093 = vmatpush3.msra.mxu1 %v2636_v47  ;;  %v3958_v47 = vld [vmem:[%s11556_s26 + $0x18] sm:$0xff] }
0x117b   :  { %v9622_v30 = vpop.eup %9621  ;;  %9098 = vmatpush3.msra.mxu0 %v2639_v21  ;;  %9094 = vmatprep.mubr.msk.f32.mxu1 %vm9953_vm1, %v9947_v0  ;;  %v3337_v46 = vmul.f32 %v9620_v54, %v9604_v36 }
0x117c   :  { %9102 = vmatprep.subr.mxu1 %v9947_v0  ;;  %9099 = vmatprep.mubr.msk.f32.mxu0 %vm9953_vm1, %v9947_v0  ;;  %v3338_v5 = vmul.f32 %v9622_v30, %v9606_v16  ;;  %v3961_v16 = vld [vmem:[%s11556_s26 + $0x30] sm:$0xff] }
0x117d   :  { %9095 = vmatmul.mubr.msk.f32.vlgmr.msra.gmra.mxu1 %vm467_vm2, %v3337_v46  ;;  %9107 = vmatprep.subr.mxu0 %v3962_v41 }
0x117e   :  { %v9624_v32 = vpop.eup %9623  ;;  %9103 = vmatpush3.msra.mxu1 %v2642_v33  ;;  %9100 = vmatmul.mubr.msk.f32.vlgmr.msra.gmra.mxu0 %vm467_vm2, %v3338_v5 }
0x117f   :  { %9104 = vmatprep.mubr.msk.f32.mxu1 %vm9953_vm1, %v9947_v0  ;;  %v3339_v8 = vmul.f32 %v9624_v32, %v10767_v42  ;;  %9108 = vmatpush3.msra.mxu0 %v3962_v41  ;;  %v8510_v41 = vld [vmem:[%s11557_s1] ss:$0 sm:$0xff] }
0x1180   :  { %9109 = vmatprep.subr.mxu0 %v3961_v16 }
0x1181   :  { %9105 = vmatmul.mubr.msk.f32.vlgmr.msra.gmra.mxu1 %vm467_vm2, %v3339_v8  ;;  %9110 = vmatpush3.msra.mxu0 %v3961_v16 }
0x1182   :  { %9111 = vmatprep.subr.mxu0 %v3960_v44 }
0x1183   :  { %9112 = vmatpush3.msra.mxu0 %v3960_v44 }
0x1184   :  { %9113 = vmatprep.subr.mxu0 %v3959_v45 }
0x1185   :  { %9114 = vmatpush3.msra.mxu0 %v3959_v45 }
0x1186   :  { %9115 = vmatprep.subr.mxu0 %v3958_v47 }
0x1187   :  { %9116 = vmatpush3.msra.mxu0 %v3958_v47 }
0x1188   :  { %9117 = vmatprep.subr.mxu0 %v3957_v26 }
0x1189   :  { %9118 = vmatpush3.msra.mxu0 %v3957_v26 }
0x118a   :  { %9119 = vmatprep.subr.mxu0 %v3956_v50 }
0x118b   :  { %9120 = vmatpush3.msra.mxu0 %v3956_v50 }
0x118c   :  { %9121 = vmatprep.subr.mxu0 %v3955_v31 }
0x118d   :  { %9122 = vmatpush3.msra.mxu0 %v3955_v31 }
0x11de   :  { %v3409_v36 = vpop.f32.mrf.mxu0 }
0x11e0   :  { %v9071_v38 = vpop.f32.mrf.mxu0 }
0x1231   :  { %v3482_v42 = vpop.f32.mrf.mxu1 }
0x1232   :  { %3925 = vrot.lane.b32.xlu0 %v3482_v42, %s9955_s2 }
0x1233   :  { %v9076_v52 = vpop.f32.mrf.mxu1 }
0x1235   :  { %v3555_v55 = vpop.f32.mrf.mxu0 }
0x1236   :  { %3929 = vrot.lane.b32.xlu1 %v3555_v55, %s9949_s30 }
0x1237   :  { %v9081_v56 = vpop.f32.mrf.mxu0 }
0x1239   :  { %v3628_v22 = vpop.f32.mrf.mxu1 }
0x123a   :  { %v3701_v51 = vpop.f32.mrf.mxu0  ;;  %3933 = vrot.lane.b32.xlu1 %v3628_v22, %s9959_s28 }
0x123b   :  { %v9086_v14 = vpop.f32.mrf.mxu1 }
0x123c   :  { %v9091_v37 = vpop.f32.mrf.mxu0 }
0x123d   :  { %v3774_v24 = vpop.f32.mrf.mxu1 }
0x123e   :  { %3941 = vrot.lane.b32.xlu0 %v3774_v24, %s9955_s2  ;;  %v3847_v58 = vpop.f32.mrf.mxu0  ;;  %v10831_v24 = vld [vmem:[%s11558_s17 + $0x38] sm:$0xff] }
0x123f   :  { %v9096_v12 = vpop.f32.mrf.mxu1  ;;  %9126 = vmatprep.subr.mxu1 %v10831_v24 }
0x1240   :  { %v9101_v49 = vpop.f32.mrf.mxu0  ;;  %9127 = vmatpush3.msra.mxu1 %v10831_v24  ;;  %v10839_v12 = vld [vmem:[%s11558_s17 + $0x28] sm:$0xff] }
0x1241   :  { %v3920_v18 = vpop.f32.mrf.mxu1  ;;  %v10844_v49 = vld [vmem:[%s11558_s17 + $0x20] sm:$0xff] }
0x1242   :  { %3945 = vrot.lane.b32.xlu0 %v3847_v58, %s9949_s30  ;;  %3949 = vrot.lane.b32.xlu1 %v3920_v18, %s9959_s28  ;;  %v10834_v58 = vld [vmem:[%s11558_s17 + $0x30] sm:$0xff]  ;;  %v10849_v18 = vld [vmem:[%s11558_s17 + $0x18] sm:$0xff] }
0x1243   :  { %v9106_v25 = vpop.f32.mrf.mxu1  ;;  %9128 = vmatprep.subr.mxu1 %v10834_v58 }
0x1244   :  { %9129 = vmatpush3.msra.mxu1 %v10834_v58  ;;  %v10854_v25 = vld [vmem:[%s11558_s17 + $0x10] sm:$0xff] }
0x1245   :  { %9130 = vmatprep.subr.mxu1 %v10839_v12 }
0x1246   :  { %9131 = vmatpush3.msra.mxu1 %v10839_v12 }
0x1247   :  { %9132 = vmatprep.subr.mxu1 %v10844_v49 }
0x1248   :  { %9133 = vmatpush3.msra.mxu1 %v10844_v49 }
0x1249   :  { %9134 = vmatprep.subr.mxu1 %v10849_v18 }
0x124a   :  { %9135 = vmatpush3.msra.mxu1 %v10849_v18 }
0x124b   :  { %9136 = vmatprep.subr.mxu1 %v10854_v25 }
0x124c   :  { %9137 = vmatpush3.msra.mxu1 %v10854_v25 }
0x12a4   :  { %v3926_v53 = vpop.permute.xlu0 %3925 }
0x12a5   :  { %v3936_v10 = vsel %vm1783_vm3, %v3409_v36, %v3926_v53  ;;  %v10859_v53 = vld [vmem:[%s11558_s17 + $0x8] sm:$0xff] }
0x12a6   :  { %9138 = vmatprep.subr.mxu1 %v10859_v53 }
0x12a7   :  { %9139 = vmatpush3.msra.mxu1 %v10859_v53 }
0x12a8   :  { %v3930_v27 = vpop.permute.xlu1 %3929 }
0x12a9   :  { %v3937_v54 = vsel %vm295_vm0, %v3936_v10, %v3930_v27  ;;  %v10866_v27 = vld [vmem:[%s11558_s17] sm:$0xff] }
0x12aa   :  { %9140 = vmatprep.subr.mxu1 %v10866_v27 }
0x12ab   :  { %9141 = vmatpush3.msra.mxu1 %v10866_v27 }
0x12ac   :  { %v3934_v21 = vpop.permute.xlu1 %3933  ;;  %4375 = vmatprep.subr.mxu1 %v10534_v57 }
0x12ad   :  { %v3939_v30 = vsel %vm3938_vm6, %v3937_v54, %v3934_v21 }
0x12ae   :  { %9123 = vmatprep.mubr.msk.f32.mxu0 %vm2066_vm5, %v3939_v30 }
0x12b0   :  { %v3942_v46 = vpop.permute.xlu0 %3941 }
0x12b1   :  { %v3952_v5 = vsel %vm1783_vm3, %v3701_v51, %v3942_v46 }
0x12b4   :  { %v3946_v33 = vpop.permute.xlu0 %3945  ;;  %v3950_v32 = vpop.permute.xlu1 %3949 }
0x12b5   :  { %v3953_v8 = vsel %vm295_vm0, %v3952_v5, %v3946_v33 }
0x12b6   :  { %v3954_v38 = vsel %vm3938_vm6, %v3953_v8, %v3950_v32  ;;  %v8513_v32 = vld [vmem:[%s11559_s21] ss:$0 sm:$0xff] }
0x12b7   :  { %9124 = vmatmul.mubr.msk.f32.vlgmr.msra.gmra.mxu0 %vm2066_vm5, %v3954_v38  ;;  %v8514_v38 = vld [vmem:[%s11560_s25] ss:$0 sm:$0xff] }
0x1377   :  { %v9125_v36 = vpop.f32.mrf.mxu0 }
0x1378   :  { %v4048_v16 = vadd.f32 %v9125_v36, %v8510_v41 }
0x1379   :  { %v4042_v44 = vpop.f32.mrf.mxu0 }
0x137a   :  { %v4052_v45 = vadd.f32 %v4048_v16, %v10624_v61  ;;  %v4043_v47 = vadd.f32 %v8510_v41, %v4042_v44 }
0x137c   :  { %v4051_v42 = vadd.f32 %v4043_v47, %v10622_v59  ;;  %v4058_v26 = vsel %vm2066_vm5, %v4052_v45, 0.0  ;;  %v9733_v47 = vld [vmem:[%s11550_s15 + $0xa8] sm:$0xff] }
0x137d   :  { %4059 = vadd.xlane.f32.xlu1 %v4058_v26  ;;  %v9735_v26 = vld [vmem:[%s11550_s15 + $0x90] sm:$0xff] }
0x137e   :  { %v4055_v50 = vsel %vm2066_vm5, %v4051_v42, 0.0 }
0x137f   :  { %4056 = vadd.xlane.f32.xlu0 %v4055_v50 }
0x1406   :  { %v4060_v52 = vpop.xlane.xlu1 %4059 }
0x1407   :  { %v4062_v55 = vmul.f32 0.015625, %v4060_v52 }
0x1408   :  { %v4057_v31 = vpop.xlane.xlu0 %4056 }
0x1409   :  { %v4061_v56 = vmul.f32 0.015625, %v4057_v31  ;;  %v4064_v22 = vsub.f32 %v4052_v45, %v4062_v55 }
0x140b   :  { %v4063_v51 = vsub.f32 %v4051_v42, %v4061_v56  ;;  %v4066_v14 = vmul.f32 %v4064_v22, %v4064_v22  ;;  %v9734_v42 = vld [vmem:[%s11550_s15 + $0x98] sm:$0xff] }
0x140d   :  { %v4065_v61 = vmul.f32 %v4063_v51, %v4063_v51  ;;  %v4070_v37 = vsel %vm2066_vm5, %v4066_v14, 0.0 }
0x140f   :  { %v4067_v59 = vsel %vm2066_vm5, %v4065_v61, 0.0 }
0x1410   :  { %4068 = vadd.xlane.f32.xlu0 %v4067_v59 }
0x1414   :  { %4071 = vadd.xlane.f32.xlu0 %v4070_v37 }
0x1499   :  { %v4069_v10 = vpop.xlane.xlu0 %4068 }
0x149a   :  { %v4073_v54 = vmul.f32 0.015625, %v4069_v10 }
0x149c   :  { %v4075_v21 = vadd.f32 1e-05, %v4073_v54 }
0x149d   :  { %v4072_v30 = vpop.xlane.xlu0 %4071 }
0x149e   :  { %9625 = vrsqrt.f32 %v4075_v21  ;;  %v4074_v46 = vmul.f32 0.015625, %v4072_v30 }
0x14a0   :  { %v4076_v5 = vadd.f32 1e-05, %v4074_v46 }
0x14a2   :  { %9627 = vrsqrt.f32 %v4076_v5 }
0x14ab   :  { %v9626_v33 = vpop.eup %9625 }
0x14ac   :  { %v4079_v8 = vmul.f32 %v9626_v33, %v4063_v51 }
0x14ae   :  { %v4087_v41 = vmul.f32 %v8513_v32, %v4079_v8 }
0x14af   :  { %v9628_v36 = vpop.eup %9627 }
0x14b0   :  { %v10873_v16 = vadd.f32 %v8514_v38, %v4087_v41  ;;  %v4080_v57 = vmul.f32 %v9628_v36, %v4064_v22  ;;  %v9738_v41 = vld [vmem:[%s11550_s15 + $0x88] sm:$0xff]  ;;  %v9739_v36 = vld [vmem:[%s11550_s15 + $0x70] sm:$0xff] }
0x14b2   :  { %9142 = vmatprep.mubr.msk.f32.mxu1 %vm2066_vm5, %v10873_v16  ;;  %v4088_v44 = vmul.f32 %v8513_v32, %v4080_v57  ;;  %v9740_v57 = vld [vmem:[%s11550_s15 + $0x58] sm:$0xff] }
0x14b4   :  { %v10877_v45 = vadd.f32 %v8514_v38, %v4088_v44  ;;  %v9737_v38 = vld [vmem:[%s11550_s15 + $0xa0] sm:$0xff] }
0x14b5   :  { %v9741_v44 = vld [vmem:[%s11550_s15 + $0x40] sm:$0xff] }
0x14b6   :  { %9143 = vmatmul.mubr.msk.f32.vlgmr.msra.gmra.mxu1 %vm2066_vm5, %v10877_v45 }
0x14b7   :  { %4376 = vmatpush1.msra.mxu1 %v9733_v47  ;;  %4423 = vmatprep.mubr.f32.mxu1 %v9947_v0  ;;  %v9742_v47 = vld [vmem:[%s11550_s15 + $0x28] sm:$0xff] }
0x14b8   :  { %4377 = vmatprep.subr.mxu1 %v9734_v42  ;;  %v9743_v42 = vld [vmem:[%s11550_s15 + $0x10] sm:$0xff] }
0x14b9   :  { %4378 = vmatpush1.msra.mxu1 %v9735_v26  ;;  %v10955_v26 = vld [vmem:[%s11563_s10] ss:$0 sm:$0xff] }
0x14ba   :  { %4379 = vmatprep.subr.mxu1 %v10543_v60  ;;  %v10899_v60 = vld [vmem:[%s11561_s29 + $0x38] sm:$0xff] }
0x14bb   :  { %4380 = vmatpush1.msra.mxu1 %v10547_v62  ;;  %v10902_v62 = vld [vmem:[%s11561_s29 + $0x30] sm:$0xff]  ;;  %9145 = vmatprep.subr.mxu0 %v10899_v60 }
0x14bc   :  { %4381 = vmatprep.subr.mxu1 %v10550_v1  ;;  %9146 = vmatpush3.msra.mxu0 %v10899_v60  ;;  %v10907_v1 = vld [vmem:[%s11561_s29 + $0x28] sm:$0xff] }
0x14bd   :  { %4382 = vmatpush1.msra.mxu1 %v10555_v2  ;;  %9147 = vmatprep.subr.mxu0 %v10902_v62  ;;  %v10912_v2 = vld [vmem:[%s11561_s29 + $0x20] sm:$0xff] }
0x14be   :  { %4383 = vmatprep.subr.mxu1 %v10559_v3  ;;  %9148 = vmatpush3.msra.mxu0 %v10902_v62  ;;  %v10917_v3 = vld [vmem:[%s11561_s29 + $0x18] sm:$0xff] }
0x14bf   :  { %4384 = vmatpush1.msra.mxu1 %v10564_v6  ;;  %9149 = vmatprep.subr.mxu0 %v10907_v1  ;;  %v10922_v6 = vld [vmem:[%s11561_s29 + $0x10] sm:$0xff] }
0x14c0   :  { %4385 = vmatprep.subr.mxu1 %v10568_v7  ;;  %9150 = vmatpush3.msra.mxu0 %v10907_v1  ;;  %v10927_v7 = vld [vmem:[%s11561_s29 + $0x8] sm:$0xff] }
0x14c1   :  { %4386 = vmatpush1.msra.mxu1 %v10573_v9  ;;  %9151 = vmatprep.subr.mxu0 %v10912_v2  ;;  %v10932_v9 = vld [vmem:[%s11561_s29] sm:$0xff] }
0x14c2   :  { %4387 = vmatprep.subr.mxu1 %v10577_v4  ;;  %9152 = vmatpush3.msra.mxu0 %v10912_v2  ;;  %v9736_v4 = vld [vmem:[%s11550_s15 + $0xb8] sm:$0xff]  ;;  %s11565_s15 = sld [smem:[#allocation36_spill]] }
0x14c3   :  { %4388 = vmatpush1.msra.mxu1 %v10582_v13  ;;  %9153 = vmatprep.subr.mxu0 %v10917_v3  ;;  %v10940_v13 = vld [vmem:[%s11562_s3] ss:$0 sm:$0xff] }
0x14c4   :  { %4389 = vmatprep.subr.mxu1 %v10586_v15  ;;  %9154 = vmatpush3.msra.mxu0 %v10917_v3 }
0x14c5   :  { %4390 = vmatpush1.msra.mxu1 %v10591_v20  ;;  %9155 = vmatprep.subr.mxu0 %v10922_v6 }
0x14c6   :  { %9183 = vmatprep.subr.mxu1 %v9947_v0  ;;  %9156 = vmatpush3.msra.mxu0 %v10922_v6 }
0x14c7   :  { %9157 = vmatprep.subr.mxu0 %v10927_v7 }
0x14c8   :  { %9158 = vmatpush3.msra.mxu0 %v10927_v7 }
0x14c9   :  { %9159 = vmatprep.subr.mxu0 %v10932_v9 }
0x14ca   :  { %9160 = vmatpush3.msra.mxu0 %v10932_v9 }
0x14cb   :  { %9164 = vmatprep.subr.mxu0 %v9736_v4 }
0x1576   :  { %v9144_v15 = vpop.f32.mrf.mxu1 }
0x1577   :  { %v4190_v20 = vadd.f32 %v9144_v15, %v10940_v13 }
0x1578   :  { %v4184_v50 = vpop.f32.mrf.mxu1 }
0x1579   :  { %v4196_v52 = vmul.f32 0.044715, %v4190_v20  ;;  %v4185_v55 = vadd.f32 %v10940_v13, %v4184_v50  ;;  %v4194_v33 = vmul.f32 0.5, %v4190_v20 }
0x157b   :  { %v4198_v31 = vmul.f32 %v4196_v52, %v4190_v20  ;;  %v4195_v56 = vmul.f32 0.044715, %v4185_v55  ;;  %v4193_v46 = vmul.f32 0.5, %v4185_v55 }
0x157d   :  { %v4200_v22 = vmul.f32 %v4198_v31, %v4190_v20  ;;  %v4197_v51 = vmul.f32 %v4195_v56, %v4185_v55 }
0x157f   :  { %v4202_v61 = vadd.f32 %v4200_v22, %v4190_v20  ;;  %v4199_v59 = vmul.f32 %v4197_v51, %v4185_v55 }
0x1581   :  { %v4204_v14 = vmul.f32 0.7978846, %v4202_v61  ;;  %v4201_v37 = vadd.f32 %v4199_v59, %v4185_v55 }
0x1583   :  { %9629 = vtanh.f32 %v4204_v14  ;;  %v4203_v10 = vmul.f32 0.7978846, %v4201_v37 }
0x1585   :  { %9631 = vtanh.f32 %v4203_v10 }
0x1590   :  { %v9630_v54 = vpop.eup %9629 }
0x1591   :  { %v4208_v30 = vadd.f32 1.0, %v9630_v54 }
0x1592   :  { %v9632_v21 = vpop.eup %9631 }
0x1593   :  { %v4207_v5 = vadd.f32 1.0, %v9632_v21  ;;  %v4210_v8 = vmul.f32 %v4208_v30, %v4194_v33 }
0x1595   :  { %v4209_v32 = vmul.f32 %v4207_v5, %v4193_v46 }
0x1597   :  { %9161 = vmatprep.mubr.msk.f32.mxu0 %vm2066_vm5, %v4209_v32 }
0x1598   :  { %9162 = vmatmul.mubr.msk.f32.vlgmr.msra.gmra.mxu0 %vm2066_vm5, %v4210_v8 }
0x1599   :  { %9165 = vmatpush3.msra.mxu0 %v9736_v4 }
0x159a   :  { %9166 = vmatprep.subr.mxu0 %v9737_v38 }
0x159b   :  { %9167 = vmatpush3.msra.mxu0 %v9737_v38  ;;  %v10966_v38 = vld [vmem:[%s11564_s11] ss:$0 sm:$0xff] }
0x159c   :  { %9168 = vmatprep.subr.mxu0 %v9738_v41 }
0x159d   :  { %9169 = vmatpush3.msra.mxu0 %v9738_v41 }
0x159e   :  { %9170 = vmatprep.subr.mxu0 %v9739_v36 }
0x159f   :  { %9171 = vmatpush3.msra.mxu0 %v9739_v36 }
0x15a0   :  { %9172 = vmatprep.subr.mxu0 %v9740_v57 }
0x15a1   :  { %9173 = vmatpush3.msra.mxu0 %v9740_v57 }
0x15a2   :  { %9174 = vmatprep.subr.mxu0 %v9741_v44 }
0x15a3   :  { %9175 = vmatpush3.msra.mxu0 %v9741_v44 }
0x15a4   :  { %9176 = vmatprep.subr.mxu0 %v9742_v47 }
0x15a5   :  { %9177 = vmatpush3.msra.mxu0 %v9742_v47  ;;  %v10970_v47 = vld [vmem:[%s11565_s15] ss:$0 sm:$0xff] }
0x15a6   :  { %9178 = vmatprep.subr.mxu0 %v9743_v42 }
0x15a7   :  { %9179 = vmatpush3.msra.mxu0 %v9743_v42 }
0x15a8   :  { %9198 = vmatprep.subr.mxu0 %v9947_v0 }
0x1658   :  { %v9163_v4 = vpop.f32.mrf.mxu0 }
0x1659   :  { %v4304_v15 = vadd.f32 %v9163_v4, %v10955_v26 }
0x165a   :  { %v4298_v20 = vpop.f32.mrf.mxu0 }
0x165b   :  { %v4308_v50 = vadd.f32 %v4304_v15, %v10877_v45  ;;  %v4299_v52 = vadd.f32 %v10955_v26, %v4298_v20 }
0x165d   :  { %v4307_v55 = vadd.f32 %v4299_v52, %v10873_v16  ;;  %v4314_v31 = vsel %vm2066_vm5, %v4308_v50, 0.0 }
0x165e   :  { %4315 = vadd.xlane.f32.xlu0 %v4314_v31 }
0x165f   :  { %v4311_v56 = vsel %vm2066_vm5, %v4307_v55, 0.0 }
0x1660   :  { %4312 = vadd.xlane.f32.xlu1 %v4311_v56 }
0x16e7   :  { %v4316_v22 = vpop.xlane.xlu0 %4315 }
0x16e8   :  { %v4318_v51 = vmul.f32 0.015625, %v4316_v22  ;;  %v9745_v22 = vld [vmem:[%s11552_s18] sm:$0xff] }
0x16e9   :  { %v4313_v61 = vpop.xlane.xlu1 %4312 }
0x16ea   :  { %v4320_v59 = vsub.f32 %v4308_v50, %v4318_v51  ;;  %v4317_v14 = vmul.f32 0.015625, %v4313_v61 }
0x16ec   :  { %v4319_v37 = vsub.f32 %v4307_v55, %v4317_v14  ;;  %v4322_v10 = vmul.f32 %v4320_v59, %v4320_v59  ;;  %v9744_v55 = vld [vmem:[%s11552_s18 + $0x8] sm:$0xff]  ;;  %s11567_s18 = sld [smem:[#allocation40_spill]] }
0x16ee   :  { %v4326_v45 = vsel %vm2066_vm5, %v4322_v10, 0.0  ;;  %v4321_v54 = vmul.f32 %v4319_v37, %v4319_v37 }
0x16ef   :  { %4327 = vadd.xlane.f32.xlu0 %v4326_v45 }
0x16f0   :  { %v4323_v16 = vsel %vm2066_vm5, %v4321_v54, 0.0 }
0x16f1   :  { %4324 = vadd.xlane.f32.xlu1 %v4323_v16 }
0x1778   :  { %v4328_v21 = vpop.xlane.xlu0 %4327 }
0x1779   :  { %v4330_v30 = vmul.f32 0.015625, %v4328_v21 }
0x177a   :  { %v4325_v46 = vpop.xlane.xlu1 %4324 }
0x177b   :  { %v4332_v5 = vadd.f32 1e-05, %v4330_v30  ;;  %v4329_v33 = vmul.f32 0.015625, %v4325_v46 }
0x177d   :  { %9633 = vrsqrt.f32 %v4332_v5  ;;  %v4331_v32 = vadd.f32 1e-05, %v4329_v33  ;;  %v9746_v33 = vld [vmem:[%s11551_s16] sm:$0xff] }
0x177f   :  { %9635 = vrsqrt.f32 %v4331_v32 }
0x178a   :  { %v9634_v8 = vpop.eup %9633 }
0x178b   :  { %v4336_v41 = vmul.f32 %v9634_v8, %v4320_v59 }
0x178c   :  { %v9636_v36 = vpop.eup %9635 }
0x178d   :  { %v4335_v57 = vmul.f32 %v9636_v36, %v4319_v37  ;;  %v4344_v44 = vmul.f32 %v10966_v38, %v4336_v41 }
0x178f   :  { %v4343_v42 = vmul.f32 %v10966_v38, %v4335_v57  ;;  %v10977_v15 = vadd.f32 %v10970_v47, %v4344_v44  ;;  %v9747_v57 = vld [vmem:[%s11551_s16 + $0x8] sm:$0xff]  ;;  %s11566_s16 = sld [smem:[#allocation39_spill]] }
0x1791   :  { %v10974_v4 = vadd.f32 %v10970_v47, %v4343_v42 }
0x1793   :  { %8523 = vmatmul.mubr.msk.f32.vlgmr.msra.gmra.mxu1 %vm2066_vm5, %v10974_v4  ;;  %9180 = vmatprep.mubr.msk.f32.mxu0 %vm2066_vm5, %v10974_v4 }
0x1794   :  { %9181 = vmatmul.mubr.msk.f32.vlgmr.msra.gmra.mxu0 %vm2066_vm5, %v10977_v15  ;;  %4429 = vmatprep.mubr.f32.mxu1 %v9947_v0 }
0x1795   :  { %9200 = vmatprep.mubr.msk.f32.mxu0 %vm9953_vm1, %v9947_v0 }
0x1797   :  { %8524 = vmatmul.mubr.msk.f32.gmra.mxu1 %vm2066_vm5, %v10977_v15 }
0x1798   :  { %9185 = vmatprep.mubr.msk.f32.mxu1 %vm9953_vm1, %v9947_v0 }
0x1853   :  { %v4425_v61 = vpop.f32.mrf.mxu1 }
0x1854   :  { %v9182_v20 = vpop.f32.mrf.mxu0  ;;  %v4426_v14 = vadd.f32 %v4425_v61, %v10663_v40 }
0x1855   :  { %v4508_v50 = vadd.f32 %v9182_v20, %v10646_v29  ;;  %v4427_v59 = vpop.f32.mrf.mxu1 }
0x1856   :  { %v4502_v52 = vpop.f32.mrf.mxu0  ;;  %v4525_v10 = vmul.f32 %v4426_v14, %v10639_v63  ;;  %v11002_v16 = vadd.f32 %v4427_v59, %v10644_v11  ;;  %v4511_v32 = vmul.f32 %v9746_v33, %v4426_v14 }
0x1857   :  { %v4528_v31 = vmul.f32 %v9744_v55, %v4508_v50  ;;  %v4503_v56 = vadd.f32 %v4502_v52, %v10646_v29  ;;  %v4431_v37 = vpop.f32.mrf.mxu1 }
0x1858   :  { %v4432_v45 = vadd.f32 %v4431_v37, %v10663_v40  ;;  %v4513_v5 = vmul.f32 %v11002_v16, %v10651_v28 }
0x1859   :  { %v4527_v51 = vmul.f32 %v9745_v22, %v4503_v56  ;;  %4533 = vrot.lane.b32.xlu0 %v4528_v31, %s9954_s20  ;;  %v4433_v63 = vpop.f32.mrf.mxu1 }
0x185a   :  { %v4526_v30 = vmul.f32 %v4432_v45, %v10666_v43  ;;  %v11012_v40 = vadd.f32 %v4433_v63, %v10644_v11  ;;  %v4512_v44 = vmul.f32 %v9747_v57, %v4432_v45 }
0x185b   :  { %4531 = vrot.lane.b32.xlu1 %v4527_v51, %s9954_s20 }
0x185c   :  { %v4514_v43 = vmul.f32 %v11012_v40, %v10672_v48 }
0x18cb   :  { %v4534_v21 = vpop.permute.xlu0 %4533 }
0x18cc   :  { %v4538_v46 = vadd.f32 %v4534_v21, %v4526_v30 }
0x18cd   :  { %v4532_v54 = vpop.permute.xlu1 %4531 }
0x18ce   :  { %v4537_v29 = vadd.f32 %v4532_v54, %v4525_v10 }
0x18d0   :  { %4556 = vrot.lane.b32.xlu0 %v4537_v29, %s9948_s19  ;;  %4554 = vrot.lane.b32.xlu1 %v4537_v29, %s9952_s13 }
0x18d4   :  { %4561 = vrot.lane.b32.xlu0 %v4538_v46, %s9952_s13  ;;  %4517 = vrot.lane.b32.xlu1 %v4513_v5, %s9954_s20 }
0x18d8   :  { %4563 = vrot.lane.b32.xlu0 %v4538_v46, %s9948_s19  ;;  %4558 = vrot.lane.b32.xlu1 %v4537_v29, %s9958_s24 }
0x18dc   :  { %4519 = vrot.lane.b32.xlu1 %v4514_v43, %s9954_s20 }
0x18e0   :  { %4565 = vrot.lane.b32.xlu1 %v4538_v46, %s9958_s24 }
0x1942   :  { %v4555_v28 = vpop.permute.xlu1 %4554  ;;  %v4557_v48 = vpop.permute.xlu0 %4556 }
0x1946   :  { %v4518_v8 = vpop.permute.xlu1 %4517  ;;  %v4562_v42 = vpop.permute.xlu0 %4561 }
0x1947   :  { %v4523_v41 = vadd.f32 %v4518_v8, %v4511_v32 }
0x1949   :  { %4542 = vrot.lane.b32.xlu1 %v4523_v41, %s9948_s19  ;;  %4540 = vrot.lane.b32.xlu0 %v4523_v41, %s9952_s13 }
0x194a   :  { %v4559_v11 = vpop.permute.xlu1 %4558  ;;  %v4564_v50 = vpop.permute.xlu0 %4563 }
0x194d   :  { %4891 = vrot.lane.b32.xlu1 %v4538_v46, %s9954_s20  ;;  %4587 = vrot.lane.b32.xlu0 %v4537_v29, %s9954_s20 }
0x194e   :  { %v4520_v36 = vpop.permute.xlu1 %4519 }
0x194f   :  { %v4524_v20 = vadd.f32 %v4520_v36, %v4512_v44 }
0x1951   :  { %4663 = vrot.lane.b32.xlu1 %v4555_v28, %s9954_s20  ;;  %4544 = vrot.lane.b32.xlu0 %v4523_v41, %s9958_s24 }
0x1952   :  { %v4566_v52 = vpop.permute.xlu1 %4565 }
0x1955   :  { %4739 = vrot.lane.b32.xlu1 %v4557_v48, %s9954_s20  ;;  %4815 = vrot.lane.b32.xlu0 %v4559_v11, %s9954_s20 }
0x1959   :  { %4547 = vrot.lane.b32.xlu1 %v4524_v20, %s9952_s13  ;;  %4967 = vrot.lane.b32.xlu0 %v4562_v42, %s9954_s20 }
0x195d   :  { %5119 = vrot.lane.b32.xlu1 %v4566_v52, %s9954_s20  ;;  %5043 = vrot.lane.b32.xlu0 %v4564_v50, %s9954_s20 }
0x1961   :  { %4551 = vrot.lane.b32.xlu1 %v4524_v20, %s9958_s24  ;;  %4549 = vrot.lane.b32.xlu0 %v4524_v20, %s9948_s19 }
0x19bb   :  { %v4543_v55 = vpop.permute.xlu1 %4542  ;;  %v4541_v31 = vpop.permute.xlu0 %4540 }
0x19bf   :  { %v4892_v56 = vpop.permute.xlu1 %4891  ;;  %v4588_v22 = vpop.permute.xlu0 %4587 }
0x19c0   :  { %9184 = vmatpush3.xpose.msk.msra.mxu1 %vm1783_vm3, %v4588_v22 }
0x19c1   :  { %9188 = vmatprep.subr.mxu1 %v9947_v0 }
0x19c3   :  { %v4664_v51 = vpop.permute.xlu1 %4663  ;;  %9186 = vmatmul.mubr.msk.f32.vlgmr.msra.gmra.mxu1 %vm1783_vm3, %v4523_v41  ;;  %v4545_v61 = vpop.permute.xlu0 %4544 }
0x19c4   :  { %9189 = vmatpush3.xpose.msk.msra.mxu1 %vm1783_vm3, %v4664_v51  ;;  %9190 = vmatprep.mubr.msk.f32.mxu1 %vm9953_vm1, %v9947_v0 }
0x19c5   :  { %9193 = vmatprep.subr.mxu1 %v9947_v0 }
0x19c7   :  { %v4740_v59 = vpop.permute.xlu1 %4739  ;;  %9191 = vmatmul.mubr.msk.f32.vlgmr.msra.gmra.mxu1 %vm1783_vm3, %v4541_v31  ;;  %v4816_v14 = vpop.permute.xlu0 %4815 }
0x19c8   :  { %9194 = vmatpush3.xpose.msk.msra.mxu1 %vm1783_vm3, %v4740_v59  ;;  %9199 = vmatpush3.xpose.msk.msra.mxu0 %vm1783_vm3, %v4816_v14 }
0x19c9   :  { %9195 = vmatprep.mubr.msk.f32.mxu1 %vm9953_vm1, %v9947_v0  ;;  %9203 = vmatprep.subr.mxu1 %v9947_v0 }
0x19ca   :  { %9208 = vmatprep.subr.mxu0 %v9947_v0 }
0x19cb   :  { %v4548_v37 = vpop.permute.xlu1 %4547  ;;  %9196 = vmatmul.mubr.msk.f32.vlgmr.msra.gmra.mxu1 %vm1783_vm3, %v4543_v55  ;;  %9201 = vmatmul.mubr.msk.f32.vlgmr.msra.gmra.mxu0 %vm1783_vm3, %v4545_v61  ;;  %v4968_v10 = vpop.permute.xlu0 %4967 }
0x19cc   :  { %9204 = vmatpush3.xpose.msk.msra.mxu1 %vm1783_vm3, %v4892_v56  ;;  %9209 = vmatpush3.xpose.msk.msra.mxu0 %vm1783_vm3, %v4968_v10 }
0x19cd   :  { %9205 = vmatprep.mubr.msk.f32.mxu1 %vm9953_vm1, %v9947_v0  ;;  %9210 = vmatprep.mubr.msk.f32.mxu0 %vm9953_vm1, %v9947_v0 }
0x19ce   :  { %9213 = vmatprep.subr.mxu1 %v9947_v0  ;;  %9218 = vmatprep.subr.mxu0 %v9947_v0 }
0x19cf   :  { %v5120_v45 = vpop.permute.xlu1 %5119  ;;  %9206 = vmatmul.mubr.msk.f32.vlgmr.msra.gmra.mxu1 %vm1783_vm3, %v4524_v20  ;;  %9211 = vmatmul.mubr.msk.f32.vlgmr.msra.gmra.mxu0 %vm1783_vm3, %v4548_v37  ;;  %v5044_v54 = vpop.permute.xlu0 %5043 }
0x19d0   :  { %9214 = vmatpush3.xpose.msk.msra.mxu1 %vm1783_vm3, %v5044_v54  ;;  %9219 = vmatpush3.xpose.msk.msra.mxu0 %vm1783_vm3, %v5120_v45 }
0x19d1   :  { %9215 = vmatprep.mubr.msk.f32.mxu1 %vm9953_vm1, %v9947_v0  ;;  %9220 = vmatprep.mubr.msk.f32.mxu0 %vm9953_vm1, %v9947_v0 }
0x19d2   :  { %9223 = vmatprep.subr.mxu1 %v9947_v0  ;;  %9228 = vmatprep.subr.mxu0 %v9947_v0 }
0x19d3   :  { %v4552_v29 = vpop.permute.xlu1 %4551  ;;  %v4550_v21 = vpop.permute.xlu0 %4549 }
0x19d4   :  { %9216 = vmatmul.mubr.msk.f32.vlgmr.msra.gmra.mxu1 %vm1783_vm3, %v4550_v21  ;;  %9221 = vmatmul.mubr.msk.f32.vlgmr.msra.gmra.mxu0 %vm1783_vm3, %v4552_v29 }
0x19d5   :  { %9224 = vmatpush3.msra.mxu1 %v11002_v16  ;;  %9225 = vmatprep.mubr.msk.f32.mxu1 %vm9953_vm1, %v9947_v0 }
0x19d6   :  { %9233 = vmatprep.subr.mxu1 %v9947_v0  ;;  %9230 = vmatprep.mubr.msk.f32.mxu0 %vm9953_vm1, %v9947_v0 }
0x1a83   :  { %v4659_v30 = vpop.f32.mrf.mxu1 }
0x1a84   :  { %v5195_v46 = vsel %vm467_vm2, %v4659_v30, -inf }
0x1a85   :  { %5196 = vmax.xlane.f32.xlu0 %v5195_v46  ;;  %v9187_v5 = vpop.f32.mrf.mxu1 }
0x1a87   :  { %v4735_v63 = vpop.f32.mrf.mxu1 }
0x1a88   :  { %v5198_v43 = vsel %vm467_vm2, %v4735_v63, -inf }
0x1a89   :  { %5199 = vmax.xlane.f32.xlu1 %v5198_v43  ;;  %v9192_v28 = vpop.f32.mrf.mxu1 }
0x1a8b   :  { %v4811_v33 = vpop.f32.mrf.mxu1  ;;  %v4887_v32 = vpop.f32.mrf.mxu0 }
0x1a8c   :  { %v5201_v8 = vsel %vm467_vm2, %v4811_v33, -inf  ;;  %v5204_v44 = vsel %vm467_vm2, %v4887_v32, -inf }
0x1a8d   :  { %5202 = vmax.xlane.f32.xlu0 %v5201_v8  ;;  %v9197_v41 = vpop.f32.mrf.mxu1  ;;  %v9202_v11 = vpop.f32.mrf.mxu0 }
0x1a8f   :  { %v4963_v48 = vpop.f32.mrf.mxu1  ;;  %v5039_v36 = vpop.f32.mrf.mxu0 }
0x1a90   :  { %v5207_v57 = vsel %vm467_vm2, %v4963_v48, -inf  ;;  %v5210_v55 = vsel %vm467_vm2, %v5039_v36, -inf }
0x1a91   :  { %5208 = vmax.xlane.f32.xlu1 %v5207_v57  ;;  %v9207_v42 = vpop.f32.mrf.mxu1  ;;  %5205 = vmax.xlane.f32.xlu0 %v5204_v44  ;;  %v9212_v20 = vpop.f32.mrf.mxu0 }
0x1a94   :  { %v5115_v50 = vpop.f32.mrf.mxu1  ;;  %v5191_v52 = vpop.f32.mrf.mxu0 }
0x1a95   :  { %5211 = vmax.xlane.f32.xlu0 %v5210_v55  ;;  %v5213_v31 = vsel %vm467_vm2, %v5115_v50, -inf  ;;  %v5216_v51 = vsel %vm467_vm2, %v5191_v52, -inf }
0x1a96   :  { %v9222_v56 = vpop.f32.mrf.mxu0  ;;  %5214 = vmax.xlane.f32.xlu1 %v5213_v31  ;;  %v9217_v22 = vpop.f32.mrf.mxu1 }
0x1a99   :  { %5217 = vmax.xlane.f32.xlu0 %v5216_v51 }
0x1aa7   :  { %4568 = vrot.lane.b32.xlu1 %v11002_v16, %s9952_s13 }
0x1aab   :  { %4574 = vrot.lane.b32.xlu1 %v11002_v16, %s9958_s24 }
0x1aaf   :  { %4571 = vrot.lane.b32.xlu0 %v11002_v16, %s9948_s19  ;;  %4578 = vrot.lane.b32.xlu1 %v11012_v40, %s9952_s13 }
0x1b0e   :  { %v5197_v61 = vpop.xlane.xlu0 %5196 }
0x1b0f   :  { %v5219_v59 = vsub.f32 %v4659_v30, %v5197_v61 }
0x1b11   :  { %v5227_v14 = vmul.f32 1.442695, %v5219_v59 }
0x1b12   :  { %v5200_v37 = vpop.xlane.xlu1 %5199 }
0x1b13   :  { %9637 = vpow2.f32 %v5227_v14  ;;  %v5220_v10 = vsub.f32 %v4735_v63, %v5200_v37 }
0x1b15   :  { %v5229_v45 = vmul.f32 1.442695, %v5220_v10 }
0x1b16   :  { %v5203_v54 = vpop.xlane.xlu0 %5202 }
0x1b17   :  { %9639 = vpow2.f32 %v5229_v45  ;;  %v5221_v29 = vsub.f32 %v4811_v33, %v5203_v54 }
0x1b19   :  { %v5231_v21 = vmul.f32 1.442695, %v5221_v29 }
0x1b1a   :  { %v5209_v46 = vpop.xlane.xlu1 %5208  ;;  %v5206_v5 = vpop.xlane.xlu0 %5205 }
0x1b1b   :  { %9641 = vpow2.f32 %v5231_v21  ;;  %v5223_v43 = vsub.f32 %v4963_v48, %v5209_v46  ;;  %v5222_v28 = vsub.f32 %v4887_v32, %v5206_v5 }
0x1b1d   :  { %v5235_v16 = vmul.f32 1.442695, %v5223_v43  ;;  %v5233_v8 = vmul.f32 1.442695, %v5222_v28 }
0x1b1e   :  { %v5212_v41 = vpop.xlane.xlu0 %5211 }
0x1b1f   :  { %9643 = vpow2.f32 %v5235_v16  ;;  %v5224_v11 = vsub.f32 %v5039_v36, %v5212_v41  ;;  %v5215_v30 = vpop.xlane.xlu1 %5214 }
0x1b20   :  { %v9638_v57 = vpop.eup %9637  ;;  %9645 = vpow2.f32 %v5233_v8  ;;  %v5225_v44 = vsub.f32 %v5115_v50, %v5215_v30 }
0x1b21   :  { %v5237_v63 = vmul.f32 1.442695, %v5224_v11  ;;  %v5243_v42 = vsel %vm467_vm2, %v9638_v57, 0.0 }
0x1b22   :  { %v5239_v20 = vmul.f32 1.442695, %v5225_v44  ;;  %5244 = vadd.xlane.f32.xlu1 %v5243_v42  ;;  %v5218_v33 = vpop.xlane.xlu0 %5217 }
0x1b23   :  { %9647 = vpow2.f32 %v5237_v63  ;;  %v5226_v55 = vsub.f32 %v5191_v52, %v5218_v33  ;;  %v4569_v31 = vpop.permute.xlu1 %4568 }
0x1b24   :  { %v9640_v48 = vpop.eup %9639  ;;  %9649 = vpow2.f32 %v5239_v20  ;;  %9229 = vmatpush3.msra.mxu0 %v4569_v31 }
0x1b25   :  { %v5241_v32 = vmul.f32 1.442695, %v5226_v55  ;;  %v5246_v56 = vsel %vm467_vm2, %v9640_v48, 0.0  ;;  %9238 = vmatprep.subr.mxu0 %v9947_v0 }
0x1b26   :  { %5247 = vadd.xlane.f32.xlu0 %v5246_v56  ;;  %v4572_v46 = vpop.permute.xlu0 %4571 }
0x1b27   :  { %9651 = vpow2.f32 %v5241_v32  ;;  %v4575_v29 = vpop.permute.xlu1 %4574 }
0x1b28   :  { %v9642_v36 = vpop.eup %9641 }
0x1b29   :  { %v5249_v50 = vsel %vm467_vm2, %v9642_v36, 0.0 }
0x1b2a   :  { %5250 = vadd.xlane.f32.xlu1 %v5249_v50 }
0x1b2b   :  { %v4579_v21 = vpop.permute.xlu1 %4578 }
0x1b2c   :  { %v9644_v22 = vpop.eup %9643 }
0x1b2d   :  { %v9646_v51 = vpop.eup %9645  ;;  %v5255_v61 = vsel %vm467_vm2, %v9644_v22, 0.0 }
0x1b2e   :  { %5256 = vadd.xlane.f32.xlu1 %v5255_v61  ;;  %v5252_v52 = vsel %vm467_vm2, %v9646_v51, 0.0 }
0x1b2f   :  { %5253 = vadd.xlane.f32.xlu0 %v5252_v52 }
0x1b30   :  { %v9648_v59 = vpop.eup %9647 }
0x1b31   :  { %v9650_v14 = vpop.eup %9649  ;;  %v5258_v37 = vsel %vm467_vm2, %v9648_v59, 0.0 }
0x1b32   :  { %v5261_v10 = vsel %vm467_vm2, %v9650_v14, 0.0 }
0x1b33   :  { %5259 = vadd.xlane.f32.xlu0 %v5258_v37  ;;  %5262 = vadd.xlane.f32.xlu1 %v5261_v10  ;;  %v9749_v37 = vld [vmem:[%s11556_s26 + $0x30] sm:$0xff]  ;;  %v9751_v10 = vld [vmem:[%s11556_s26 + $0x20] sm:$0xff] }
0x1b34   :  { %v11102_v45 = vpop.eup %9651 }
0x1b35   :  { %v5264_v54 = vsel %vm467_vm2, %v11102_v45, 0.0 }
0x1b37   :  { %5265 = vadd.xlane.f32.xlu0 %v5264_v54  ;;  %v9754_v54 = vld [vmem:[%s11556_s26 + $0x8] sm:$0xff] }
0x1b44   :  { %4584 = vrot.lane.b32.xlu1 %v11012_v40, %s9958_s24  ;;  %s11571_s24 = sld [smem:[#allocation44_spill]] }
0x1b4d   :  { %4581 = vrot.lane.b32.xlu0 %v11012_v40, %s9948_s19 }
0x1bab   :  { %v5245_v5 = vpop.xlane.xlu1 %5244 }
0x1bac   :  { %9653 = vrcp.f32 %v5245_v5 }
0x1baf   :  { %v5248_v43 = vpop.xlane.xlu0 %5247 }
0x1bb0   :  { %9655 = vrcp.f32 %v5248_v43 }
0x1bb3   :  { %v5251_v28 = vpop.xlane.xlu1 %5250 }
0x1bb4   :  { %9657 = vrcp.f32 %v5251_v28 }
0x1bb7   :  { %v5257_v16 = vpop.xlane.xlu1 %5256 }
0x1bb8   :  { %9659 = vrcp.f32 %v5257_v16  ;;  %v5254_v8 = vpop.xlane.xlu0 %5253 }
0x1bb9   :  { %v9654_v41 = vpop.eup %9653  ;;  %9661 = vrcp.f32 %v5254_v8 }
0x1bba   :  { %v5275_v11 = vmul.f32 %v9654_v41, %v9638_v57 }
0x1bbc   :  { %v5260_v30 = vpop.xlane.xlu0 %5259  ;;  %9226 = vmatmul.mubr.msk.f32.vlgmr.msra.gmra.mxu1 %vm467_vm2, %v5275_v11  ;;  %v5263_v44 = vpop.xlane.xlu1 %5262 }
0x1bbd   :  { %v9656_v63 = vpop.eup %9655  ;;  %9663 = vrcp.f32 %v5260_v30  ;;  %9234 = vmatpush3.msra.mxu1 %v4572_v46  ;;  %9235 = vmatprep.mubr.msk.f32.mxu1 %vm9953_vm1, %v9947_v0 }
0x1bbe   :  { %9665 = vrcp.f32 %v5263_v44  ;;  %v5276_v42 = vmul.f32 %v9656_v63, %v9640_v48  ;;  %9243 = vmatprep.subr.mxu1 %v9947_v0 }
0x1bc0   :  { %v5266_v20 = vpop.xlane.xlu0 %5265  ;;  %9231 = vmatmul.mubr.msk.f32.vlgmr.msra.gmra.mxu0 %vm467_vm2, %v5276_v42  ;;  %v4585_v61 = vpop.permute.xlu1 %4584 }
0x1bc1   :  { %v9658_v33 = vpop.eup %9657  ;;  %9667 = vrcp.f32 %v5266_v20  ;;  %9239 = vmatpush3.msra.mxu0 %v4575_v29  ;;  %9240 = vmatprep.mubr.msk.f32.mxu0 %vm9953_vm1, %v9947_v0 }
0x1bc2   :  { %v5277_v57 = vmul.f32 %v9658_v33, %v9642_v36  ;;  %9248 = vmatprep.subr.mxu0 %v9947_v0 }
0x1bc4   :  { %9236 = vmatmul.mubr.msk.f32.vlgmr.msra.gmra.mxu1 %vm467_vm2, %v5277_v57  ;;  %v4582_v56 = vpop.permute.xlu0 %4581 }
0x1bc5   :  { %v9660_v55 = vpop.eup %9659  ;;  %9244 = vmatpush3.msra.mxu1 %v11012_v40  ;;  %9245 = vmatprep.mubr.msk.f32.mxu1 %vm9953_vm1, %v9947_v0 }
0x1bc6   :  { %v9662_v31 = vpop.eup %9661  ;;  %9253 = vmatprep.subr.mxu1 %v9947_v0  ;;  %v5279_v48 = vmul.f32 %v9660_v55, %v9644_v22 }
0x1bc7   :  { %v5278_v32 = vmul.f32 %v9662_v31, %v9646_v51  ;;  %v9748_v51 = vld [vmem:[%s11556_s26 + $0x38] sm:$0xff] }
0x1bc8   :  { %9246 = vmatmul.mubr.msk.f32.vlgmr.msra.gmra.mxu1 %vm467_vm2, %v5279_v48 }
0x1bc9   :  { %9241 = vmatmul.mubr.msk.f32.vlgmr.msra.gmra.mxu0 %vm467_vm2, %v5278_v32  ;;  %9254 = vmatpush3.msra.mxu1 %v4582_v56 }
0x1bca   :  { %v9664_v36 = vpop.eup %9663  ;;  %9249 = vmatpush3.msra.mxu0 %v4579_v21  ;;  %9250 = vmatprep.mubr.msk.f32.mxu0 %vm9953_vm1, %v9947_v0 }
0x1bcb   :  { %v9666_v40 = vpop.eup %9665  ;;  %9258 = vmatprep.subr.mxu0 %v9947_v0  ;;  %v5280_v50 = vmul.f32 %v9664_v36, %v9648_v59  ;;  %9255 = vmatprep.mubr.msk.f32.mxu1 %vm9953_vm1, %v9947_v0 }
0x1bcc   :  { %v5281_v22 = vmul.f32 %v9666_v40, %v9650_v14  ;;  %9263 = vmatprep.subr.mxu1 %v9748_v51  ;;  %v9750_v14 = vld [vmem:[%s11556_s26 + $0x28] sm:$0xff] }
0x1bcd   :  { %9251 = vmatmul.mubr.msk.f32.vlgmr.msra.gmra.mxu0 %vm467_vm2, %v5280_v50 }
0x1bce   :  { %v9668_v52 = vpop.eup %9667  ;;  %9259 = vmatpush3.msra.mxu0 %v4585_v61  ;;  %9256 = vmatmul.mubr.msk.f32.vlgmr.msra.gmra.mxu1 %vm467_vm2, %v5281_v22 }
0x1bcf   :  { %9260 = vmatprep.mubr.msk.f32.mxu0 %vm9953_vm1, %v9947_v0  ;;  %v5282_v59 = vmul.f32 %v9668_v52, %v11102_v45  ;;  %9264 = vmatpush3.msra.mxu1 %v9748_v51  ;;  %v9752_v45 = vld [vmem:[%s11556_s26 + $0x18] sm:$0xff] }
0x1bd0   :  { %9265 = vmatprep.subr.mxu1 %v9749_v37  ;;  %9282 = vmatprep.subr.mxu0 %v10831_v24 }
0x1bd1   :  { %9261 = vmatmul.mubr.msk.f32.vlgmr.msra.gmra.mxu0 %vm467_vm2, %v5282_v59  ;;  %9266 = vmatpush3.msra.mxu1 %v9749_v37 }
0x1bd2   :  { %9267 = vmatprep.subr.mxu1 %v9750_v14  ;;  %9283 = vmatpush3.msra.mxu0 %v10831_v24  ;;  %v9753_v24 = vld [vmem:[%s11556_s26 + $0x10] sm:$0xff] }
0x1bd3   :  { %9268 = vmatpush3.msra.mxu1 %v9750_v14  ;;  %9284 = vmatprep.subr.mxu0 %v10834_v58 }
0x1bd4   :  { %9269 = vmatprep.subr.mxu1 %v9751_v10  ;;  %9285 = vmatpush3.msra.mxu0 %v10834_v58  ;;  %v9755_v58 = vld [vmem:[%s11556_s26] sm:$0xff] }
0x1bd5   :  { %9270 = vmatpush3.msra.mxu1 %v9751_v10  ;;  %9286 = vmatprep.subr.mxu0 %v10839_v12 }
0x1bd6   :  { %9271 = vmatprep.subr.mxu1 %v9752_v45  ;;  %9287 = vmatpush3.msra.mxu0 %v10839_v12 }
0x1bd7   :  { %9272 = vmatpush3.msra.mxu1 %v9752_v45  ;;  %9288 = vmatprep.subr.mxu0 %v10844_v49 }
0x1bd8   :  { %9273 = vmatprep.subr.mxu1 %v9753_v24  ;;  %9289 = vmatpush3.msra.mxu0 %v10844_v49 }
0x1bd9   :  { %9274 = vmatpush3.msra.mxu1 %v9753_v24  ;;  %9290 = vmatprep.subr.mxu0 %v10849_v18 }
0x1bda   :  { %9275 = vmatprep.subr.mxu1 %v9754_v54  ;;  %9291 = vmatpush3.msra.mxu0 %v10849_v18 }
0x1bdb   :  { %9276 = vmatpush3.msra.mxu1 %v9754_v54  ;;  %9292 = vmatprep.subr.mxu0 %v10854_v25 }
0x1bdc   :  { %9277 = vmatprep.subr.mxu1 %v9755_v58  ;;  %9293 = vmatpush3.msra.mxu0 %v10854_v25 }
0x1bdd   :  { %9278 = vmatpush3.msra.mxu1 %v9755_v58  ;;  %9294 = vmatprep.subr.mxu0 %v10859_v53 }
0x1bde   :  { %9295 = vmatpush3.msra.mxu0 %v10859_v53  ;;  %9301 = vmatprep.subr.mxu1 %v10899_v60 }
0x1bdf   :  { %9296 = vmatprep.subr.mxu0 %v10866_v27 }
0x1be0   :  { %9297 = vmatpush3.msra.mxu0 %v10866_v27 }
0x1c7c   :  { %v5352_v12 = vpop.f32.mrf.mxu1 }
0x1c7e   :  { %v9227_v49 = vpop.f32.mrf.mxu1 }
0x1c80   :  { %v5425_v18 = vpop.f32.mrf.mxu0 }
0x1c81   :  { %5868 = vrot.lane.b32.xlu0 %v5425_v18, %s9955_s2  ;;  %v9757_v18 = vld [vmem:[%s11559_s21] ss:$0 sm:$0xff] }
0x1c82   :  { %v9232_v29 = vpop.f32.mrf.mxu0 }
0x1c84   :  { %v5498_v21 = vpop.f32.mrf.mxu1 }
0x1c85   :  { %5872 = vrot.lane.b32.xlu1 %v5498_v21, %s9949_s30 }
0x1c86   :  { %v9237_v25 = vpop.f32.mrf.mxu1 }
0x1c88   :  { %v5644_v46 = vpop.f32.mrf.mxu1 }
0x1c89   :  { %v5571_v5 = vpop.f32.mrf.mxu0 }
0x1c8a   :  { %5876 = vrot.lane.b32.xlu1 %v5571_v5, %s9959_s28  ;;  %v9247_v53 = vpop.f32.mrf.mxu1 }
0x1c8b   :  { %v9242_v43 = vpop.f32.mrf.mxu0 }
0x1c8d   :  { %v5717_v28 = vpop.f32.mrf.mxu0 }
0x1c8e   :  { %5883 = vrot.lane.b32.xlu0 %v5717_v28, %s9955_s2  ;;  %v5790_v27 = vpop.f32.mrf.mxu1 }
0x1c8f   :  { %v9252_v16 = vpop.f32.mrf.mxu0 }
0x1c90   :  { %v9257_v8 = vpop.f32.mrf.mxu1 }
0x1c91   :  { %v5863_v41 = vpop.f32.mrf.mxu0 }
0x1c92   :  { %5891 = vrot.lane.b32.xlu1 %v5863_v41, %s9959_s28  ;;  %5887 = vrot.lane.b32.xlu0 %v5790_v27, %s9949_s30 }
0x1c93   :  { %v9262_v11 = vpop.f32.mrf.mxu0 }
0x1cf3   :  { %v5869_v44 = vpop.permute.xlu0 %5868 }
0x1cf4   :  { %v5879_v63 = vsel %vm1783_vm3, %v5352_v12, %v5869_v44 }
0x1cf7   :  { %v5873_v30 = vpop.permute.xlu1 %5872 }
0x1cf8   :  { %v5880_v42 = vsel %vm295_vm0, %v5879_v63, %v5873_v30 }
0x1cfc   :  { %v5877_v20 = vpop.permute.xlu1 %5876 }
0x1cfd   :  { %v5881_v33 = vsel %vm3938_vm6, %v5880_v42, %v5877_v20 }
0x1cfe   :  { %9279 = vmatprep.mubr.msk.f32.mxu1 %vm2066_vm5, %v5881_v33 }
0x1d00   :  { %v5884_v57 = vpop.permute.xlu0 %5883 }
0x1d01   :  { %v5894_v55 = vsel %vm1783_vm3, %v5644_v46, %v5884_v57  ;;  %v9758_v46 = vld [vmem:[%s11560_s25] ss:$0 sm:$0xff] }
0x1d04   :  { %v5892_v31 = vpop.permute.xlu1 %5891  ;;  %v5888_v48 = vpop.permute.xlu0 %5887 }
0x1d05   :  { %v5895_v32 = vsel %vm295_vm0, %v5894_v55, %v5888_v48 }
0x1d06   :  { %v5896_v56 = vsel %vm3938_vm6, %v5895_v32, %v5892_v31 }
0x1d07   :  { %9280 = vmatmul.mubr.msk.f32.vlgmr.msra.gmra.mxu1 %vm2066_vm5, %v5896_v56 }
0x1d08   :  { %9302 = vmatpush3.msra.mxu1 %v10899_v60 }
0x1d09   :  { %9303 = vmatprep.subr.mxu1 %v10902_v62 }
0x1d0a   :  { %9304 = vmatpush3.msra.mxu1 %v10902_v62  ;;  %v9756_v62 = vld [vmem:[%s11557_s1] ss:$0 sm:$0xff] }
0x1d0b   :  { %9305 = vmatprep.subr.mxu1 %v10907_v1 }
0x1d0c   :  { %9306 = vmatpush3.msra.mxu1 %v10907_v1 }
0x1d0d   :  { %9307 = vmatprep.subr.mxu1 %v10912_v2 }
0x1d0e   :  { %9308 = vmatpush3.msra.mxu1 %v10912_v2 }
0x1d0f   :  { %9309 = vmatprep.subr.mxu1 %v10917_v3 }
0x1d10   :  { %9310 = vmatpush3.msra.mxu1 %v10917_v3 }
0x1d11   :  { %9311 = vmatprep.subr.mxu1 %v10922_v6 }
0x1d12   :  { %9312 = vmatpush3.msra.mxu1 %v10922_v6 }
0x1d13   :  { %9313 = vmatprep.subr.mxu1 %v10927_v7 }
0x1d14   :  { %9314 = vmatpush3.msra.mxu1 %v10927_v7 }
0x1d15   :  { %9315 = vmatprep.subr.mxu1 %v10932_v9 }
0x1d16   :  { %9316 = vmatpush3.msra.mxu1 %v10932_v9 }
0x1dc7   :  { %v9281_v60 = vpop.f32.mrf.mxu1 }
0x1dc8   :  { %v5975_v1 = vadd.f32 %v9756_v62, %v9281_v60 }
0x1dc9   :  { %v5969_v2 = vpop.f32.mrf.mxu1 }
0x1dca   :  { %v5979_v36 = vadd.f32 %v5975_v1, %v10977_v15  ;;  %v5970_v40 = vadd.f32 %v9756_v62, %v5969_v2 }
0x1dcc   :  { %v5978_v3 = vadd.f32 %v5970_v40, %v10974_v4  ;;  %v5983_v50 = vsel %vm2066_vm5, %v5979_v36, 0.0 }
0x1dcd   :  { %5984 = vadd.xlane.f32.xlu1 %v5983_v50 }
0x1dce   :  { %v5980_v6 = vsel %vm2066_vm5, %v5978_v3, 0.0 }
0x1dcf   :  { %5981 = vadd.xlane.f32.xlu0 %v5980_v6 }
0x1e56   :  { %v5985_v7 = vpop.xlane.xlu1 %5984 }
0x1e57   :  { %v5987_v22 = vmul.f32 0.015625, %v5985_v7 }
0x1e58   :  { %v5982_v51 = vpop.xlane.xlu0 %5981 }
0x1e59   :  { %v5986_v61 = vmul.f32 0.015625, %v5982_v51  ;;  %v5989_v9 = vsub.f32 %v5979_v36, %v5987_v22 }
0x1e5b   :  { %v5988_v52 = vsub.f32 %v5978_v3, %v5986_v61  ;;  %v5991_v15 = vmul.f32 %v5989_v9, %v5989_v9 }
0x1e5d   :  { %v5990_v59 = vmul.f32 %v5988_v52, %v5988_v52  ;;  %v5995_v4 = vsel %vm2066_vm5, %v5991_v15, 0.0 }
0x1e5f   :  { %v5992_v37 = vsel %vm2066_vm5, %v5990_v59, 0.0 }
0x1e60   :  { %5993 = vadd.xlane.f32.xlu0 %v5992_v37 }
0x1e64   :  { %5996 = vadd.xlane.f32.xlu0 %v5995_v4 }
0x1ee9   :  { %v5994_v14 = vpop.xlane.xlu0 %5993 }
0x1eea   :  { %v5998_v10 = vmul.f32 0.015625, %v5994_v14 }
0x1eec   :  { %v6000_v45 = vadd.f32 1e-05, %v5998_v10  ;;  %v6229_v10 = vld [vmem:[%s11566_s16 + $0x38] sm:$0xff] }
0x1eed   :  { %v5997_v24 = vpop.xlane.xlu0 %5996  ;;  %9320 = vmatprep.subr.mxu0 %v6229_v10 }
0x1eee   :  { %9669 = vrsqrt.f32 %v6000_v45  ;;  %v5999_v54 = vmul.f32 0.015625, %v5997_v24  ;;  %v6228_v45 = vld [vmem:[%s11566_s16 + $0x30] sm:$0xff]  ;;  %v6227_v24 = vld [vmem:[%s11566_s16 + $0x28] sm:$0xff] }
0x1ef0   :  { %v6001_v58 = vadd.f32 1e-05, %v5999_v54  ;;  %v6226_v54 = vld [vmem:[%s11566_s16 + $0x20] sm:$0xff] }
0x1ef2   :  { %9671 = vrsqrt.f32 %v6001_v58  ;;  %v6225_v58 = vld [vmem:[%s11566_s16 + $0x18] sm:$0xff] }
0x1efb   :  { %v9670_v12 = vpop.eup %9669 }
0x1efc   :  { %v6004_v49 = vmul.f32 %v9670_v12, %v5988_v52  ;;  %v6224_v12 = vld [vmem:[%s11566_s16 + $0x10] sm:$0xff] }
0x1efe   :  { %v6006_v29 = vmul.f32 %v9757_v18, %v6004_v49  ;;  %v6223_v49 = vld [vmem:[%s11566_s16 + $0x8] sm:$0xff] }
0x1eff   :  { %v9672_v21 = vpop.eup %9671 }
0x1f00   :  { %v6005_v25 = vmul.f32 %v9672_v21, %v5989_v9  ;;  %v6008_v5 = vadd.f32 %v9758_v46, %v6006_v29 }
0x1f02   :  { %9298 = vmatprep.mubr.msk.f32.mxu0 %vm2066_vm5, %v6008_v5  ;;  %v6007_v53 = vmul.f32 %v9757_v18, %v6005_v25  ;;  %v6222_v18 = vld [vmem:[%s11566_s16] sm:$0xff] }
0x1f04   :  { %v6009_v43 = vadd.f32 %v9758_v46, %v6007_v53 }
0x1f06   :  { %9299 = vmatmul.mubr.msk.f32.vlgmr.msra.gmra.mxu0 %vm2066_vm5, %v6009_v43 }
0x1f07   :  { %9321 = vmatpush3.msra.mxu0 %v6229_v10  ;;  %v8561_v10 = vld [vmem:[%s11570_s23] ss:$0 sm:$0xff] }
0x1f08   :  { %9322 = vmatprep.subr.mxu0 %v6228_v45 }
0x1f09   :  { %9323 = vmatpush3.msra.mxu0 %v6228_v45 }
0x1f0a   :  { %9324 = vmatprep.subr.mxu0 %v6227_v24 }
0x1f0b   :  { %9325 = vmatpush3.msra.mxu0 %v6227_v24 }
0x1f0c   :  { %9326 = vmatprep.subr.mxu0 %v6226_v54 }
0x1f0d   :  { %9327 = vmatpush3.msra.mxu0 %v6226_v54 }
0x1f0e   :  { %9328 = vmatprep.subr.mxu0 %v6225_v58 }
0x1f0f   :  { %9329 = vmatpush3.msra.mxu0 %v6225_v58 }
0x1f10   :  { %9330 = vmatprep.subr.mxu0 %v6224_v12 }
0x1f11   :  { %9331 = vmatpush3.msra.mxu0 %v6224_v12 }
0x1f12   :  { %9332 = vmatprep.subr.mxu0 %v6223_v49 }
0x1f13   :  { %9333 = vmatpush3.msra.mxu0 %v6223_v49 }
0x1f14   :  { %9334 = vmatprep.subr.mxu0 %v6222_v18 }
0x1f15   :  { %9335 = vmatpush3.msra.mxu0 %v6222_v18 }
0x1f16   :  { %9339 = vmatprep.subr.mxu0 %v9947_v0 }
0x1fc6   :  { %v9300_v28 = vpop.f32.mrf.mxu0 }
0x1fc7   :  { %v6088_v27 = vadd.f32 %v9300_v28, %v10940_v13 }
0x1fc8   :  { %v6082_v16 = vpop.f32.mrf.mxu0 }
0x1fc9   :  { %v6094_v8 = vmul.f32 0.044715, %v6088_v27  ;;  %v6083_v41 = vadd.f32 %v10940_v13, %v6082_v16  ;;  %v6092_v62 = vmul.f32 0.5, %v6088_v27 }
0x1fcb   :  { %v6096_v11 = vmul.f32 %v6094_v8, %v6088_v27  ;;  %v6093_v30 = vmul.f32 0.044715, %v6083_v41  ;;  %v6091_v56 = vmul.f32 0.5, %v6083_v41 }
0x1fcd   :  { %v6098_v44 = vmul.f32 %v6096_v11, %v6088_v27  ;;  %v6095_v63 = vmul.f32 %v6093_v30, %v6083_v41 }
0x1fcf   :  { %v6100_v42 = vadd.f32 %v6098_v44, %v6088_v27  ;;  %v6097_v20 = vmul.f32 %v6095_v63, %v6083_v41  ;;  %v8557_v44 = vld [vmem:[%s11567_s18] ss:$0 sm:$0xff] }
0x1fd1   :  { %v6102_v33 = vmul.f32 0.7978846, %v6100_v42  ;;  %v6099_v57 = vadd.f32 %v6097_v20, %v6083_v41 }
0x1fd3   :  { %9673 = vtanh.f32 %v6102_v33  ;;  %v6101_v55 = vmul.f32 0.7978846, %v6099_v57 }
0x1fd5   :  { %9675 = vtanh.f32 %v6101_v55 }
0x1fe0   :  { %v9674_v31 = vpop.eup %9673 }
0x1fe1   :  { %v6106_v32 = vadd.f32 1.0, %v9674_v31 }
0x1fe2   :  { %v9676_v48 = vpop.eup %9675 }
0x1fe3   :  { %v6105_v60 = vadd.f32 1.0, %v9676_v48  ;;  %v6108_v2 = vmul.f32 %v6106_v32, %v6092_v62 }
0x1fe5   :  { %v6107_v1 = vmul.f32 %v6105_v60, %v6091_v56 }
0x1fe7   :  { %9317 = vmatprep.mubr.msk.f32.mxu1 %vm2066_vm5, %v6107_v1 }
0x1fe8   :  { %9318 = vmatmul.mubr.msk.f32.vlgmr.msra.gmra.mxu1 %vm2066_vm5, %v6108_v2 }
0x1fe9   :  { %6470 = vmatprep.mubr.f32.mxu1 %v9947_v0 }
0x20a8   :  { %v9319_v13 = vpop.f32.mrf.mxu1 }
0x20a9   :  { %v6187_v36 = vadd.f32 %v9319_v13, %v10955_v26  ;;  %v6387_v13 = vld [vmem:[%s11568_s22 + $0x38] sm:$0xff] }
0x20aa   :  { %v6181_v40 = vpop.f32.mrf.mxu1  ;;  %6430 = vmatprep.subr.mxu1 %v6387_v13 }
0x20ab   :  { %v6191_v3 = vadd.f32 %v6187_v36, %v6009_v43  ;;  %v6182_v50 = vadd.f32 %v10955_v26, %v6181_v40  ;;  %v6386_v36 = vld [vmem:[%s11568_s22 + $0x30] sm:$0xff]  ;;  %v6385_v40 = vld [vmem:[%s11568_s22 + $0x28] sm:$0xff] }
0x20ac   :  { %6431 = vmatpush1.msra.mxu1 %v6386_v36 }
0x20ad   :  { %v6190_v6 = vadd.f32 %v6182_v50, %v6008_v5  ;;  %v6195_v7 = vsel %vm2066_vm5, %v6191_v3, 0.0  ;;  %v6383_v50 = vld [vmem:[%s11568_s22 + $0x18] sm:$0xff]  ;;  %6432 = vmatprep.subr.mxu1 %v6385_v40 }
0x20ae   :  { %6196 = vadd.xlane.f32.xlu0 %v6195_v7  ;;  %v6381_v7 = vld [vmem:[%s11568_s22 + $0x8] sm:$0xff] }
0x20af   :  { %v6192_v22 = vsel %vm2066_vm5, %v6190_v6, 0.0 }
0x20b0   :  { %6193 = vadd.xlane.f32.xlu1 %v6192_v22  ;;  %v6380_v22 = vld [vmem:[%s11568_s22] sm:$0xff] }
0x2137   :  { %v6197_v51 = vpop.xlane.xlu0 %6196 }
0x2138   :  { %v6199_v61 = vmul.f32 0.015625, %v6197_v51 }
0x2139   :  { %v6194_v9 = vpop.xlane.xlu1 %6193 }
0x213a   :  { %v6201_v52 = vsub.f32 %v6191_v3, %v6199_v61  ;;  %v6198_v59 = vmul.f32 0.015625, %v6194_v9  ;;  %v6384_v3 = vld [vmem:[%s11568_s22 + $0x20] sm:$0xff] }
0x213b   :  { %6433 = vmatpush1.msra.mxu1 %v6384_v3 }
0x213c   :  { %v6200_v37 = vsub.f32 %v6190_v6, %v6198_v59  ;;  %v6203_v15 = vmul.f32 %v6201_v52, %v6201_v52  ;;  %v6382_v6 = vld [vmem:[%s11568_s22 + $0x10] sm:$0xff]  ;;  %6434 = vmatprep.subr.mxu1 %v6383_v50 }
0x213d   :  { %6435 = vmatpush1.msra.mxu1 %v6382_v6 }
0x213e   :  { %v6207_v26 = vsel %vm2066_vm5, %v6203_v15, 0.0  ;;  %v6202_v4 = vmul.f32 %v6200_v37, %v6200_v37  ;;  %6436 = vmatprep.subr.mxu1 %v6381_v7 }
0x213f   :  { %6208 = vadd.xlane.f32.xlu0 %v6207_v26  ;;  %6437 = vmatpush1.msra.mxu1 %v6380_v22  ;;  %v8560_v26 = vld [vmem:[%s11569_s27] ss:$0 sm:$0xff] }
0x2140   :  { %v6204_v14 = vsel %vm2066_vm5, %v6202_v4, 0.0  ;;  %9354 = vmatprep.subr.mxu1 %v9947_v0 }
0x2141   :  { %6205 = vadd.xlane.f32.xlu1 %v6204_v14 }
0x21c8   :  { %v6209_v29 = vpop.xlane.xlu0 %6208 }
0x21c9   :  { %v6211_v21 = vmul.f32 0.015625, %v6209_v29 }
0x21ca   :  { %v6206_v25 = vpop.xlane.xlu1 %6205 }
0x21cb   :  { %v6213_v46 = vadd.f32 1e-05, %v6211_v21  ;;  %v6210_v5 = vmul.f32 0.015625, %v6206_v25 }
0x21cd   :  { %9677 = vrsqrt.f32 %v6213_v46  ;;  %v6212_v53 = vadd.f32 1e-05, %v6210_v5 }
0x21cf   :  { %9679 = vrsqrt.f32 %v6212_v53 }
0x21da   :  { %v9678_v43 = vpop.eup %9677 }
0x21db   :  { %v6217_v28 = vmul.f32 %v9678_v43, %v6201_v52 }
0x21dc   :  { %v9680_v27 = vpop.eup %9679 }
0x21dd   :  { %v6216_v16 = vmul.f32 %v9680_v27, %v6200_v37  ;;  %v6219_v8 = vmul.f32 %v10966_v38, %v6217_v28 }
0x21df   :  { %v6218_v41 = vmul.f32 %v10966_v38, %v6216_v16  ;;  %v6221_v30 = vadd.f32 %v10970_v47, %v6219_v8 }
0x21e1   :  { %v6220_v11 = vadd.f32 %v10970_v47, %v6218_v41 }
0x21e3   :  { %9336 = vmatprep.mubr.msk.f32.mxu0 %vm2066_vm5, %v6220_v11 }
0x21e4   :  { %9337 = vmatmul.mubr.msk.f32.vlgmr.msra.gmra.mxu0 %vm2066_vm5, %v6221_v30 }
0x21e5   :  { %9341 = vmatprep.mubr.msk.f32.mxu0 %vm9953_vm1, %v9947_v0 }
0x22a4   :  { %v9338_v63 = vpop.f32.mrf.mxu0 }
0x22a5   :  { %v6315_v42 = vadd.f32 %v9338_v63, %v8557_v44 }
0x22a6   :  { %v6309_v20 = vpop.f32.mrf.mxu0 }
0x22a7   :  { %v6310_v33 = vadd.f32 %v8557_v44, %v6309_v20  ;;  %v6323_v57 = vsel %vm295_vm0, %v6315_v42, 0.0 }
0x22a8   :  { %6324 = vadd.xlane.f32.xlu0 %v6323_v57 }
0x22a9   :  { %v6320_v38 = vsel %vm295_vm0, %v6310_v33, 0.0 }
0x22aa   :  { %6321 = vadd.xlane.f32.xlu1 %v6320_v38 }
0x2331   :  { %v6325_v47 = vpop.xlane.xlu0 %6324 }
0x2332   :  { %v6327_v55 = vmul.f32 0.03125, %v6325_v47 }
0x2333   :  { %v6322_v31 = vpop.xlane.xlu1 %6321 }
0x2334   :  { %v6329_v48 = vsub.f32 %v6315_v42, %v6327_v55  ;;  %v6326_v32 = vmul.f32 0.03125, %v6322_v31  ;;  %v6388_v42 = vld [vmem:[%s11571_s24] sm:$0x3] }
0x2335   :  { %v6397_v20 = vrot.slane %v6388_v42, %v10274_v19  ;;  %v9759_v55 = vld [vmem:[%s10039_s12] sm:$0xff] }
0x2336   :  { %v6328_v56 = vsub.f32 %v6310_v33, %v6326_v32  ;;  %v6331_v60 = vmul.f32 %v6329_v48, %v6329_v48 }
0x2338   :  { %v6335_v62 = vsel %vm295_vm0, %v6331_v60, 0.0  ;;  %v6330_v1 = vmul.f32 %v6328_v56, %v6328_v56 }
0x2339   :  { %6336 = vadd.xlane.f32.xlu0 %v6335_v62  ;;  %v6393_v62 = vrot.slane %v6388_v42, %v10270_v17 }
0x233a   :  { %v6332_v2 = vsel %vm295_vm0, %v6330_v1, 0.0 }
0x233b   :  { %6333 = vadd.xlane.f32.xlu1 %v6332_v2 }
0x23c2   :  { %v6337_v51 = vpop.xlane.xlu0 %6336 }
0x23c3   :  { %v6339_v61 = vmul.f32 0.03125, %v6337_v51 }
0x23c4   :  { %v6334_v9 = vpop.xlane.xlu1 %6333 }
0x23c5   :  { %v6341_v52 = vadd.f32 1e-05, %v6339_v61  ;;  %v6338_v59 = vmul.f32 0.03125, %v6334_v9 }
0x23c7   :  { %9681 = vrsqrt.f32 %v6341_v52  ;;  %v6340_v37 = vadd.f32 1e-05, %v6338_v59 }
0x23c9   :  { %9683 = vrsqrt.f32 %v6340_v37  ;;  %v9762_v37 = vld [vmem:[%s10034_s6 + $0x8] sm:$0xff] }
0x23d4   :  { %v9682_v15 = vpop.eup %9681 }
0x23d5   :  { %v6345_v4 = vmul.f32 %v9682_v15, %v6329_v48 }
0x23d6   :  { %v9684_v14 = vpop.eup %9683 }
0x23d7   :  { %v6353_v45 = vmul.f32 %v8560_v26, %v6345_v4  ;;  %v6344_v24 = vmul.f32 %v9684_v14, %v6328_v56  ;;  %v9760_v56 = vld [vmem:[%s10039_s12 + $0x8] sm:$0xff]  ;;  %s11573_s12 = sld [smem:[#allocation46_spill]] }
0x23d9   :  { %v6361_v54 = vadd.f32 %v8561_v10, %v6353_v45  ;;  %v6352_v58 = vmul.f32 %v8560_v26, %v6344_v24 }
0x23db   :  { %v6360_v12 = vadd.f32 %v8561_v10, %v6352_v58  ;;  %v6365_v49 = vmul.f32 0.044715, %v6361_v54  ;;  %v6363_v44 = vmul.f32 0.5, %v6361_v54 }
0x23dd   :  { %v6364_v18 = vmul.f32 0.044715, %v6360_v12  ;;  %v6367_v29 = vmul.f32 %v6365_v49, %v6361_v54  ;;  %v6362_v8 = vmul.f32 0.5, %v6360_v12 }
0x23df   :  { %v6366_v21 = vmul.f32 %v6364_v18, %v6360_v12  ;;  %v6369_v25 = vmul.f32 %v6367_v29, %v6361_v54 }
0x23e1   :  { %v6368_v46 = vmul.f32 %v6366_v21, %v6360_v12  ;;  %v6371_v5 = vadd.f32 %v6369_v25, %v6361_v54 }
0x23e3   :  { %v6370_v53 = vadd.f32 %v6368_v46, %v6360_v12  ;;  %v6373_v43 = vmul.f32 0.7978846, %v6371_v5 }
0x23e5   :  { %v6372_v28 = vmul.f32 0.7978846, %v6370_v53  ;;  %9685 = vtanh.f32 %v6373_v43 }
0x23e7   :  { %9687 = vtanh.f32 %v6372_v28 }
0x23f2   :  { %v9686_v27 = vpop.eup %9685 }
0x23f3   :  { %v6377_v30 = vadd.f32 1.0, %v9686_v27 }
0x23f4   :  { %v9688_v16 = vpop.eup %9687 }
0x23f5   :  { %v6376_v41 = vadd.f32 1.0, %v9688_v16  ;;  %v11250_v63 = vmul.f32 %v6377_v30, %v6363_v44 }
0x23f7   :  { %v11245_v11 = vmul.f32 %v6376_v41, %v6362_v8 }
0x23f9   :  { %8562 = vmatmul.mubr.msk.f32.vlgmr.msra.gmra.mxu1 %vm295_vm0, %v11245_v11 }
0x23fa   :  { %6476 = vmatprep.mubr.f32.mxu1 %v9947_v0 }
0x23fd   :  { %8563 = vmatmul.mubr.msk.f32.gmra.mxu1 %vm295_vm0, %v11250_v63 }
0x23fe   :  { %9356 = vmatprep.mubr.msk.f32.mxu1 %vm9953_vm1, %v9947_v0 }
0x24b9   :  { %v6472_v33 = vpop.f32.mrf.mxu1 }
0x24ba   :  { %v11263_v1 = vadd.f32 %v6472_v33, %v6393_v62 }
0x24bb   :  { %v6474_v57 = vpop.f32.mrf.mxu1 }
0x24bc   :  { %v6475_v38 = vadd.f32 %v6474_v57, %v6397_v20  ;;  %v6497_v19 = vmul.f32 %v11263_v1, %v10289_v34  ;;  %v6485_v17 = vmul.f32 %v11263_v1, %v10278_v23  ;;  %v9761_v23 = vld [vmem:[%s10034_s6] sm:$0xff]  ;;  %s11572_s6 = sld [smem:[#allocation45_spill]] }
0x24bd   :  { %v6478_v47 = vpop.f32.mrf.mxu1  ;;  %v6483_v7 = vmul.f32 %v9761_v23, %v11263_v1 }
0x24be   :  { %v6499_v31 = vmul.f32 %v9759_v55, %v6475_v38  ;;  %v11265_v2 = vadd.f32 %v6478_v47, %v6393_v62 }
0x24bf   :  { %v6480_v48 = vpop.f32.mrf.mxu1 }
0x24c0   :  { %v6481_v32 = vadd.f32 %v6480_v48, %v6397_v20  ;;  %6503 = vrot.lane.b32.xlu1 %v6499_v31, %s9949_s30  ;;  %v6498_v40 = vmul.f32 %v11265_v2, %v10291_v35  ;;  %v6486_v34 = vmul.f32 %v11265_v2, %v10295_v39  ;;  %v6484_v15 = vmul.f32 %v9762_v37, %v11265_v2 }
0x24c2   :  { %v6500_v60 = vmul.f32 %v9760_v56, %v6481_v32 }
0x24c4   :  { %6505 = vrot.lane.b32.xlu0 %v6500_v60, %s9949_s30 }
0x2532   :  { %v6504_v13 = vpop.permute.xlu1 %6503 }
0x2533   :  { %v6509_v36 = vadd.f32 %v6504_v13, %v6497_v19 }
0x2535   :  { %6528 = vrot.lane.b32.xlu0 %v6509_v36, %s9952_s13  ;;  %6526 = vrot.lane.b32.xlu1 %v6509_v36, %s9950_s5 }
0x2536   :  { %v6506_v3 = vpop.permute.xlu0 %6505 }
0x2537   :  { %v6510_v50 = vadd.f32 %v6506_v3, %v6498_v40 }
0x2539   :  { %6533 = vrot.lane.b32.xlu0 %v6510_v50, %s9950_s5  ;;  %6489 = vrot.lane.b32.xlu1 %v6485_v17, %s9949_s30 }
0x253d   :  { %6535 = vrot.lane.b32.xlu0 %v6510_v50, %s9952_s13  ;;  %6530 = vrot.lane.b32.xlu1 %v6509_v36, %s9951_s9 }
0x2541   :  { %6553 = vrot.lane.b32.xlu0 %v6509_v36, %s9948_s19  ;;  %6491 = vrot.lane.b32.xlu1 %v6486_v34, %s9949_s30  ;;  %s11575_s30 = sld [smem:[#allocation47_spill]] }
0x2545   :  { %6537 = vrot.lane.b32.xlu1 %v6510_v50, %s9951_s9 }
0x25a7   :  { %v6529_v35 = vpop.permute.xlu0 %6528  ;;  %v6527_v6 = vpop.permute.xlu1 %6526 }
0x25ab   :  { %v6534_v22 = vpop.permute.xlu0 %6533  ;;  %v6490_v51 = vpop.permute.xlu1 %6489 }
0x25ac   :  { %v6495_v61 = vadd.f32 %v6490_v51, %v6483_v7 }
0x25ae   :  { %6514 = vrot.lane.b32.xlu1 %v6495_v61, %s9952_s13  ;;  %6512 = vrot.lane.b32.xlu0 %v6495_v61, %s9950_s5 }
0x25af   :  { %v6536_v39 = vpop.permute.xlu0 %6535  ;;  %v6531_v9 = vpop.permute.xlu1 %6530 }
0x25b2   :  { %6857 = vrot.lane.b32.xlu1 %v6510_v50, %s9948_s19  ;;  %6516 = vrot.lane.b32.xlu0 %v6495_v61, %s9951_s9 }
0x25b3   :  { %v6554_v52 = vpop.permute.xlu0 %6553  ;;  %v6492_v59 = vpop.permute.xlu1 %6491 }
0x25b4   :  { %9340 = vmatpush3.xpose.msk.msra.mxu0 %vm467_vm2, %v6554_v52  ;;  %v6496_v26 = vadd.f32 %v6492_v59, %v6484_v15 }
0x25b5   :  { %9344 = vmatprep.subr.mxu0 %v9947_v0 }
0x25b6   :  { %6629 = vrot.lane.b32.xlu1 %v6527_v6, %s9948_s19  ;;  %6781 = vrot.lane.b32.xlu0 %v6531_v9, %s9948_s19 }
0x25b7   :  { %9342 = vmatmul.mubr.msk.f32.vlgmr.msra.gmra.mxu0 %vm467_vm2, %v6495_v61  ;;  %v6538_v4 = vpop.permute.xlu1 %6537 }
0x25b8   :  { %9346 = vmatprep.mubr.msk.f32.mxu0 %vm9953_vm1, %v9947_v0 }
0x25ba   :  { %6705 = vrot.lane.b32.xlu1 %v6529_v35, %s9948_s19  ;;  %6933 = vrot.lane.b32.xlu0 %v6534_v22, %s9948_s19 }
0x25be   :  { %6519 = vrot.lane.b32.xlu1 %v6496_v26, %s9950_s5  ;;  %7009 = vrot.lane.b32.xlu0 %v6536_v39, %s9948_s19 }
0x25c2   :  { %7085 = vrot.lane.b32.xlu1 %v6538_v4, %s9948_s19  ;;  %6521 = vrot.lane.b32.xlu0 %v6496_v26, %s9952_s13  ;;  %s11574_s19 = sld [smem:[#allocation48_spill]] }
0x25c6   :  { %6523 = vrot.lane.b32.xlu1 %v6496_v26, %s9951_s9 }
0x2620   :  { %v6515_v14 = vpop.permute.xlu1 %6514  ;;  %v6513_v10 = vpop.permute.xlu0 %6512 }
0x2624   :  { %v6858_v45 = vpop.permute.xlu1 %6857  ;;  %v6517_v24 = vpop.permute.xlu0 %6516 }
0x2628   :  { %v6630_v54 = vpop.permute.xlu1 %6629  ;;  %v6782_v58 = vpop.permute.xlu0 %6781 }
0x2629   :  { %9345 = vmatpush3.xpose.msk.msra.mxu0 %vm467_vm2, %v6630_v54  ;;  %9355 = vmatpush3.xpose.msk.msra.mxu1 %vm467_vm2, %v6782_v58 }
0x262a   :  { %9364 = vmatprep.subr.mxu1 %v9947_v0  ;;  %9349 = vmatprep.subr.mxu0 %v9947_v0 }
0x262c   :  { %v6706_v12 = vpop.permute.xlu1 %6705  ;;  %9357 = vmatmul.mubr.msk.f32.vlgmr.msra.gmra.mxu1 %vm467_vm2, %v6517_v24  ;;  %v6934_v49 = vpop.permute.xlu0 %6933  ;;  %9347 = vmatmul.mubr.msk.f32.vlgmr.msra.gmra.mxu0 %vm467_vm2, %v6513_v10 }
0x262d   :  { %9350 = vmatpush3.xpose.msk.msra.mxu0 %vm467_vm2, %v6706_v12  ;;  %9365 = vmatpush3.xpose.msk.msra.mxu1 %vm467_vm2, %v6934_v49 }
0x262e   :  { %9351 = vmatprep.mubr.msk.f32.mxu0 %vm9953_vm1, %v9947_v0  ;;  %9366 = vmatprep.mubr.msk.f32.mxu1 %vm9953_vm1, %v9947_v0 }
0x262f   :  { %9359 = vmatprep.subr.mxu0 %v9947_v0  ;;  %9374 = vmatprep.subr.mxu1 %v9947_v0 }
0x2630   :  { %v6520_v18 = vpop.permute.xlu1 %6519  ;;  %9352 = vmatmul.mubr.msk.f32.vlgmr.msra.gmra.mxu0 %vm467_vm2, %v6515_v14  ;;  %v7010_v29 = vpop.permute.xlu0 %7009 }
0x2631   :  { %9360 = vmatpush3.xpose.msk.msra.mxu0 %vm467_vm2, %v6858_v45  ;;  %9367 = vmatmul.mubr.msk.f32.vlgmr.msra.gmra.mxu1 %vm467_vm2, %v6520_v18 }
0x2632   :  { %9361 = vmatprep.mubr.msk.f32.mxu0 %vm9953_vm1, %v9947_v0  ;;  %9369 = vmatprep.subr.mxu0 %v9947_v0 }
0x2633   :  { %9376 = vmatprep.mubr.msk.f32.mxu1 %vm9953_vm1, %v9947_v0 }
0x2634   :  { %v7086_v21 = vpop.permute.xlu1 %7085  ;;  %9362 = vmatmul.mubr.msk.f32.vlgmr.msra.gmra.mxu0 %vm467_vm2, %v6496_v26  ;;  %v6522_v25 = vpop.permute.xlu0 %6521 }
0x2635   :  { %9370 = vmatpush3.xpose.msk.msra.mxu0 %vm467_vm2, %v7010_v29  ;;  %9375 = vmatpush3.xpose.msk.msra.mxu1 %vm467_vm2, %v7086_v21 }
0x2636   :  { %9371 = vmatprep.mubr.msk.f32.mxu0 %vm9953_vm1, %v9947_v0  ;;  %9379 = vmatprep.subr.mxu0 %v9947_v0 }
0x2637   :  { %9384 = vmatprep.subr.mxu1 %v9947_v0 }
0x2638   :  { %v6524_v46 = vpop.permute.xlu1 %6523  ;;  %9372 = vmatmul.mubr.msk.f32.vlgmr.msra.gmra.mxu0 %vm467_vm2, %v6522_v25 }
0x2639   :  { %9377 = vmatmul.mubr.msk.f32.vlgmr.msra.gmra.mxu1 %vm467_vm2, %v6524_v46  ;;  %9381 = vmatprep.mubr.msk.f32.mxu0 %vm9953_vm1, %v9947_v0 }
0x263a   :  { %9386 = vmatprep.mubr.msk.f32.mxu1 %vm9953_vm1, %v9947_v0 }
0x2677   :  { %v6625_v5 = vpop.f32.mrf.mxu0 }
0x2678   :  { %v7161_v53 = vsel %vm467_vm2, %v6625_v5, -inf }
0x2679   :  { %7162 = vmax.xlane.f32.xlu0 %v7161_v53  ;;  %v9343_v43 = vpop.f32.mrf.mxu0 }
0x26ec   :  { %v11342_v28 = vpop.f32.mrf.mxu0  ;;  %v6853_v27 = vpop.f32.mrf.mxu1 }
0x26ed   :  { %v7164_v16 = vsel %vm467_vm2, %v11342_v28, -inf  ;;  %v7170_v38 = vsel %vm467_vm2, %v6853_v27, -inf }
0x26ee   :  { %v9358_v8 = vpop.f32.mrf.mxu1  ;;  %7165 = vmax.xlane.f32.xlu1 %v7164_v16  ;;  %v9348_v41 = vpop.f32.mrf.mxu0 }
0x26f0   :  { %v6777_v30 = vpop.f32.mrf.mxu0 }
0x26f1   :  { %v7005_v44 = vpop.f32.mrf.mxu1  ;;  %v7167_v42 = vsel %vm467_vm2, %v6777_v30, -inf }
0x26f2   :  { %7168 = vmax.xlane.f32.xlu0 %v7167_v42  ;;  %v9353_v20 = vpop.f32.mrf.mxu0  ;;  %v7176_v32 = vsel %vm467_vm2, %v7005_v44, -inf }
0x26f3   :  { %v9368_v33 = vpop.f32.mrf.mxu1 }
0x26f4   :  { %v11347_v57 = vpop.f32.mrf.mxu0 }
0x26f5   :  { %v7173_v47 = vsel %vm467_vm2, %v11347_v57, -inf }
0x26f6   :  { %7171 = vmax.xlane.f32.xlu0 %v7170_v38  ;;  %7174 = vmax.xlane.f32.xlu1 %v7173_v47  ;;  %v9363_v55 = vpop.f32.mrf.mxu0 }
0x26f8   :  { %v11352_v31 = vpop.f32.mrf.mxu0 }
0x26f9   :  { %v7157_v48 = vpop.f32.mrf.mxu1  ;;  %v7179_v19 = vsel %vm467_vm2, %v11352_v31, -inf }
0x26fa   :  { %7177 = vmax.xlane.f32.xlu0 %v7176_v32  ;;  %v9373_v56 = vpop.f32.mrf.mxu0  ;;  %v7182_v62 = vsel %vm467_vm2, %v7157_v48, -inf }
0x26fb   :  { %v9378_v60 = vpop.f32.mrf.mxu1 }
0x26fe   :  { %7183 = vmax.xlane.f32.xlu0 %v7182_v62 }
0x2702   :  { %v7163_v13 = vpop.xlane.xlu0 %7162 }
0x2703   :  { %v7185_v23 = vsub.f32 %v6625_v5, %v7163_v13 }
0x2707   :  { %6540 = vrot.lane.b32.xlu1 %v11263_v1, %s9950_s5 }
0x270b   :  { %6544 = vrot.lane.b32.xlu1 %v11263_v1, %s9951_s9 }
0x2714   :  { %6542 = vrot.lane.b32.xlu0 %v11263_v1, %s9952_s13 }
0x2718   :  { %6549 = vrot.lane.b32.xlu0 %v11265_v2, %s9952_s13 }
0x272f   :  { %7180 = vmax.xlane.f32.xlu1 %v7179_v19 }
0x2740   :  { %6547 = vrot.lane.b32.xlu1 %v11265_v2, %s9950_s5  ;;  %s11576_s5 = sld [smem:[#allocation49_spill]] }
0x2744   :  { %6551 = vrot.lane.b32.xlu1 %v11265_v2, %s9951_s9 }
0x2748   :  { %7249 = vrot.lane.b32.xlu1 %v11263_v1, %s9954_s20  ;;  %v7193_v1 = vmul.f32 1.442695, %v7185_v23 }
0x274a   :  { %9689 = vpow2.f32 %v7193_v1 }
0x2757   :  { %v9690_v37 = vpop.eup %9689 }
0x2758   :  { %v7209_v15 = vsel %vm467_vm2, %v9690_v37, 0.0 }
0x2777   :  { %v7166_v36 = vpop.xlane.xlu1 %7165 }
0x2778   :  { %v7186_v21 = vsub.f32 %v11342_v28, %v7166_v36 }
0x277a   :  { %v7195_v25 = vmul.f32 1.442695, %v7186_v21 }
0x277b   :  { %v7169_v40 = vpop.xlane.xlu0 %7168 }
0x277c   :  { %v7187_v51 = vsub.f32 %v6777_v30, %v7169_v40 }
0x277e   :  { %v7197_v39 = vmul.f32 1.442695, %v7187_v51 }
0x277f   :  { %v7172_v3 = vpop.xlane.xlu0 %7171  ;;  %v7175_v50 = vpop.xlane.xlu1 %7174 }
0x2780   :  { %v7188_v22 = vsub.f32 %v6853_v27, %v7172_v3  ;;  %v7189_v46 = vsub.f32 %v11347_v57, %v7175_v50 }
0x2782   :  { %v7199_v61 = vmul.f32 1.442695, %v7188_v22  ;;  %v7201_v53 = vmul.f32 1.442695, %v7189_v46 }
0x2783   :  { %v7178_v17 = vpop.xlane.xlu0 %7177  ;;  %v6541_v34 = vpop.permute.xlu1 %6540 }
0x2784   :  { %7325 = vrot.lane.b32.xlu0 %v6541_v34, %s9954_s20  ;;  %9691 = vpow2.f32 %v7199_v61  ;;  %v7190_v9 = vsub.f32 %v7005_v44, %v7178_v17 }
0x2785   :  { %9693 = vpow2.f32 %v7197_v39 }
0x2786   :  { %v7203_v52 = vmul.f32 1.442695, %v7190_v9 }
0x2787   :  { %v7184_v35 = vpop.xlane.xlu0 %7183  ;;  %v6545_v7 = vpop.permute.xlu1 %6544 }
0x2788   :  { %7553 = vrot.lane.b32.xlu0 %v11265_v2, %s9954_s20  ;;  %v7192_v59 = vsub.f32 %v7157_v48, %v7184_v35  ;;  %9695 = vpow2.f32 %v7203_v52 }
0x278a   :  { %v7207_v2 = vmul.f32 1.442695, %v7192_v59 }
0x278b   :  { %v6543_v6 = vpop.permute.xlu0 %6542 }
0x278c   :  { %7401 = vrot.lane.b32.xlu1 %v6543_v6, %s9954_s20  ;;  %9697 = vpow2.f32 %v7207_v2 }
0x278d   :  { %9699 = vpow2.f32 %v7195_v25 }
0x278e   :  { %9701 = vpow2.f32 %v7201_v53 }
0x278f   :  { %v6550_v5 = vpop.permute.xlu0 %6549 }
0x2790   :  { %7477 = vrot.lane.b32.xlu1 %v6545_v7, %s9954_s20 }
0x2791   :  { %v11378_v26 = vpop.eup %9691 }
0x2792   :  { %v7218_v4 = vsel %vm467_vm2, %v11378_v26, 0.0  ;;  %v9694_v14 = vpop.eup %9693 }
0x2793   :  { %v7215_v10 = vsel %vm467_vm2, %v9694_v14, 0.0 }
0x2795   :  { %v11383_v45 = vpop.eup %9695 }
0x2796   :  { %v7224_v24 = vsel %vm467_vm2, %v11383_v45, 0.0 }
0x2799   :  { %v11387_v54 = vpop.eup %9697 }
0x279a   :  { %v7230_v58 = vsel %vm467_vm2, %v11387_v54, 0.0  ;;  %v9700_v16 = vpop.eup %9699 }
0x279b   :  { %v7212_v8 = vsel %vm467_vm2, %v9700_v16, 0.0  ;;  %v9702_v41 = vpop.eup %9701 }
0x279c   :  { %v7221_v28 = vsel %vm467_vm2, %v9702_v41, 0.0 }
0x27a7   :  { %7210 = vadd.xlane.f32.xlu0 %v7209_v15  ;;  %v7890_v15 = vld [vmem:[%s11572_s6 + $0x18] sm:$0xff] }
0x27ab   :  { %7219 = vadd.xlane.f32.xlu0 %v7218_v4  ;;  %v7888_v4 = vld [vmem:[%s11572_s6 + $0x8] sm:$0xff] }
0x27af   :  { %7216 = vadd.xlane.f32.xlu0 %v7215_v10  ;;  %v7887_v10 = vld [vmem:[%s11572_s6] sm:$0xff] }
0x27b3   :  { %7225 = vadd.xlane.f32.xlu0 %v7224_v24 }
0x27b7   :  { %7231 = vadd.xlane.f32.xlu0 %v7230_v58 }
0x27b8   :  { %v7181_v12 = vpop.xlane.xlu1 %7180 }
0x27b9   :  { %v7191_v43 = vsub.f32 %v11352_v31, %v7181_v12 }
0x27bb   :  { %v7205_v27 = vmul.f32 1.442695, %v7191_v43 }
0x27bc   :  { %v6548_v49 = vpop.permute.xlu1 %6547 }
0x27bd   :  { %7629 = vrot.lane.b32.xlu1 %v6548_v49, %s9954_s20  ;;  %9703 = vpow2.f32 %v7205_v27 }
0x27c0   :  { %v6552_v18 = vpop.permute.xlu1 %6551 }
0x27c4   :  { %v7250_v29 = vpop.permute.xlu1 %7249 }
0x27c5   :  { %9380 = vmatpush3.msra.mxu0 %v7250_v29 }
0x27c6   :  { %9389 = vmatprep.subr.mxu0 %v9947_v0 }
0x27ca   :  { %v9704_v30 = vpop.eup %9703 }
0x27cb   :  { %v7227_v44 = vsel %vm467_vm2, %v9704_v30, 0.0 }
0x27cd   :  { %7705 = vrot.lane.b32.xlu0 %v6550_v5, %s9954_s20 }
0x27e1   :  { %7213 = vadd.xlane.f32.xlu1 %v7212_v8 }
0x27e5   :  { %7222 = vadd.xlane.f32.xlu1 %v7221_v28 }
0x27e9   :  { %7228 = vadd.xlane.f32.xlu1 %v7227_v44 }
0x27f6   :  { %v7326_v42 = vpop.permute.xlu0 %7325 }
0x27f7   :  { %9385 = vmatpush3.msra.mxu1 %v7326_v42 }
0x27f8   :  { %9394 = vmatprep.subr.mxu1 %v9947_v0 }
0x27fa   :  { %7781 = vrot.lane.b32.xlu1 %v6552_v18, %s9954_s20  ;;  %v7554_v20 = vpop.permute.xlu0 %7553 }
0x27fe   :  { %v7402_v31 = vpop.permute.xlu1 %7401 }
0x2802   :  { %v7478_v56 = vpop.permute.xlu1 %7477 }
0x282f   :  { %v7630_v60 = vpop.permute.xlu1 %7629 }
0x2830   :  { %v7211_v33 = vpop.xlane.xlu0 %7210 }
0x2831   :  { %9705 = vrcp.f32 %v7211_v33  ;;  %v8588_v33 = vld [vmem:[%s11573_s12] ss:$0 sm:$0xff] }
0x2834   :  { %v7220_v57 = vpop.xlane.xlu0 %7219 }
0x2838   :  { %v7217_v38 = vpop.xlane.xlu0 %7216 }
0x2839   :  { %9707 = vrcp.f32 %v7217_v38 }
0x283c   :  { %v7226_v19 = vpop.xlane.xlu0 %7225 }
0x283e   :  { %v9706_v47 = vpop.eup %9705 }
0x283f   :  { %v7241_v55 = vmul.f32 %v9706_v47, %v9690_v37 }
0x2840   :  { %v7232_v36 = vpop.xlane.xlu0 %7231 }
0x2841   :  { %9382 = vmatmul.mubr.msk.f32.vlgmr.msra.gmra.mxu0 %vm467_vm2, %v7241_v55 }
0x2842   :  { %9390 = vmatpush3.msra.mxu0 %v7402_v31  ;;  %9391 = vmatprep.mubr.msk.f32.mxu0 %vm9953_vm1, %v9947_v0 }
0x2843   :  { %9399 = vmatprep.subr.mxu0 %v9947_v0 }
0x2844   :  { %v7706_v7 = vpop.permute.xlu0 %7705 }
0x2846   :  { %v9708_v48 = vpop.eup %9707 }
0x2847   :  { %v7243_v32 = vmul.f32 %v9708_v48, %v9694_v14 }
0x2849   :  { %9392 = vmatmul.mubr.msk.f32.vlgmr.msra.gmra.mxu0 %vm467_vm2, %v7243_v32 }
0x284a   :  { %9400 = vmatpush3.msra.mxu0 %v7554_v20  ;;  %9401 = vmatprep.mubr.msk.f32.mxu0 %vm9953_vm1, %v9947_v0 }
0x284b   :  { %9409 = vmatprep.subr.mxu0 %v9947_v0 }
0x286a   :  { %v7214_v62 = vpop.xlane.xlu1 %7213 }
0x286b   :  { %9709 = vrcp.f32 %v7214_v62 }
0x286c   :  { %9711 = vrcp.f32 %v7220_v57 }
0x286e   :  { %v7223_v13 = vpop.xlane.xlu1 %7222 }
0x286f   :  { %9713 = vrcp.f32 %v7223_v13 }
0x2870   :  { %9715 = vrcp.f32 %v7226_v19 }
0x2872   :  { %v7229_v40 = vpop.xlane.xlu1 %7228 }
0x2873   :  { %9717 = vrcp.f32 %v7229_v40 }
0x2874   :  { %9719 = vrcp.f32 %v7232_v36 }
0x2876   :  { %v7782_v39 = vpop.permute.xlu1 %7781 }
0x2878   :  { %v9710_v3 = vpop.eup %9709 }
0x2879   :  { %v7242_v50 = vmul.f32 %v9710_v3, %v9700_v16  ;;  %v9712_v17 = vpop.eup %9711 }
0x287a   :  { %v7244_v35 = vmul.f32 %v9712_v17, %v11378_v26  ;;  %v7889_v26 = vld [vmem:[%s11572_s6 + $0x10] sm:$0xff]  ;;  %v8028_v17 = vld [vmem:[%s11574_s19 + $0x18] sm:$0xff] }
0x287b   :  { %9387 = vmatmul.mubr.msk.f32.vlgmr.msra.gmra.mxu1 %vm467_vm2, %v7242_v50 }
0x287c   :  { %v9714_v34 = vpop.eup %9713  ;;  %9395 = vmatpush3.msra.mxu1 %v7478_v56  ;;  %9396 = vmatprep.mubr.msk.f32.mxu1 %vm9953_vm1, %v9947_v0 }
0x287d   :  { %9404 = vmatprep.subr.mxu1 %v9947_v0  ;;  %v7245_v6 = vmul.f32 %v9714_v34, %v9702_v41  ;;  %v9716_v23 = vpop.eup %9715  ;;  %v8027_v34 = vld [vmem:[%s11574_s19 + $0x10] sm:$0xff] }
0x287e   :  { %v7246_v22 = vmul.f32 %v9716_v23, %v11383_v45 }
0x287f   :  { %9397 = vmatmul.mubr.msk.f32.vlgmr.msra.gmra.mxu1 %vm467_vm2, %v7244_v35  ;;  %9402 = vmatmul.mubr.msk.f32.vlgmr.msra.gmra.mxu0 %vm467_vm2, %v7245_v6  ;;  %v8026_v35 = vld [vmem:[%s11574_s19 + $0x8] sm:$0xff]  ;;  %v8025_v6 = vld [vmem:[%s11574_s19] sm:$0xff] }
0x2880   :  { %v9718_v1 = vpop.eup %9717  ;;  %9405 = vmatpush3.msra.mxu1 %v7630_v60  ;;  %9410 = vmatpush3.msra.mxu0 %v7706_v7 }
0x2881   :  { %9406 = vmatprep.mubr.msk.f32.mxu1 %vm9953_vm1, %v9947_v0  ;;  %9411 = vmatprep.mubr.msk.f32.mxu0 %vm9953_vm1, %v9947_v0  ;;  %v7247_v51 = vmul.f32 %v9718_v1, %v9704_v30  ;;  %v9720_v61 = vpop.eup %9719 }
0x2882   :  { %9414 = vmatprep.subr.mxu1 %v9947_v0  ;;  %v7248_v9 = vmul.f32 %v9720_v61, %v11387_v54  ;;  %9419 = vmatprep.subr.mxu0 %v7890_v15 }
0x2883   :  { %9407 = vmatmul.mubr.msk.f32.vlgmr.msra.gmra.mxu1 %vm467_vm2, %v7246_v22  ;;  %9412 = vmatmul.mubr.msk.f32.vlgmr.msra.gmra.mxu0 %vm467_vm2, %v7247_v51 }
0x2884   :  { %9415 = vmatpush3.msra.mxu1 %v7782_v39  ;;  %9416 = vmatprep.mubr.msk.f32.mxu1 %vm9953_vm1, %v9947_v0 }
0x2885   :  { %9420 = vmatpush3.msra.mxu0 %v7890_v15  ;;  %9430 = vmatprep.subr.mxu1 %v8028_v17 }
0x2886   :  { %9421 = vmatprep.subr.mxu0 %v7889_v26 }
0x2887   :  { %9417 = vmatmul.mubr.msk.f32.vlgmr.msra.gmra.mxu1 %vm467_vm2, %v7248_v9  ;;  %9422 = vmatpush3.msra.mxu0 %v7889_v26  ;;  %v8591_v9 = vld [vmem:[%s11575_s30] ss:$0 sm:$0xff] }
0x2888   :  { %9423 = vmatprep.subr.mxu0 %v7888_v4  ;;  %9431 = vmatpush3.msra.mxu1 %v8028_v17 }
0x2889   :  { %9424 = vmatpush3.msra.mxu0 %v7888_v4  ;;  %9432 = vmatprep.subr.mxu1 %v8027_v34 }
0x288a   :  { %9425 = vmatprep.subr.mxu0 %v7887_v10  ;;  %9433 = vmatpush3.msra.mxu1 %v8027_v34 }
0x288b   :  { %9426 = vmatpush3.msra.mxu0 %v7887_v10  ;;  %9434 = vmatprep.subr.mxu1 %v8026_v35  ;;  %v8142_v10 = vld [vmem:[%s11576_s5 + $0x38] sm:$0xff] }
0x288c   :  { %9435 = vmatpush3.msra.mxu1 %v8026_v35  ;;  %9441 = vmatprep.subr.mxu0 %v8142_v10 }
0x288d   :  { %9436 = vmatprep.subr.mxu1 %v8025_v6 }
0x288e   :  { %9437 = vmatpush3.msra.mxu1 %v8025_v6 }
0x288f   :  { %9460 = vmatprep.subr.mxu1 %v9947_v0 }
0x2901   :  { %v7321_v52 = vpop.f32.mrf.mxu0 }
0x2903   :  { %v9383_v59 = vpop.f32.mrf.mxu0 }
0x2904   :  { %v8592_v59 = vld [vmem:[#allocation2] ss:$0 sm:$0xff] }
0x2909   :  { %v7473_v2 = vpop.f32.mrf.mxu0 }
0x290a   :  { %7862 = vrot.lane.b32.xlu1 %v7473_v2, %s9955_s2 }
0x290b   :  { %v9393_v37 = vpop.f32.mrf.mxu0 }
0x293b   :  { %v7397_v14 = vpop.f32.mrf.mxu1 }
0x293c   :  { %7858 = vrot.lane.b32.xlu0 %v7397_v14, %s9956_s0 }
0x293d   :  { %v9388_v45 = vpop.f32.mrf.mxu1 }
0x293e   :  { %v8141_v45 = vld [vmem:[%s11576_s5 + $0x30] sm:$0xff] }
0x293f   :  { %v7549_v24 = vpop.f32.mrf.mxu1  ;;  %v7625_v54 = vpop.f32.mrf.mxu0 }
0x2940   :  { %7866 = vrot.lane.b32.xlu1 %v7549_v24, %s9957_s7  ;;  %v8140_v24 = vld [vmem:[%s11576_s5 + $0x28] sm:$0xff] }
0x2941   :  { %v9398_v58 = vpop.f32.mrf.mxu1  ;;  %v9403_v12 = vpop.f32.mrf.mxu0 }
0x2942   :  { %v8138_v58 = vld [vmem:[%s11576_s5 + $0x18] sm:$0xff]  ;;  %v8137_v12 = vld [vmem:[%s11576_s5 + $0x10] sm:$0xff] }
0x2943   :  { %v7701_v49 = vpop.f32.mrf.mxu1  ;;  %v7777_v18 = vpop.f32.mrf.mxu0 }
0x2944   :  { %7873 = vrot.lane.b32.xlu0 %v7701_v49, %s9956_s0  ;;  %v8136_v49 = vld [vmem:[%s11576_s5 + $0x8] sm:$0xff] }
0x2945   :  { %v9408_v29 = vpop.f32.mrf.mxu1  ;;  %v9413_v21 = vpop.f32.mrf.mxu0 }
0x2946   :  { %v8593_v29 = vld [vmem:[#allocation5] ss:$0 sm:$0xff] }
0x2947   :  { %v7853_v25 = vpop.f32.mrf.mxu1 }
0x2948   :  { %7881 = vrot.lane.b32.xlu1 %v7853_v25, %s9957_s7  ;;  %7877 = vrot.lane.b32.xlu0 %v7777_v18, %s9955_s2  ;;  %v8135_v18 = vld [vmem:[%s11576_s5] sm:$0xff] }
0x2949   :  { %v9418_v46 = vpop.f32.mrf.mxu1 }
0x297c   :  { %v7863_v5 = vpop.permute.xlu1 %7862 }
0x29ae   :  { %v7859_v53 = vpop.permute.xlu0 %7858 }
0x29af   :  { %v7869_v43 = vsel %vm467_vm2, %v7321_v52, %v7859_v53 }
0x29b0   :  { %v7870_v27 = vsel %vm1783_vm3, %v7869_v43, %v7863_v5 }
0x29b2   :  { %v7867_v16 = vpop.permute.xlu1 %7866 }
0x29b3   :  { %v7871_v8 = vsel %vm1785_vm4, %v7870_v27, %v7867_v16 }
0x29b4   :  { %9427 = vmatprep.mubr.msk.f32.mxu0 %vm295_vm0, %v7871_v8 }
0x29b6   :  { %v7874_v41 = vpop.permute.xlu0 %7873 }
0x29b7   :  { %v7884_v28 = vsel %vm467_vm2, %v7625_v54, %v7874_v41  ;;  %v8139_v54 = vld [vmem:[%s11576_s5 + $0x20] sm:$0xff] }
0x29ba   :  { %v7882_v30 = vpop.permute.xlu1 %7881  ;;  %v7878_v44 = vpop.permute.xlu0 %7877 }
0x29bb   :  { %v7885_v42 = vsel %vm1783_vm3, %v7884_v28, %v7878_v44 }
0x29bc   :  { %v7886_v20 = vsel %vm1785_vm4, %v7885_v42, %v7882_v30 }
0x29bd   :  { %9428 = vmatmul.mubr.msk.f32.vlgmr.msra.gmra.mxu0 %vm295_vm0, %v7886_v20 }
0x29be   :  { %9442 = vmatpush3.msra.mxu0 %v8142_v10 }
0x29bf   :  { %9443 = vmatprep.subr.mxu0 %v8141_v45 }
0x29c0   :  { %9444 = vmatpush3.msra.mxu0 %v8141_v45  ;;  %v8600_v45 = vld [vmem:[#allocation10] ss:$0 sm:$0xff] }
0x29c1   :  { %9445 = vmatprep.subr.mxu0 %v8140_v24 }
0x29c2   :  { %9446 = vmatpush3.msra.mxu0 %v8140_v24 }
0x29c3   :  { %9447 = vmatprep.subr.mxu0 %v8139_v54 }
0x29c4   :  { %9448 = vmatpush3.msra.mxu0 %v8139_v54 }
0x29c5   :  { %9449 = vmatprep.subr.mxu0 %v8138_v58 }
0x29c6   :  { %9450 = vmatpush3.msra.mxu0 %v8138_v58 }
0x29c7   :  { %9451 = vmatprep.subr.mxu0 %v8137_v12 }
0x29c8   :  { %9452 = vmatpush3.msra.mxu0 %v8137_v12 }
0x29c9   :  { %9453 = vmatprep.subr.mxu0 %v8136_v49 }
0x29ca   :  { %9454 = vmatpush3.msra.mxu0 %v8136_v49 }
0x29cb   :  { %9455 = vmatprep.subr.mxu0 %v8135_v18 }
0x29cc   :  { %9456 = vmatpush3.msra.mxu0 %v8135_v18 }
0x2a7d   :  { %v9429_v57 = vpop.f32.mrf.mxu0 }
0x2a7e   :  { %v7976_v38 = vadd.f32 %v9429_v57, %v8588_v33 }
0x2a7f   :  { %v7970_v47 = vpop.f32.mrf.mxu0 }
0x2a80   :  { %v7980_v55 = vadd.f32 %v7976_v38, %v11250_v63  ;;  %v7971_v31 = vadd.f32 %v8588_v33, %v7970_v47 }
0x2a82   :  { %v7979_v48 = vadd.f32 %v7971_v31, %v11245_v11  ;;  %v7986_v32 = vsel %vm295_vm0, %v7980_v55, 0.0 }
0x2a83   :  { %7987 = vadd.xlane.f32.xlu1 %v7986_v32  ;;  %v8596_v32 = vld [vmem:[#allocation7] ss:$0 sm:$0xff] }
0x2a84   :  { %v7983_v56 = vsel %vm295_vm0, %v7979_v48, 0.0 }
0x2a85   :  { %7984 = vadd.xlane.f32.xlu0 %v7983_v56 }
0x2b0c   :  { %v7988_v60 = vpop.xlane.xlu1 %7987 }
0x2b0d   :  { %v7990_v62 = vmul.f32 0.03125, %v7988_v60 }
0x2b0e   :  { %v7985_v19 = vpop.xlane.xlu0 %7984 }
0x2b0f   :  { %v7989_v13 = vmul.f32 0.03125, %v7985_v19  ;;  %v7992_v36 = vsub.f32 %v7980_v55, %v7990_v62 }
0x2b11   :  { %v7991_v40 = vsub.f32 %v7979_v48, %v7989_v13  ;;  %v7994_v11 = vmul.f32 %v7992_v36, %v7992_v36 }
0x2b13   :  { %v7993_v63 = vmul.f32 %v7991_v40, %v7991_v40  ;;  %v7998_v50 = vsel %vm295_vm0, %v7994_v11, 0.0 }
0x2b15   :  { %v7995_v3 = vsel %vm295_vm0, %v7993_v63, 0.0 }
0x2b16   :  { %7996 = vadd.xlane.f32.xlu0 %v7995_v3 }
0x2b1a   :  { %7999 = vadd.xlane.f32.xlu0 %v7998_v50 }
0x2b9f   :  { %v7997_v23 = vpop.xlane.xlu0 %7996 }
0x2ba0   :  { %v8001_v7 = vmul.f32 0.03125, %v7997_v23 }
0x2ba2   :  { %v8003_v1 = vadd.f32 1e-05, %v8001_v7 }
0x2ba3   :  { %v8000_v22 = vpop.xlane.xlu0 %7999 }
0x2ba4   :  { %9721 = vrsqrt.f32 %v8003_v1  ;;  %v8002_v51 = vmul.f32 0.03125, %v8000_v22  ;;  %v8288_v22 = vld [vmem:[%s10214_s4 + $0x18] sm:$0xff] }
0x2ba6   :  { %v8004_v61 = vadd.f32 1e-05, %v8002_v51  ;;  %v8287_v51 = vld [vmem:[%s10214_s4 + $0x10] sm:$0xff] }
0x2ba8   :  { %9723 = vrsqrt.f32 %v8004_v61  ;;  %v8286_v61 = vld [vmem:[%s10214_s4 + $0x8] sm:$0xff] }
0x2bb1   :  { %v9722_v39 = vpop.eup %9721 }
0x2bb2   :  { %v8007_v52 = vmul.f32 %v9722_v39, %v7991_v40  ;;  %v8285_v39 = vld [vmem:[%s10214_s4] sm:$0xff]  ;;  %s9960_s4 = smov [#allocation11]  }
0x2bb3   :  { %s8376_s9 = sshll.u32 %s9960_s4, 4  ;;  %s8377_s9 = int_to_ptr.vmem [resolvable:$true] %s8376_s9 }
0x2bb4   :  { %v8015_v2 = vmul.f32 %v8591_v9, %v8007_v52  ;;  %s9863_s13 = scalar_lea.vmem %s8377_s9, 32  ;;  %p9868_p12 = scmp.lt.s32.totalorder %s8377_s9, %s8377_s9 }
0x2bb5   :  { %v9724_v37 = vpop.eup %9723  ;;  %p9864_p11 = scmp.ne.s32.totalorder %s8377_s9, %s9863_s13  ;;  %p9869_p13 = scmp.lt.s32.totalorder %s9863_s13, %s9863_s13 }
0x2bb6   :  { %v8008_v15 = vmul.f32 %v9724_v37, %v7992_v36  ;;  %v11460_v26 = vadd.f32 %v8592_v59, %v8015_v2 }
0x2bb7   :  { %p9870_p0 = por %p9869_p13, %p9868_p12 }
0x2bb8   :  { %v8016_v4 = vmul.f32 %v8591_v9, %v8008_v15  ;;  %9438 = vmatprep.mubr.msk.f32.mxu1 %vm295_vm0, %v11460_v26 }
0x2bb9   :  { %p9871_p1 = pnand %p9870_p0, %p9864_p11 }
0x2bba   :  { %v8024_v14 = vadd.f32 %v8592_v59, %v8016_v4  ;;  %v8599_v4 = vld [vmem:[#allocation8] ss:$0 sm:$0xff] }
0x2bbc   :  { %9439 = vmatmul.mubr.msk.f32.vlgmr.msra.gmra.mxu1 %vm295_vm0, %v8024_v14 }
0x2bbd   :  { %9468 = vmatprep.mubr.msk.f32.mxu1 %vm9953_vm1, %v9947_v0  ;;  %9461 = vmatpush3.msra.mxu1 %v8288_v22 }
0x2bbe   :  { %9462 = vmatprep.subr.mxu1 %v9947_v0 }
0x2bbf   :  { %9463 = vmatpush3.msra.mxu1 %v8287_v51 }
0x2bc0   :  { %9464 = vmatprep.subr.mxu1 %v9947_v0 }
0x2bc1   :  { %9465 = vmatpush3.msra.mxu1 %v8286_v61 }
0x2bc2   :  { %9466 = vmatprep.subr.mxu1 %v9947_v0 }
0x2bc3   :  { %9467 = vmatpush3.msra.mxu1 %v8285_v39 }
0x2c7c   :  { %v9440_v21 = vpop.f32.mrf.mxu1 }
0x2c7d   :  { %v8114_v25 = vadd.f32 %v9440_v21, %v8593_v29  ;;  %v8601_v21 = vld [vmem:[%s10219_s8] ss:$0 sm:$0xff] }
0x2c7e   :  { %v8108_v46 = vpop.f32.mrf.mxu1 }
0x2c7f   :  { %v8120_v5 = vmul.f32 0.044715, %v8114_v25  ;;  %v8109_v53 = vadd.f32 %v8593_v29, %v8108_v46  ;;  %v8118_v55 = vmul.f32 0.5, %v8114_v25 }
0x2c81   :  { %v8122_v43 = vmul.f32 %v8120_v5, %v8114_v25  ;;  %v8119_v27 = vmul.f32 0.044715, %v8109_v53  ;;  %v8117_v38 = vmul.f32 0.5, %v8109_v53 }
0x2c83   :  { %v8124_v16 = vmul.f32 %v8122_v43, %v8114_v25  ;;  %v8121_v8 = vmul.f32 %v8119_v27, %v8109_v53 }
0x2c85   :  { %v8126_v41 = vadd.f32 %v8124_v16, %v8114_v25  ;;  %v8123_v28 = vmul.f32 %v8121_v8, %v8109_v53 }
0x2c87   :  { %v8128_v30 = vmul.f32 0.7978846, %v8126_v41  ;;  %v8125_v44 = vadd.f32 %v8123_v28, %v8109_v53 }
0x2c89   :  { %9725 = vtanh.f32 %v8128_v30  ;;  %v8127_v42 = vmul.f32 0.7978846, %v8125_v44 }
0x2c8b   :  { %9727 = vtanh.f32 %v8127_v42 }
0x2c96   :  { %v9726_v20 = vpop.eup %9725 }
0x2c97   :  { %v8132_v57 = vadd.f32 1.0, %v9726_v20 }
0x2c98   :  { %v9728_v33 = vpop.eup %9727 }
0x2c99   :  { %v8131_v47 = vadd.f32 1.0, %v9728_v33  ;;  %v8134_v48 = vmul.f32 %v8132_v57, %v8118_v55 }
0x2c9b   :  { %v8133_v31 = vmul.f32 %v8131_v47, %v8117_v38 }
0x2c9d   :  { %9457 = vmatprep.mubr.msk.f32.mxu0 %vm2066_vm5, %v8133_v31 }
0x2c9e   :  { %9458 = vmatmul.mubr.msk.f32.vlgmr.msra.gmra.mxu0 %vm2066_vm5, %v8134_v48 }
0x2d5e   :  { %v9459_v56 = vpop.f32.mrf.mxu0 }
0x2d5f   :  { %v8228_v60 = vadd.f32 %v9459_v56, %v8596_v32 }
0x2d60   :  { %v8222_v62 = vpop.f32.mrf.mxu0 }
0x2d61   :  { %v8232_v19 = vadd.f32 %v8228_v60, %v8024_v14  ;;  %v8223_v13 = vadd.f32 %v8596_v32, %v8222_v62 }
0x2d63   :  { %v8231_v36 = vadd.f32 %v8223_v13, %v11460_v26  ;;  %v8238_v40 = vsel %vm295_vm0, %v8232_v19, 0.0 }
0x2d64   :  { %8239 = vadd.xlane.f32.xlu0 %v8238_v40 }
0x2d65   :  { %v8235_v63 = vsel %vm295_vm0, %v8231_v36, 0.0 }
0x2d66   :  { %8236 = vadd.xlane.f32.xlu1 %v8235_v63 }
0x2ded   :  { %v8240_v3 = vpop.xlane.xlu0 %8239 }
0x2dee   :  { %v8242_v11 = vmul.f32 0.03125, %v8240_v3 }
0x2def   :  { %v8237_v50 = vpop.xlane.xlu1 %8236 }
0x2df0   :  { %v8244_v17 = vsub.f32 %v8232_v19, %v8242_v11  ;;  %v8241_v34 = vmul.f32 0.03125, %v8237_v50 }
0x2df2   :  { %v8243_v35 = vsub.f32 %v8231_v36, %v8241_v34  ;;  %v8246_v6 = vmul.f32 %v8244_v17, %v8244_v17 }
0x2df4   :  { %v8250_v23 = vsel %vm295_vm0, %v8246_v6, 0.0  ;;  %v8245_v7 = vmul.f32 %v8243_v35, %v8243_v35 }
0x2df5   :  { %8251 = vadd.xlane.f32.xlu0 %v8250_v23 }
0x2df6   :  { %v8247_v1 = vsel %vm295_vm0, %v8245_v7, 0.0 }
0x2df7   :  { %8248 = vadd.xlane.f32.xlu1 %v8247_v1 }
0x2e7e   :  { %v8252_v9 = vpop.xlane.xlu0 %8251 }
0x2e7f   :  { %v8254_v52 = vmul.f32 0.03125, %v8252_v9 }
0x2e80   :  { %v8249_v59 = vpop.xlane.xlu1 %8248 }
0x2e81   :  { %v8256_v2 = vadd.f32 1e-05, %v8254_v52  ;;  %v8253_v37 = vmul.f32 0.03125, %v8249_v59 }
0x2e83   :  { %9729 = vrsqrt.f32 %v8256_v2  ;;  %v8255_v15 = vadd.f32 1e-05, %v8253_v37 }
0x2e85   :  { %9731 = vrsqrt.f32 %v8255_v15 }
0x2e90   :  { %v9730_v26 = vpop.eup %9729 }
0x2e91   :  { %v8260_v14 = vmul.f32 %v9730_v26, %v8244_v17 }
0x2e92   :  { %v9732_v10 = vpop.eup %9731 }
0x2e93   :  { %v8259_v24 = vmul.f32 %v9732_v10, %v8243_v35  ;;  %v8268_v54 = vmul.f32 %v8599_v4, %v8260_v14 }
0x2e95   :  { %v8267_v58 = vmul.f32 %v8599_v4, %v8259_v24  ;;  %v8276_v12 = vadd.f32 %v8600_v45, %v8268_v54 }
0x2e97   :  { %v8275_v0 = vadd.f32 %v8600_v45, %v8267_v58  ;;  %v8281_v18 = vrot.slane %v8276_v12, 6 }
0x2e99   :  { %v8278_v49 = vrot.slane %v8275_v0, 7 }
0x2e9b   :  { %v8284_v29 = vsel %vm8283_vm7, %v8278_v49, %v8281_v18 }
0x2e9c   :  { %9469 = vmatmul.mubr.msk.f32.vlgmr.msra.gmra.mxu1 %vm295_vm0, %v8284_v29 }
0x2f5c   :  { %v8365_v25 = vpop.f32.mrf.mxu1 }
0x2f5d   :  { %v8366_v46 = vadd.f32 %v8601_v21, %v8365_v25 }
0x2f5e   :  { %v9470_v5 = vpop.f32.mrf.mxu1 }
0x2f5f   :  { %8369 = vst [vmem:[#allocation11] sm:$0x3] %v8366_v46 }
0x2f60   :  { %9874 = shalt.err (!%p9871_p1)
}
0x2f61   :  { %8379 = dma.vmem_to_hbm [thread:$0]  %s8377_s9, 32, %s10224_s14, [#allocation4]  }
0x2f62   :  { %9889 = dma.done.wait [#allocation4], 32  }
0x2f63   :  { %9890 = vsyncadd [#allocation4], 4294967264 }
0x2f64   :  { %8383 = vsyncpa [#allocation3], 1 }
0x2f65   :  { %8384 = vsyncpa [#allocation6], 1 }
0x2f66   :  { %8385 = vsyncpa [#allocation9], 1 }
0x2f67   :  { %8386 = vsyncpa [#allocation4], 1 }

</bundles_post_ra>
